<compile_context>
chip_gen: v7x
topology: tpu7x:2x2x1
jax: 0.10.0
libtpu: 0.0.40
codegen_flags: <defaults>
</compile_context>

<pallas_src>
import numpy as np
import jax
import jax.numpy as jnp
from jax import lax
from jax.experimental import pallas as pl
from jax.experimental.pallas import tpu as pltpu

_GATES = ('i', 'f', 'g', 'o')      # torch LSTM gate chunk order


def _sigmoid(x):
    return 1.0 / (1.0 + jnp.exp(-x))


def _pack_params(blocks, width=128, align=8):
    """Pack small 2D f32 arrays into one (rows, width) slab.

    Returns (slab, {name: (row_offset, (h, w))}); every block starts at an
    8-aligned row so in-kernel loads are sublane-aligned static slices.
    """
    offs, parts, r = {}, [], 0
    for name, a in blocks:
        a = np.asarray(a, np.float32)
        assert a.ndim == 2 and a.shape[1] <= width, name
        h, w = a.shape
        ph = (-h) % align
        buf = np.zeros((h + ph, width), np.float32)
        buf[:h, :w] = a
        offs[name] = (r, (h, w))
        parts.append(buf)
        r += h + ph
    return jnp.asarray(np.concatenate(parts, axis=0)), offs


def _make_kernel(B, L, NH, HS, offs):
    T = NH                 # LSTM sequence length (channel axis of atfm)
    BL = B * L
    BN_EPS = 1e-5
    f32 = jnp.float32

    def kernel(x_ref, p_ref, out_ref,
               gxi_ref, gxf_ref, gxg_ref, gxo_ref, hseq_ref):

        def P(name):                       # static slice of the packed parameter slab
            r, (h, w) = offs[name]
            return p_ref[r:r + h, 0:w]

        def sig(v):                        # sigmoid via a single tanh (one EUP op)
            return 0.5 * (jnp.tanh(0.5 * v) + 1.0)

        # Sequence-boundary masks built in-kernel (no extra inputs / DMAs).
        lpos = lax.broadcasted_iota(jnp.int32, (BL, 1), 0) % L
        pm = (lpos != 0).astype(f32)          # x[l-1] exists inside this batch element
        nm = (lpos != (L - 1)).astype(f32)    # x[l+1] exists

        def shifted(x):
            # x[l-1] / x[l+1] taps via XLU rolls on register-resident values;
            # pm/nm zero the cyclic wrap and the cross-batch taps.
            xp = pltpu.roll(x, shift=1, axis=0) * pm
            xn = pltpu.roll(x, shift=BL - 1, axis=0) * nm
            return xp, xn

        def conv3(xp, x0, xn, wname, bname):
            # Conv1d(k=3, padding=1) over the sequence axis, channels-last rows.
            y = (jnp.dot(xp, P(wname + '_0'), preferred_element_type=f32)
                 + jnp.dot(x0, P(wname + '_1'), preferred_element_type=f32)
                 + jnp.dot(xn, P(wname + '_2'), preferred_element_type=f32))
            return y + P(bname)

        # conv block: Conv1d -> BatchNorm1d (train-mode batch stats) -> ReLU -> Conv1d
        x = x_ref[...]
        xp, xn = shifted(x)
        y1 = conv3(xp, x, xn, 'c1', 'c1_b')                    # (BL, NF)
        mu = jnp.mean(y1, axis=0, keepdims=True)               # single-pass BN stats
        ex2 = jnp.mean(y1 * y1, axis=0, keepdims=True)
        y1 = (y1 - mu) * lax.rsqrt(ex2 - mu * mu + BN_EPS) * P('gamma') + P('beta')
        y1 = jnp.maximum(y1, 0.0)
        y1p, y1n = shifted(y1)
        fm = conv3(y1p, y1, y1n, 'c2', 'c2_b')                 # (BL, NH)

        # key / query / value convs share the shifted views of fm (built once);
        # three separate lane-aligned outputs, no lane-unaligned split.
        fmp, fmn = shifted(fm)
        k2d = conv3(fmp, fm, fmn, 'k', 'k_b')                  # (BL, NH)
        q2d = conv3(fmp, fm, fmn, 'q', 'q_b')
        v2d = conv3(fmp, fm, fmn, 'v', 'v_b')

        # Attention per batch element (B tiny; static unroll, plain 2D MXU ops).
        atfms = []
        for b in range(B):
            r0 = b * L
            q_b = q2d[r0:r0 + L, :]                            # (L, NH)  [l=j, c=t]
            k_b = k2d[r0:r0 + L, :]                            # (L, NH)  [l=t, c=i]
            v_b = v2d[r0:r0 + L, :]                            # (L, NH)  [l=j, c=i]
            attnT = jnp.dot(q_b, k_b, preferred_element_type=f32)  # [j,i]==attnmap[b,i,j]
            m = jnp.max(attnT, axis=-1, keepdims=True)
            e = jnp.exp(attnT - m)
            smax = e * pl.reciprocal(jnp.sum(e, axis=-1, keepdims=True), approx=True)
            atfms.append(smax * v_b)                           # [j,i]==atfm[b,i,j]

        # LSTM input pre-activations, per gate (lane-aligned HS blocks), contracted
        # over axis 0 (no transposes), staged once in per-gate VMEM scratch in
        # b-major row order (row = b*T + t).
        gx_refs = (gxi_ref, gxf_ref, gxg_ref, gxo_ref)
        for gi, gn in enumerate(_GATES):
            w_g = P('wih_' + gn)                               # (L, HS)
            b_g = P('b_' + gn)                                 # (1, HS)
            for b in range(B):
                gx = lax.dot_general(atfms[b], w_g,
                                     dimension_numbers=(((0,), (0,)), ((), ())),
                                     preferred_element_type=f32)   # (T, HS)
                gx_refs[gi][b * T:(b + 1) * T, :] = gx + b_g

        whh = {gn: P('whh_' + gn) for gn in _GATES}            # (HS, HS) per gate
        h = jnp.zeros((B, HS), f32)
        c = jnp.zeros((B, HS), f32)
        for t in range(T):                                     # fully unrolled recurrence
            # strided read: rows {b*T + t} -> (B, HS); off the h-serial path.
            a_i = gxi_ref[pl.ds(t, B, stride=T), :]
            a_f = gxf_ref[pl.ds(t, B, stride=T), :]
            a_g = gxg_ref[pl.ds(t, B, stride=T), :]
            a_o = gxo_ref[pl.ds(t, B, stride=T), :]
            if t > 0:                                          # h0 == 0: skip first matmuls
                a_i = a_i + jnp.dot(h, whh['i'], preferred_element_type=f32)
                a_f = a_f + jnp.dot(h, whh['f'], preferred_element_type=f32)
                a_g = a_g + jnp.dot(h, whh['g'], preferred_element_type=f32)
                a_o = a_o + jnp.dot(h, whh['o'], preferred_element_type=f32)
            i_g = sig(a_i)
            f_g = sig(a_f)
            g_g = jnp.tanh(a_g)
            o_g = sig(a_o)
            c = f_g * c + i_g * g_g
            h = o_g * jnp.tanh(c)
            hseq_ref[t * B:(t + 1) * B, :] = h                 # t-major rows (t*B + b)

        # MLP head on the full (T*B, HS) slab: two matmuls, one sigmoid, one store.
        enc = hseq_ref[...]
        z = jnp.maximum(jnp.dot(enc, P('mw1'), preferred_element_type=f32) + P('mb1'), 0.0)
        z = jnp.maximum(jnp.dot(z, P('mw2'), preferred_element_type=f32) + P('mb2'), 0.0)
        out_ref[...] = sig(z)                                  # (T*B, LO)

    return kernel


def forward_pallas(X, p):
    """X: (B, ni, L) float32 (torch NCL). Returns (nh, B), matching the module."""
    B, NI, L = X.shape
    NF = p['conv1_w'].shape[0]
    NH = p['conv2_w'].shape[0]
    HS = p['whh'].shape[1]
    LO = p['mw2'].shape[0]
    assert NH == L, "torch.bmm(key(fm), query(fm)) requires seq_len == nh"
    T = NH

    x2d = jnp.transpose(X, (0, 2, 1)).reshape(B * L, NI).astype(jnp.float32)

    def tap(w, k):          # (Cout, Cin, 3) -> tap k as (Cin, Cout)
        return np.asarray(w)[:, :, k].T

    # Pack every parameter into a single (rows, 128) slab (one prologue DMA).
    blocks = []
    for name, w in (('c1', p['conv1_w']), ('c2', p['conv2_w']),
                    ('k', p['key_w']), ('q', p['query_w']), ('v', p['value_w'])):
        for k in range(3):
            blocks.append((f'{name}_{k}', tap(w, k)))
    wih = np.asarray(p['wih'])                  # (4HS, NH)
    whh = np.asarray(p['whh'])                  # (4HS, HS)
    lbias = np.asarray(p['bih']) + np.asarray(p['bhh'])
    for gi, gn in enumerate(_GATES):            # per-gate split (lane-aligned blocks)
        sl = slice(gi * HS, (gi + 1) * HS)
        blocks.append(('wih_' + gn, wih[sl, :].T))        # (NH, HS)
        blocks.append(('whh_' + gn, whh[sl, :].T))        # (HS, HS)
        blocks.append(('b_' + gn, lbias[sl][None, :]))    # (1, HS)
    blocks += [('mw1', np.asarray(p['mw1']).T), ('mb1', np.asarray(p['mb1'])[None, :]),
               ('mw2', np.asarray(p['mw2']).T), ('mb2', np.asarray(p['mb2'])[None, :]),
               ('c1_b', np.asarray(p['conv1_b'])[None, :]),
               ('gamma', np.asarray(p['bn_gamma'])[None, :]),
               ('beta', np.asarray(p['bn_beta'])[None, :]),
               ('c2_b', np.asarray(p['conv2_b'])[None, :]),
               ('k_b', np.asarray(p['key_b'])[None, :]),
               ('q_b', np.asarray(p['query_b'])[None, :]),
               ('v_b', np.asarray(p['value_b'])[None, :])]
    pslab, offs = _pack_params(blocks)

    kernel = _make_kernel(B, L, NH, HS, offs)
    out = pl.pallas_call(
        kernel,
        out_shape=jax.ShapeDtypeStruct((T * B, LO), jnp.float32),
        in_specs=[pl.BlockSpec(memory_space=pltpu.MemorySpace.VMEM)] * 2,
        out_specs=pl.BlockSpec(memory_space=pltpu.MemorySpace.VMEM),
        scratch_shapes=(
            [pltpu.VMEM((B * T, HS), jnp.float32) for _ in range(4)]   # per-gate gx
            + [pltpu.VMEM((T * B, HS), jnp.float32)]                   # h_t slab
        ),
    )(x2d, pslab)
    # rows are t-major (row = t*B + b); match torch .squeeze(): (nh, B) when LO == 1
    return jnp.squeeze(out.reshape(T, B, LO))


def forward_ref(X, p):
    """Pure-JAX reference (same math as the torch module, NCL layout)."""
    hp = lax.Precision.HIGHEST
    B, NI, L = X.shape

    def conv1d(x, w, b):
        xp = jnp.pad(x, ((0, 0), (0, 0), (1, 1)))
        out = b[None, :, None]
        for k in range(3):
            out = out + jnp.einsum('bcl,oc->bol', xp[:, :, k:k + L], w[:, :, k],
                                   precision=hp)
        return out

    y1 = conv1d(X, p['conv1_w'], p['conv1_b'])
    mu = jnp.mean(y1, axis=(0, 2), keepdims=True)
    var = jnp.mean((y1 - mu) ** 2, axis=(0, 2), keepdims=True)
    y1 = (y1 - mu) / jnp.sqrt(var + 1e-5) * p['bn_gamma'][None, :, None] + p['bn_beta'][None, :, None]
    y1 = jnp.maximum(y1, 0.0)
    fm = conv1d(y1, p['conv2_w'], p['conv2_b'])
    kf = conv1d(fm, p['key_w'], p['key_b'])
    qf = conv1d(fm, p['query_w'], p['query_b'])
    vf = conv1d(fm, p['value_w'], p['value_b'])
    attn = jnp.einsum('bil,blj->bij', kf, qf, precision=hp)
    sm = jax.nn.softmax(attn, axis=1)
    atfm = sm * vf                                  # (B, nh, L)
    seq = jnp.transpose(atfm, (1, 0, 2))            # (nh, B, L)
    HS = p['whh'].shape[1]
    bias = p['bih'] + p['bhh']
    h = jnp.zeros((B, HS), jnp.float32)
    c = jnp.zeros((B, HS), jnp.float32)
    outs = []
    for t in range(seq.shape[0]):
        gates = (jnp.dot(seq[t], p['wih'].T, precision=hp)
                 + jnp.dot(h, p['whh'].T, precision=hp) + bias)
        i_g = _sigmoid(gates[:, 0:HS])
        f_g = _sigmoid(gates[:, HS:2 * HS])
        g_g = jnp.tanh(gates[:, 2 * HS:3 * HS])
        o_g = _sigmoid(gates[:, 3 * HS:4 * HS])
        c = f_g * c + i_g * g_g
        h = o_g * jnp.tanh(c)
        outs.append(h)
    enc = jnp.stack(outs, axis=0)                   # (nh, B, HS)
    z = jnp.maximum(jnp.einsum('tbh,oh->tbo', enc, p['mw1'], precision=hp) + p['mb1'], 0.0)
    z = jnp.maximum(jnp.einsum('tbh,oh->tbo', z, p['mw2'], precision=hp) + p['mb2'], 0.0)
    return jnp.squeeze(_sigmoid(z))


def init_params(key, ni, nf, nh, hs, ls):
    ks = jax.random.split(key, 18)

    def u(k, shape, fan_in):
        b = 1.0 / np.sqrt(fan_in)
        return jax.random.uniform(k, shape, jnp.float32, -b, b)

    p = {}
    p['conv1_w'] = u(ks[0], (nf, ni, 3), ni * 3)
    p['conv1_b'] = u(ks[1], (nf,), ni * 3)
    p['bn_gamma'] = jnp.ones((nf,), jnp.float32)
    p['bn_beta'] = jnp.zeros((nf,), jnp.float32)
    p['conv2_w'] = u(ks[2], (nh, nf, 3), nf * 3)
    p['conv2_b'] = u(ks[3], (nh,), nf * 3)
    p['key_w'] = u(ks[4], (nh, nh, 3), nh * 3)
    p['key_b'] = u(ks[5], (nh,), nh * 3)
    p['query_w'] = u(ks[6], (nh, nh, 3), nh * 3)
    p['query_b'] = u(ks[7], (nh,), nh * 3)
    p['value_w'] = u(ks[8], (nh, nh, 3), nh * 3)
    p['value_b'] = u(ks[9], (nh,), nh * 3)
    p['wih'] = u(ks[10], (4 * hs, nh), hs)
    p['whh'] = u(ks[11], (4 * hs, hs), hs)
    p['bih'] = u(ks[12], (4 * hs,), hs)
    p['bhh'] = u(ks[13], (4 * hs,), hs)
    (l0_in, l0_out), (l1_in, l1_out) = ls
    p['mw1'] = u(ks[14], (l0_out, l0_in), l0_in)
    p['mb1'] = u(ks[15], (l0_out,), l0_in)
    p['mw2'] = u(ks[16], (l1_out, l1_in), l1_in)
    p['mb2'] = u(ks[17], (l1_out,), l1_in)
    return p


if __name__ == "__main__":
    # ni=4 input channels, nf=8, nh=16 hidden channels, hs=32 LSTM hidden,
    # ls = [(32, 16), (16, 1)].  seq_len L must equal nh (see note above).
    B, NI, NF, NH, HS = 2, 4, 8, 16, 32
    L = NH
    ls = [(HS, 16), (16, 1)]

    root = jax.random.PRNGKey(0)
    kx, kp = jax.random.split(root)
    X = jax.random.normal(kx, (B, NI, L), jnp.float32)
    params = init_params(kp, NI, NF, NH, HS, ls)

    out = jax.block_until_ready(forward_pallas(X, params))
    ref = jax.block_until_ready(forward_ref(X, params))

    assert out.shape == (NH, B) and ref.shape == (NH, B)
    err = float(jnp.max(jnp.abs(out - ref)))
    assert err < 3e-2, f"max abs err {err}"
    print("KERNEL_OK")
</pallas_src>

<mosaic_0001>
module attributes {stable_mosaic.version = 11 : i64} {
  func.func @kernel(%arg0: memref<32x4xf32, #tpu.memory_space<vmem>>, %arg1: memref<536x128xf32, #tpu.memory_space<vmem>>, %arg2: memref<32x1xf32, #tpu.memory_space<vmem>>, %arg3: memref<32x32xf32, #tpu.memory_space<vmem>>, %arg4: memref<32x32xf32, #tpu.memory_space<vmem>>, %arg5: memref<32x32xf32, #tpu.memory_space<vmem>>, %arg6: memref<32x32xf32, #tpu.memory_space<vmem>>, %arg7: memref<32x32xf32, #tpu.memory_space<vmem>>) attributes {dimension_semantics = [], scalar_prefetch = 0 : i64, scratch_operands = 5 : i64, tpu.core_type = #tpu.core_type<tc>} {
    %0 = tpu.iota {dimensions = array<i32: 0>} : vector<32x1xi32>
    %c16_i32 = arith.constant 16 : i32
    %c0_i32 = arith.constant 0 : i32
    %1 = arith.cmpi eq, %c16_i32, %c0_i32 : i32
    %c1_i32 = arith.constant 1 : i32
    %2 = arith.select %1, %c1_i32, %c16_i32 : i32
    %3 = vector.broadcast %2 : i32 to vector<32x1xi32>
    %4 = arith.remsi %0, %3 : vector<32x1xi32>
    %c0_i32_0 = arith.constant 0 : i32
    %5 = vector.broadcast %c0_i32_0 : i32 to vector<32x1xi32>
    %6 = arith.cmpi ne, %4, %5 : vector<32x1xi32>
    %c0_i32_1 = arith.constant 0 : i32
    %7 = vector.broadcast %c0_i32_1 : i32 to vector<32x1xi32>
    %8 = arith.cmpi slt, %4, %7 : vector<32x1xi32>
    %c0_i32_2 = arith.constant 0 : i32
    %9 = arith.cmpi slt, %2, %c0_i32_2 : i32
    %10 = vector.broadcast %9 : i1 to vector<32x1xi1>
    %11 = vector.broadcast %10 : vector<32x1xi1> to vector<32x1xi1>
    %12 = arith.xori %8, %11 : vector<32x1xi1>
    %13 = arith.andi %12, %6 : vector<32x1xi1>
    %14 = vector.broadcast %2 : i32 to vector<32x1xi32>
    %15 = arith.addi %4, %14 : vector<32x1xi32>
    %16 = arith.select %13, %15, %4 : vector<32x1xi1>, vector<32x1xi32>
    %c0_i32_3 = arith.constant 0 : i32
    %17 = vector.broadcast %c0_i32_3 : i32 to vector<32x1xi32>
    %18 = arith.cmpi ne, %16, %17 : vector<32x1xi32>
    %19 = arith.extui %18 : vector<32x1xi1> to vector<32x1xi32>
    %20 = arith.sitofp %19 : vector<32x1xi32> to vector<32x1xf32>
    %c15_i32 = arith.constant 15 : i32
    %21 = vector.broadcast %c15_i32 : i32 to vector<32x1xi32>
    %22 = arith.cmpi ne, %16, %21 : vector<32x1xi32>
    %23 = arith.extui %22 : vector<32x1xi1> to vector<32x1xi32>
    %24 = arith.sitofp %23 : vector<32x1xi32> to vector<32x1xf32>
    %c0 = arith.constant 0 : index
    %c0_4 = arith.constant 0 : index
    %25 = vector.load %arg0[%c0, %c0_4] : memref<32x4xf32, #tpu.memory_space<vmem>>, vector<32x4xf32>
    %c1_i32_5 = arith.constant 1 : i32
    %26 = tpu.dynamic_rotate %25 by %c1_i32_5 dim 0 : vector<32x4xf32>, i32 -> vector<32x4xf32>
    %27 = vector.broadcast %20 : vector<32x1xf32> to vector<32x4xf32>
    %28 = arith.mulf %26, %27 : vector<32x4xf32>
    %c31_i32 = arith.constant 31 : i32
    %29 = tpu.dynamic_rotate %25 by %c31_i32 dim 0 : vector<32x4xf32>, i32 -> vector<32x4xf32>
    %30 = vector.broadcast %24 : vector<32x1xf32> to vector<32x4xf32>
    %31 = arith.mulf %29, %30 : vector<32x4xf32>
    %c0_6 = arith.constant 0 : index
    %c0_7 = arith.constant 0 : index
    %32 = vector.load %arg1[%c0_6, %c0_7] : memref<536x128xf32, #tpu.memory_space<vmem>>, vector<4x8xf32>
    %cst = arith.constant dense<0.000000e+00> : vector<32x8xf32>
    %33 = tpu.matmul %28, %32, %cst {dimension_numbers = #tpu.dot_dimension_numbers<[1], [0], [0], [1], [0, 0, 1, 1], [], []>} : vector<32x4xf32>, vector<4x8xf32>, vector<32x8xf32> -> vector<32x8xf32>
    %c8 = arith.constant 8 : index
    %c0_8 = arith.constant 0 : index
    %34 = vector.load %arg1[%c8, %c0_8] : memref<536x128xf32, #tpu.memory_space<vmem>>, vector<4x8xf32>
    %cst_9 = arith.constant dense<0.000000e+00> : vector<32x8xf32>
    %35 = tpu.matmul %25, %34, %cst_9 {dimension_numbers = #tpu.dot_dimension_numbers<[1], [0], [0], [1], [0, 0, 1, 1], [], []>} : vector<32x4xf32>, vector<4x8xf32>, vector<32x8xf32> -> vector<32x8xf32>
    %36 = arith.addf %33, %35 : vector<32x8xf32>
    %c16 = arith.constant 16 : index
    %c0_10 = arith.constant 0 : index
    %37 = vector.load %arg1[%c16, %c0_10] : memref<536x128xf32, #tpu.memory_space<vmem>>, vector<4x8xf32>
    %cst_11 = arith.constant dense<0.000000e+00> : vector<32x8xf32>
    %38 = tpu.matmul %31, %37, %cst_11 {dimension_numbers = #tpu.dot_dimension_numbers<[1], [0], [0], [1], [0, 0, 1, 1], [], []>} : vector<32x4xf32>, vector<4x8xf32>, vector<32x8xf32> -> vector<32x8xf32>
    %39 = arith.addf %36, %38 : vector<32x8xf32>
    %c480 = arith.constant 480 : index
    %c0_12 = arith.constant 0 : index
    %40 = vector.load %arg1[%c480, %c0_12] : memref<536x128xf32, #tpu.memory_space<vmem>>, vector<1x8xf32>
    %41 = vector.broadcast %40 : vector<1x8xf32> to vector<32x8xf32>
    %42 = arith.addf %39, %41 : vector<32x8xf32>
    %cst_13 = arith.constant dense<0.000000e+00> : vector<8xf32>
    %43 = vector.multi_reduction <add>, %42, %cst_13 [0] : vector<32x8xf32> to vector<8xf32>
    %44 = vector.shape_cast %43 : vector<8xf32> to vector<1x8xf32>
    %cst_14 = arith.constant 3.200000e+01 : f32
    %45 = vector.broadcast %cst_14 : f32 to vector<1x8xf32>
    %46 = arith.divf %44, %45 : vector<1x8xf32>
    %47 = arith.mulf %42, %42 : vector<32x8xf32>
    %cst_15 = arith.constant dense<0.000000e+00> : vector<8xf32>
    %48 = vector.multi_reduction <add>, %47, %cst_15 [0] : vector<32x8xf32> to vector<8xf32>
    %49 = vector.shape_cast %48 : vector<8xf32> to vector<1x8xf32>
    %cst_16 = arith.constant 3.200000e+01 : f32
    %50 = vector.broadcast %cst_16 : f32 to vector<1x8xf32>
    %51 = arith.divf %49, %50 : vector<1x8xf32>
    %52 = vector.broadcast %46 : vector<1x8xf32> to vector<32x8xf32>
    %53 = arith.subf %42, %52 : vector<32x8xf32>
    %54 = arith.mulf %46, %46 : vector<1x8xf32>
    %55 = arith.subf %51, %54 : vector<1x8xf32>
    %cst_17 = arith.constant 9.99999974E-6 : f32
    %56 = vector.broadcast %cst_17 : f32 to vector<1x8xf32>
    %57 = arith.addf %55, %56 : vector<1x8xf32>
    %58 = math.rsqrt %57 : vector<1x8xf32>
    %59 = vector.broadcast %58 : vector<1x8xf32> to vector<32x8xf32>
    %60 = arith.mulf %53, %59 : vector<32x8xf32>
    %c488 = arith.constant 488 : index
    %c0_18 = arith.constant 0 : index
    %61 = vector.load %arg1[%c488, %c0_18] : memref<536x128xf32, #tpu.memory_space<vmem>>, vector<1x8xf32>
    %62 = vector.broadcast %61 : vector<1x8xf32> to vector<32x8xf32>
    %63 = arith.mulf %60, %62 : vector<32x8xf32>
    %c496 = arith.constant 496 : index
    %c0_19 = arith.constant 0 : index
    %64 = vector.load %arg1[%c496, %c0_19] : memref<536x128xf32, #tpu.memory_space<vmem>>, vector<1x8xf32>
    %65 = vector.broadcast %64 : vector<1x8xf32> to vector<32x8xf32>
    %66 = arith.addf %63, %65 : vector<32x8xf32>
    %cst_20 = arith.constant 0.000000e+00 : f32
    %67 = vector.broadcast %cst_20 : f32 to vector<32x8xf32>
    %68 = arith.maximumf %66, %67 : vector<32x8xf32>
    %c1_i32_21 = arith.constant 1 : i32
    %69 = tpu.dynamic_rotate %68 by %c1_i32_21 dim 0 : vector<32x8xf32>, i32 -> vector<32x8xf32>
    %70 = vector.broadcast %20 : vector<32x1xf32> to vector<32x8xf32>
    %71 = arith.mulf %69, %70 : vector<32x8xf32>
    %c31_i32_22 = arith.constant 31 : i32
    %72 = tpu.dynamic_rotate %68 by %c31_i32_22 dim 0 : vector<32x8xf32>, i32 -> vector<32x8xf32>
    %73 = vector.broadcast %24 : vector<32x1xf32> to vector<32x8xf32>
    %74 = arith.mulf %72, %73 : vector<32x8xf32>
    %c24 = arith.constant 24 : index
    %c0_23 = arith.constant 0 : index
    %75 = vector.load %arg1[%c24, %c0_23] : memref<536x128xf32, #tpu.memory_space<vmem>>, vector<8x16xf32>
    %cst_24 = arith.constant dense<0.000000e+00> : vector<32x16xf32>
    %76 = tpu.matmul %71, %75, %cst_24 {dimension_numbers = #tpu.dot_dimension_numbers<[1], [0], [0], [1], [0, 0, 1, 1], [], []>} : vector<32x8xf32>, vector<8x16xf32>, vector<32x16xf32> -> vector<32x16xf32>
    %c32 = arith.constant 32 : index
    %c0_25 = arith.constant 0 : index
    %77 = vector.load %arg1[%c32, %c0_25] : memref<536x128xf32, #tpu.memory_space<vmem>>, vector<8x16xf32>
    %cst_26 = arith.constant dense<0.000000e+00> : vector<32x16xf32>
    %78 = tpu.matmul %68, %77, %cst_26 {dimension_numbers = #tpu.dot_dimension_numbers<[1], [0], [0], [1], [0, 0, 1, 1], [], []>} : vector<32x8xf32>, vector<8x16xf32>, vector<32x16xf32> -> vector<32x16xf32>
    %79 = arith.addf %76, %78 : vector<32x16xf32>
    %c40 = arith.constant 40 : index
    %c0_27 = arith.constant 0 : index
    %80 = vector.load %arg1[%c40, %c0_27] : memref<536x128xf32, #tpu.memory_space<vmem>>, vector<8x16xf32>
    %cst_28 = arith.constant dense<0.000000e+00> : vector<32x16xf32>
    %81 = tpu.matmul %74, %80, %cst_28 {dimension_numbers = #tpu.dot_dimension_numbers<[1], [0], [0], [1], [0, 0, 1, 1], [], []>} : vector<32x8xf32>, vector<8x16xf32>, vector<32x16xf32> -> vector<32x16xf32>
    %82 = arith.addf %79, %81 : vector<32x16xf32>
    %c504 = arith.constant 504 : index
    %c0_29 = arith.constant 0 : index
    %83 = vector.load %arg1[%c504, %c0_29] : memref<536x128xf32, #tpu.memory_space<vmem>>, vector<1x16xf32>
    %84 = vector.broadcast %83 : vector<1x16xf32> to vector<32x16xf32>
    %85 = arith.addf %82, %84 : vector<32x16xf32>
    %c1_i32_30 = arith.constant 1 : i32
    %86 = tpu.dynamic_rotate %85 by %c1_i32_30 dim 0 : vector<32x16xf32>, i32 -> vector<32x16xf32>
    %87 = vector.broadcast %20 : vector<32x1xf32> to vector<32x16xf32>
    %88 = arith.mulf %86, %87 : vector<32x16xf32>
    %c31_i32_31 = arith.constant 31 : i32
    %89 = tpu.dynamic_rotate %85 by %c31_i32_31 dim 0 : vector<32x16xf32>, i32 -> vector<32x16xf32>
    %90 = vector.broadcast %24 : vector<32x1xf32> to vector<32x16xf32>
    %91 = arith.mulf %89, %90 : vector<32x16xf32>
    %c48 = arith.constant 48 : index
    %c0_32 = arith.constant 0 : index
    %92 = vector.load %arg1[%c48, %c0_32] : memref<536x128xf32, #tpu.memory_space<vmem>>, vector<16x16xf32>
    %cst_33 = arith.constant dense<0.000000e+00> : vector<32x16xf32>
    %93 = tpu.matmul %88, %92, %cst_33 {dimension_numbers = #tpu.dot_dimension_numbers<[1], [0], [0], [1], [0, 0, 1, 1], [], []>} : vector<32x16xf32>, vector<16x16xf32>, vector<32x16xf32> -> vector<32x16xf32>
    %c64 = arith.constant 64 : index
    %c0_34 = arith.constant 0 : index
    %94 = vector.load %arg1[%c64, %c0_34] : memref<536x128xf32, #tpu.memory_space<vmem>>, vector<16x16xf32>
    %cst_35 = arith.constant dense<0.000000e+00> : vector<32x16xf32>
    %95 = tpu.matmul %85, %94, %cst_35 {dimension_numbers = #tpu.dot_dimension_numbers<[1], [0], [0], [1], [0, 0, 1, 1], [], []>} : vector<32x16xf32>, vector<16x16xf32>, vector<32x16xf32> -> vector<32x16xf32>
    %96 = arith.addf %93, %95 : vector<32x16xf32>
    %c80 = arith.constant 80 : index
    %c0_36 = arith.constant 0 : index
    %97 = vector.load %arg1[%c80, %c0_36] : memref<536x128xf32, #tpu.memory_space<vmem>>, vector<16x16xf32>
    %cst_37 = arith.constant dense<0.000000e+00> : vector<32x16xf32>
    %98 = tpu.matmul %91, %97, %cst_37 {dimension_numbers = #tpu.dot_dimension_numbers<[1], [0], [0], [1], [0, 0, 1, 1], [], []>} : vector<32x16xf32>, vector<16x16xf32>, vector<32x16xf32> -> vector<32x16xf32>
    %99 = arith.addf %96, %98 : vector<32x16xf32>
    %c512 = arith.constant 512 : index
    %c0_38 = arith.constant 0 : index
    %100 = vector.load %arg1[%c512, %c0_38] : memref<536x128xf32, #tpu.memory_space<vmem>>, vector<1x16xf32>
    %101 = vector.broadcast %100 : vector<1x16xf32> to vector<32x16xf32>
    %102 = arith.addf %99, %101 : vector<32x16xf32>
    %c96 = arith.constant 96 : index
    %c0_39 = arith.constant 0 : index
    %103 = vector.load %arg1[%c96, %c0_39] : memref<536x128xf32, #tpu.memory_space<vmem>>, vector<16x16xf32>
    %cst_40 = arith.constant dense<0.000000e+00> : vector<32x16xf32>
    %104 = tpu.matmul %88, %103, %cst_40 {dimension_numbers = #tpu.dot_dimension_numbers<[1], [0], [0], [1], [0, 0, 1, 1], [], []>} : vector<32x16xf32>, vector<16x16xf32>, vector<32x16xf32> -> vector<32x16xf32>
    %c112 = arith.constant 112 : index
    %c0_41 = arith.constant 0 : index
    %105 = vector.load %arg1[%c112, %c0_41] : memref<536x128xf32, #tpu.memory_space<vmem>>, vector<16x16xf32>
    %cst_42 = arith.constant dense<0.000000e+00> : vector<32x16xf32>
    %106 = tpu.matmul %85, %105, %cst_42 {dimension_numbers = #tpu.dot_dimension_numbers<[1], [0], [0], [1], [0, 0, 1, 1], [], []>} : vector<32x16xf32>, vector<16x16xf32>, vector<32x16xf32> -> vector<32x16xf32>
    %107 = arith.addf %104, %106 : vector<32x16xf32>
    %c128 = arith.constant 128 : index
    %c0_43 = arith.constant 0 : index
    %108 = vector.load %arg1[%c128, %c0_43] : memref<536x128xf32, #tpu.memory_space<vmem>>, vector<16x16xf32>
    %cst_44 = arith.constant dense<0.000000e+00> : vector<32x16xf32>
    %109 = tpu.matmul %91, %108, %cst_44 {dimension_numbers = #tpu.dot_dimension_numbers<[1], [0], [0], [1], [0, 0, 1, 1], [], []>} : vector<32x16xf32>, vector<16x16xf32>, vector<32x16xf32> -> vector<32x16xf32>
    %110 = arith.addf %107, %109 : vector<32x16xf32>
    %c520 = arith.constant 520 : index
    %c0_45 = arith.constant 0 : index
    %111 = vector.load %arg1[%c520, %c0_45] : memref<536x128xf32, #tpu.memory_space<vmem>>, vector<1x16xf32>
    %112 = vector.broadcast %111 : vector<1x16xf32> to vector<32x16xf32>
    %113 = arith.addf %110, %112 : vector<32x16xf32>
    %c144 = arith.constant 144 : index
    %c0_46 = arith.constant 0 : index
    %114 = vector.load %arg1[%c144, %c0_46] : memref<536x128xf32, #tpu.memory_space<vmem>>, vector<16x16xf32>
    %cst_47 = arith.constant dense<0.000000e+00> : vector<32x16xf32>
    %115 = tpu.matmul %88, %114, %cst_47 {dimension_numbers = #tpu.dot_dimension_numbers<[1], [0], [0], [1], [0, 0, 1, 1], [], []>} : vector<32x16xf32>, vector<16x16xf32>, vector<32x16xf32> -> vector<32x16xf32>
    %c160 = arith.constant 160 : index
    %c0_48 = arith.constant 0 : index
    %116 = vector.load %arg1[%c160, %c0_48] : memref<536x128xf32, #tpu.memory_space<vmem>>, vector<16x16xf32>
    %cst_49 = arith.constant dense<0.000000e+00> : vector<32x16xf32>
    %117 = tpu.matmul %85, %116, %cst_49 {dimension_numbers = #tpu.dot_dimension_numbers<[1], [0], [0], [1], [0, 0, 1, 1], [], []>} : vector<32x16xf32>, vector<16x16xf32>, vector<32x16xf32> -> vector<32x16xf32>
    %118 = arith.addf %115, %117 : vector<32x16xf32>
    %c176 = arith.constant 176 : index
    %c0_50 = arith.constant 0 : index
    %119 = vector.load %arg1[%c176, %c0_50] : memref<536x128xf32, #tpu.memory_space<vmem>>, vector<16x16xf32>
    %cst_51 = arith.constant dense<0.000000e+00> : vector<32x16xf32>
    %120 = tpu.matmul %91, %119, %cst_51 {dimension_numbers = #tpu.dot_dimension_numbers<[1], [0], [0], [1], [0, 0, 1, 1], [], []>} : vector<32x16xf32>, vector<16x16xf32>, vector<32x16xf32> -> vector<32x16xf32>
    %121 = arith.addf %118, %120 : vector<32x16xf32>
    %c528 = arith.constant 528 : index
    %c0_52 = arith.constant 0 : index
    %122 = vector.load %arg1[%c528, %c0_52] : memref<536x128xf32, #tpu.memory_space<vmem>>, vector<1x16xf32>
    %123 = vector.broadcast %122 : vector<1x16xf32> to vector<32x16xf32>
    %124 = arith.addf %121, %123 : vector<32x16xf32>
    %125 = vector.extract_strided_slice %113 {offsets = [0, 0], sizes = [16, 16], strides = [1, 1]} : vector<32x16xf32> to vector<16x16xf32>
    %126 = vector.extract_strided_slice %102 {offsets = [0, 0], sizes = [16, 16], strides = [1, 1]} : vector<32x16xf32> to vector<16x16xf32>
    %127 = vector.extract_strided_slice %124 {offsets = [0, 0], sizes = [16, 16], strides = [1, 1]} : vector<32x16xf32> to vector<16x16xf32>
    %cst_53 = arith.constant dense<0.000000e+00> : vector<16x16xf32>
    %128 = tpu.matmul %125, %126, %cst_53 {dimension_numbers = #tpu.dot_dimension_numbers<[1], [0], [0], [1], [0, 0, 1, 1], [], []>} : vector<16x16xf32>, vector<16x16xf32>, vector<16x16xf32> -> vector<16x16xf32>
    %cst_54 = arith.constant dense<0xFF800000> : vector<16xf32>
    %129 = vector.multi_reduction <maximumf>, %128, %cst_54 [1] : vector<16x16xf32> to vector<16xf32>
    %130 = vector.shape_cast %129 : vector<16xf32> to vector<16x1xf32>
    %131 = vector.broadcast %130 : vector<16x1xf32> to vector<16x16xf32>
    %132 = arith.subf %128, %131 : vector<16x16xf32>
    %133 = math.exp %132 : vector<16x16xf32>
    %cst_55 = arith.constant dense<0.000000e+00> : vector<16xf32>
    %134 = vector.multi_reduction <add>, %133, %cst_55 [1] : vector<16x16xf32> to vector<16xf32>
    %135 = vector.shape_cast %134 : vector<16xf32> to vector<16x1xf32>
    %136 = tpu.reciprocal %135 {approx = true} : vector<16x1xf32> -> vector<16x1xf32>
    %137 = vector.broadcast %136 : vector<16x1xf32> to vector<16x16xf32>
    %138 = arith.mulf %133, %137 : vector<16x16xf32>
    %139 = arith.mulf %138, %127 : vector<16x16xf32>
    %140 = vector.extract_strided_slice %113 {offsets = [16, 0], sizes = [16, 16], strides = [1, 1]} : vector<32x16xf32> to vector<16x16xf32>
    %141 = vector.extract_strided_slice %102 {offsets = [16, 0], sizes = [16, 16], strides = [1, 1]} : vector<32x16xf32> to vector<16x16xf32>
    %142 = vector.extract_strided_slice %124 {offsets = [16, 0], sizes = [16, 16], strides = [1, 1]} : vector<32x16xf32> to vector<16x16xf32>
    %cst_56 = arith.constant dense<0.000000e+00> : vector<16x16xf32>
    %143 = tpu.matmul %140, %141, %cst_56 {dimension_numbers = #tpu.dot_dimension_numbers<[1], [0], [0], [1], [0, 0, 1, 1], [], []>} : vector<16x16xf32>, vector<16x16xf32>, vector<16x16xf32> -> vector<16x16xf32>
    %cst_57 = arith.constant dense<0xFF800000> : vector<16xf32>
    %144 = vector.multi_reduction <maximumf>, %143, %cst_57 [1] : vector<16x16xf32> to vector<16xf32>
    %145 = vector.shape_cast %144 : vector<16xf32> to vector<16x1xf32>
    %146 = vector.broadcast %145 : vector<16x1xf32> to vector<16x16xf32>
    %147 = arith.subf %143, %146 : vector<16x16xf32>
    %148 = math.exp %147 : vector<16x16xf32>
    %cst_58 = arith.constant dense<0.000000e+00> : vector<16xf32>
    %149 = vector.multi_reduction <add>, %148, %cst_58 [1] : vector<16x16xf32> to vector<16xf32>
    %150 = vector.shape_cast %149 : vector<16xf32> to vector<16x1xf32>
    %151 = tpu.reciprocal %150 {approx = true} : vector<16x1xf32> -> vector<16x1xf32>
    %152 = vector.broadcast %151 : vector<16x1xf32> to vector<16x16xf32>
    %153 = arith.mulf %148, %152 : vector<16x16xf32>
    %154 = arith.mulf %153, %142 : vector<16x16xf32>
    %c192 = arith.constant 192 : index
    %c0_59 = arith.constant 0 : index
    %155 = vector.load %arg1[%c192, %c0_59] : memref<536x128xf32, #tpu.memory_space<vmem>>, vector<16x32xf32>
    %c240 = arith.constant 240 : index
    %c0_60 = arith.constant 0 : index
    %156 = vector.load %arg1[%c240, %c0_60] : memref<536x128xf32, #tpu.memory_space<vmem>>, vector<1x32xf32>
    %cst_61 = arith.constant dense<0.000000e+00> : vector<16x32xf32>
    %157 = tpu.matmul %139, %155, %cst_61 {dimension_numbers = #tpu.dot_dimension_numbers<[0], [0], [1], [1], [0, 1, 1, 1], [], []>} : vector<16x16xf32>, vector<16x32xf32>, vector<16x32xf32> -> vector<16x32xf32>
    %158 = vector.broadcast %156 : vector<1x32xf32> to vector<16x32xf32>
    %159 = arith.addf %157, %158 : vector<16x32xf32>
    %c0_62 = arith.constant 0 : index
    %c0_63 = arith.constant 0 : index
    %160 = vector.load %arg3[%c0_62, %c0_63] : memref<32x32xf32, #tpu.memory_space<vmem>>, vector<16x32xf32>
    tpu.vector_store %arg3[%c0_62, %c0_63], %159 {strides = array<i32>} : memref<32x32xf32, #tpu.memory_space<vmem>>, vector<16x32xf32>,
    %cst_64 = arith.constant dense<0.000000e+00> : vector<16x32xf32>
    %161 = tpu.matmul %154, %155, %cst_64 {dimension_numbers = #tpu.dot_dimension_numbers<[0], [0], [1], [1], [0, 1, 1, 1], [], []>} : vector<16x16xf32>, vector<16x32xf32>, vector<16x32xf32> -> vector<16x32xf32>
    %162 = vector.broadcast %156 : vector<1x32xf32> to vector<16x32xf32>
    %163 = arith.addf %161, %162 : vector<16x32xf32>
    %c16_65 = arith.constant 16 : index
    %c0_66 = arith.constant 0 : index
    %164 = vector.load %arg3[%c16_65, %c0_66] : memref<32x32xf32, #tpu.memory_space<vmem>>, vector<16x32xf32>
    tpu.vector_store %arg3[%c16_65, %c0_66], %163 {strides = array<i32>} : memref<32x32xf32, #tpu.memory_space<vmem>>, vector<16x32xf32>,
    %c248 = arith.constant 248 : index
    %c0_67 = arith.constant 0 : index
    %165 = vector.load %arg1[%c248, %c0_67] : memref<536x128xf32, #tpu.memory_space<vmem>>, vector<16x32xf32>
    %c296 = arith.constant 296 : index
    %c0_68 = arith.constant 0 : index
    %166 = vector.load %arg1[%c296, %c0_68] : memref<536x128xf32, #tpu.memory_space<vmem>>, vector<1x32xf32>
    %cst_69 = arith.constant dense<0.000000e+00> : vector<16x32xf32>
    %167 = tpu.matmul %139, %165, %cst_69 {dimension_numbers = #tpu.dot_dimension_numbers<[0], [0], [1], [1], [0, 1, 1, 1], [], []>} : vector<16x16xf32>, vector<16x32xf32>, vector<16x32xf32> -> vector<16x32xf32>
    %168 = vector.broadcast %166 : vector<1x32xf32> to vector<16x32xf32>
    %169 = arith.addf %167, %168 : vector<16x32xf32>
    %c0_70 = arith.constant 0 : index
    %c0_71 = arith.constant 0 : index
    %170 = vector.load %arg4[%c0_70, %c0_71] : memref<32x32xf32, #tpu.memory_space<vmem>>, vector<16x32xf32>
    tpu.vector_store %arg4[%c0_70, %c0_71], %169 {strides = array<i32>} : memref<32x32xf32, #tpu.memory_space<vmem>>, vector<16x32xf32>,
    %cst_72 = arith.constant dense<0.000000e+00> : vector<16x32xf32>
    %171 = tpu.matmul %154, %165, %cst_72 {dimension_numbers = #tpu.dot_dimension_numbers<[0], [0], [1], [1], [0, 1, 1, 1], [], []>} : vector<16x16xf32>, vector<16x32xf32>, vector<16x32xf32> -> vector<16x32xf32>
    %172 = vector.broadcast %166 : vector<1x32xf32> to vector<16x32xf32>
    %173 = arith.addf %171, %172 : vector<16x32xf32>
    %c16_73 = arith.constant 16 : index
    %c0_74 = arith.constant 0 : index
    %174 = vector.load %arg4[%c16_73, %c0_74] : memref<32x32xf32, #tpu.memory_space<vmem>>, vector<16x32xf32>
    tpu.vector_store %arg4[%c16_73, %c0_74], %173 {strides = array<i32>} : memref<32x32xf32, #tpu.memory_space<vmem>>, vector<16x32xf32>,
    %c304 = arith.constant 304 : index
    %c0_75 = arith.constant 0 : index
    %175 = vector.load %arg1[%c304, %c0_75] : memref<536x128xf32, #tpu.memory_space<vmem>>, vector<16x32xf32>
    %c352 = arith.constant 352 : index
    %c0_76 = arith.constant 0 : index
    %176 = vector.load %arg1[%c352, %c0_76] : memref<536x128xf32, #tpu.memory_space<vmem>>, vector<1x32xf32>
    %cst_77 = arith.constant dense<0.000000e+00> : vector<16x32xf32>
    %177 = tpu.matmul %139, %175, %cst_77 {dimension_numbers = #tpu.dot_dimension_numbers<[0], [0], [1], [1], [0, 1, 1, 1], [], []>} : vector<16x16xf32>, vector<16x32xf32>, vector<16x32xf32> -> vector<16x32xf32>
    %178 = vector.broadcast %176 : vector<1x32xf32> to vector<16x32xf32>
    %179 = arith.addf %177, %178 : vector<16x32xf32>
    %c0_78 = arith.constant 0 : index
    %c0_79 = arith.constant 0 : index
    %180 = vector.load %arg5[%c0_78, %c0_79] : memref<32x32xf32, #tpu.memory_space<vmem>>, vector<16x32xf32>
    tpu.vector_store %arg5[%c0_78, %c0_79], %179 {strides = array<i32>} : memref<32x32xf32, #tpu.memory_space<vmem>>, vector<16x32xf32>,
    %cst_80 = arith.constant dense<0.000000e+00> : vector<16x32xf32>
    %181 = tpu.matmul %154, %175, %cst_80 {dimension_numbers = #tpu.dot_dimension_numbers<[0], [0], [1], [1], [0, 1, 1, 1], [], []>} : vector<16x16xf32>, vector<16x32xf32>, vector<16x32xf32> -> vector<16x32xf32>
    %182 = vector.broadcast %176 : vector<1x32xf32> to vector<16x32xf32>
    %183 = arith.addf %181, %182 : vector<16x32xf32>
    %c16_81 = arith.constant 16 : index
    %c0_82 = arith.constant 0 : index
    %184 = vector.load %arg5[%c16_81, %c0_82] : memref<32x32xf32, #tpu.memory_space<vmem>>, vector<16x32xf32>
    tpu.vector_store %arg5[%c16_81, %c0_82], %183 {strides = array<i32>} : memref<32x32xf32, #tpu.memory_space<vmem>>, vector<16x32xf32>,
    %c360 = arith.constant 360 : index
    %c0_83 = arith.constant 0 : index
    %185 = vector.load %arg1[%c360, %c0_83] : memref<536x128xf32, #tpu.memory_space<vmem>>, vector<16x32xf32>
    %c408 = arith.constant 408 : index
    %c0_84 = arith.constant 0 : index
    %186 = vector.load %arg1[%c408, %c0_84] : memref<536x128xf32, #tpu.memory_space<vmem>>, vector<1x32xf32>
    %cst_85 = arith.constant dense<0.000000e+00> : vector<16x32xf32>
    %187 = tpu.matmul %139, %185, %cst_85 {dimension_numbers = #tpu.dot_dimension_numbers<[0], [0], [1], [1], [0, 1, 1, 1], [], []>} : vector<16x16xf32>, vector<16x32xf32>, vector<16x32xf32> -> vector<16x32xf32>
    %188 = vector.broadcast %186 : vector<1x32xf32> to vector<16x32xf32>
    %189 = arith.addf %187, %188 : vector<16x32xf32>
    %c0_86 = arith.constant 0 : index
    %c0_87 = arith.constant 0 : index
    %190 = vector.load %arg6[%c0_86, %c0_87] : memref<32x32xf32, #tpu.memory_space<vmem>>, vector<16x32xf32>
    tpu.vector_store %arg6[%c0_86, %c0_87], %189 {strides = array<i32>} : memref<32x32xf32, #tpu.memory_space<vmem>>, vector<16x32xf32>,
    %cst_88 = arith.constant dense<0.000000e+00> : vector<16x32xf32>
    %191 = tpu.matmul %154, %185, %cst_88 {dimension_numbers = #tpu.dot_dimension_numbers<[0], [0], [1], [1], [0, 1, 1, 1], [], []>} : vector<16x16xf32>, vector<16x32xf32>, vector<16x32xf32> -> vector<16x32xf32>
    %192 = vector.broadcast %186 : vector<1x32xf32> to vector<16x32xf32>
    %193 = arith.addf %191, %192 : vector<16x32xf32>
    %c16_89 = arith.constant 16 : index
    %c0_90 = arith.constant 0 : index
    %194 = vector.load %arg6[%c16_89, %c0_90] : memref<32x32xf32, #tpu.memory_space<vmem>>, vector<16x32xf32>
    tpu.vector_store %arg6[%c16_89, %c0_90], %193 {strides = array<i32>} : memref<32x32xf32, #tpu.memory_space<vmem>>, vector<16x32xf32>,
    %c208 = arith.constant 208 : index
    %c0_91 = arith.constant 0 : index
    %195 = vector.load %arg1[%c208, %c0_91] : memref<536x128xf32, #tpu.memory_space<vmem>>, vector<32x32xf32>
    %c264 = arith.constant 264 : index
    %c0_92 = arith.constant 0 : index
    %196 = vector.load %arg1[%c264, %c0_92] : memref<536x128xf32, #tpu.memory_space<vmem>>, vector<32x32xf32>
    %c320 = arith.constant 320 : index
    %c0_93 = arith.constant 0 : index
    %197 = vector.load %arg1[%c320, %c0_93] : memref<536x128xf32, #tpu.memory_space<vmem>>, vector<32x32xf32>
    %c376 = arith.constant 376 : index
    %c0_94 = arith.constant 0 : index
    %198 = vector.load %arg1[%c376, %c0_94] : memref<536x128xf32, #tpu.memory_space<vmem>>, vector<32x32xf32>
    %cst_95 = arith.constant 0.000000e+00 : f32
    %199 = vector.broadcast %cst_95 : f32 to vector<2x32xf32>
    %c0_96 = arith.constant 0 : index
    %c0_97 = arith.constant 0 : index
    %200 = tpu.strided_load %arg3[%c0_96, %c0_97] {strides = array<i32: 16, 1>} : memref<32x32xf32, #tpu.memory_space<vmem>>, vector<2x32xf32>
    %c0_98 = arith.constant 0 : index
    %c0_99 = arith.constant 0 : index
    %201 = tpu.strided_load %arg4[%c0_98, %c0_99] {strides = array<i32: 16, 1>} : memref<32x32xf32, #tpu.memory_space<vmem>>, vector<2x32xf32>
    %c0_100 = arith.constant 0 : index
    %c0_101 = arith.constant 0 : index
    %202 = tpu.strided_load %arg5[%c0_100, %c0_101] {strides = array<i32: 16, 1>} : memref<32x32xf32, #tpu.memory_space<vmem>>, vector<2x32xf32>
    %c0_102 = arith.constant 0 : index
    %c0_103 = arith.constant 0 : index
    %203 = tpu.strided_load %arg6[%c0_102, %c0_103] {strides = array<i32: 16, 1>} : memref<32x32xf32, #tpu.memory_space<vmem>>, vector<2x32xf32>
    %cst_104 = arith.constant 5.000000e-01 : f32
    %204 = vector.broadcast %cst_104 : f32 to vector<2x32xf32>
    %205 = arith.mulf %204, %200 : vector<2x32xf32>
    %206 = math.tanh %205 : vector<2x32xf32>
    %cst_105 = arith.constant 1.000000e+00 : f32
    %207 = vector.broadcast %cst_105 : f32 to vector<2x32xf32>
    %208 = arith.addf %206, %207 : vector<2x32xf32>
    %cst_106 = arith.constant 5.000000e-01 : f32
    %209 = vector.broadcast %cst_106 : f32 to vector<2x32xf32>
    %210 = arith.mulf %209, %208 : vector<2x32xf32>
    %cst_107 = arith.constant 5.000000e-01 : f32
    %211 = vector.broadcast %cst_107 : f32 to vector<2x32xf32>
    %212 = arith.mulf %211, %201 : vector<2x32xf32>
    %213 = math.tanh %212 : vector<2x32xf32>
    %cst_108 = arith.constant 1.000000e+00 : f32
    %214 = vector.broadcast %cst_108 : f32 to vector<2x32xf32>
    %215 = arith.addf %213, %214 : vector<2x32xf32>
    %cst_109 = arith.constant 5.000000e-01 : f32
    %216 = vector.broadcast %cst_109 : f32 to vector<2x32xf32>
    %217 = arith.mulf %216, %215 : vector<2x32xf32>
    %218 = math.tanh %202 : vector<2x32xf32>
    %cst_110 = arith.constant 5.000000e-01 : f32
    %219 = vector.broadcast %cst_110 : f32 to vector<2x32xf32>
    %220 = arith.mulf %219, %203 : vector<2x32xf32>
    %221 = math.tanh %220 : vector<2x32xf32>
    %cst_111 = arith.constant 1.000000e+00 : f32
    %222 = vector.broadcast %cst_111 : f32 to vector<2x32xf32>
    %223 = arith.addf %221, %222 : vector<2x32xf32>
    %cst_112 = arith.constant 5.000000e-01 : f32
    %224 = vector.broadcast %cst_112 : f32 to vector<2x32xf32>
    %225 = arith.mulf %224, %223 : vector<2x32xf32>
    %226 = arith.mulf %217, %199 : vector<2x32xf32>
    %227 = arith.mulf %210, %218 : vector<2x32xf32>
    %228 = arith.addf %226, %227 : vector<2x32xf32>
    %229 = math.tanh %228 : vector<2x32xf32>
    %230 = arith.mulf %225, %229 : vector<2x32xf32>
    %c0_113 = arith.constant 0 : index
    %c0_114 = arith.constant 0 : index
    %231 = vector.load %arg7[%c0_113, %c0_114] : memref<32x32xf32, #tpu.memory_space<vmem>>, vector<2x32xf32>
    tpu.vector_store %arg7[%c0_113, %c0_114], %230 {strides = array<i32>} : memref<32x32xf32, #tpu.memory_space<vmem>>, vector<2x32xf32>,
    %c1 = arith.constant 1 : index
    %c0_115 = arith.constant 0 : index
    %232 = tpu.strided_load %arg3[%c1, %c0_115] {strides = array<i32: 16, 1>} : memref<32x32xf32, #tpu.memory_space<vmem>>, vector<2x32xf32>
    %c1_116 = arith.constant 1 : index
    %c0_117 = arith.constant 0 : index
    %233 = tpu.strided_load %arg4[%c1_116, %c0_117] {strides = array<i32: 16, 1>} : memref<32x32xf32, #tpu.memory_space<vmem>>, vector<2x32xf32>
    %c1_118 = arith.constant 1 : index
    %c0_119 = arith.constant 0 : index
    %234 = tpu.strided_load %arg5[%c1_118, %c0_119] {strides = array<i32: 16, 1>} : memref<32x32xf32, #tpu.memory_space<vmem>>, vector<2x32xf32>
    %c1_120 = arith.constant 1 : index
    %c0_121 = arith.constant 0 : index
    %235 = tpu.strided_load %arg6[%c1_120, %c0_121] {strides = array<i32: 16, 1>} : memref<32x32xf32, #tpu.memory_space<vmem>>, vector<2x32xf32>
    %cst_122 = arith.constant dense<0.000000e+00> : vector<2x32xf32>
    %236 = tpu.matmul %230, %195, %cst_122 {dimension_numbers = #tpu.dot_dimension_numbers<[1], [0], [0], [1], [0, 0, 1, 1], [], []>} : vector<2x32xf32>, vector<32x32xf32>, vector<2x32xf32> -> vector<2x32xf32>
    %237 = arith.addf %232, %236 : vector<2x32xf32>
    %cst_123 = arith.constant dense<0.000000e+00> : vector<2x32xf32>
    %238 = tpu.matmul %230, %196, %cst_123 {dimension_numbers = #tpu.dot_dimension_numbers<[1], [0], [0], [1], [0, 0, 1, 1], [], []>} : vector<2x32xf32>, vector<32x32xf32>, vector<2x32xf32> -> vector<2x32xf32>
    %239 = arith.addf %233, %238 : vector<2x32xf32>
    %cst_124 = arith.constant dense<0.000000e+00> : vector<2x32xf32>
    %240 = tpu.matmul %230, %197, %cst_124 {dimension_numbers = #tpu.dot_dimension_numbers<[1], [0], [0], [1], [0, 0, 1, 1], [], []>} : vector<2x32xf32>, vector<32x32xf32>, vector<2x32xf32> -> vector<2x32xf32>
    %241 = arith.addf %234, %240 : vector<2x32xf32>
    %cst_125 = arith.constant dense<0.000000e+00> : vector<2x32xf32>
    %242 = tpu.matmul %230, %198, %cst_125 {dimension_numbers = #tpu.dot_dimension_numbers<[1], [0], [0], [1], [0, 0, 1, 1], [], []>} : vector<2x32xf32>, vector<32x32xf32>, vector<2x32xf32> -> vector<2x32xf32>
    %243 = arith.addf %235, %242 : vector<2x32xf32>
    %cst_126 = arith.constant 5.000000e-01 : f32
    %244 = vector.broadcast %cst_126 : f32 to vector<2x32xf32>
    %245 = arith.mulf %244, %237 : vector<2x32xf32>
    %246 = math.tanh %245 : vector<2x32xf32>
    %cst_127 = arith.constant 1.000000e+00 : f32
    %247 = vector.broadcast %cst_127 : f32 to vector<2x32xf32>
    %248 = arith.addf %246, %247 : vector<2x32xf32>
    %cst_128 = arith.constant 5.000000e-01 : f32
    %249 = vector.broadcast %cst_128 : f32 to vector<2x32xf32>
    %250 = arith.mulf %249, %248 : vector<2x32xf32>
    %cst_129 = arith.constant 5.000000e-01 : f32
    %251 = vector.broadcast %cst_129 : f32 to vector<2x32xf32>
    %252 = arith.mulf %251, %239 : vector<2x32xf32>
    %253 = math.tanh %252 : vector<2x32xf32>
    %cst_130 = arith.constant 1.000000e+00 : f32
    %254 = vector.broadcast %cst_130 : f32 to vector<2x32xf32>
    %255 = arith.addf %253, %254 : vector<2x32xf32>
    %cst_131 = arith.constant 5.000000e-01 : f32
    %256 = vector.broadcast %cst_131 : f32 to vector<2x32xf32>
    %257 = arith.mulf %256, %255 : vector<2x32xf32>
    %258 = math.tanh %241 : vector<2x32xf32>
    %cst_132 = arith.constant 5.000000e-01 : f32
    %259 = vector.broadcast %cst_132 : f32 to vector<2x32xf32>
    %260 = arith.mulf %259, %243 : vector<2x32xf32>
    %261 = math.tanh %260 : vector<2x32xf32>
    %cst_133 = arith.constant 1.000000e+00 : f32
    %262 = vector.broadcast %cst_133 : f32 to vector<2x32xf32>
    %263 = arith.addf %261, %262 : vector<2x32xf32>
    %cst_134 = arith.constant 5.000000e-01 : f32
    %264 = vector.broadcast %cst_134 : f32 to vector<2x32xf32>
    %265 = arith.mulf %264, %263 : vector<2x32xf32>
    %266 = arith.mulf %257, %228 : vector<2x32xf32>
    %267 = arith.mulf %250, %258 : vector<2x32xf32>
    %268 = arith.addf %266, %267 : vector<2x32xf32>
    %269 = math.tanh %268 : vector<2x32xf32>
    %270 = arith.mulf %265, %269 : vector<2x32xf32>
    %c2 = arith.constant 2 : index
    %c0_135 = arith.constant 0 : index
    %271 = vector.load %arg7[%c2, %c0_135] : memref<32x32xf32, #tpu.memory_space<vmem>>, vector<2x32xf32>
    tpu.vector_store %arg7[%c2, %c0_135], %270 {strides = array<i32>} : memref<32x32xf32, #tpu.memory_space<vmem>>, vector<2x32xf32>,
    %c2_136 = arith.constant 2 : index
    %c0_137 = arith.constant 0 : index
    %272 = tpu.strided_load %arg3[%c2_136, %c0_137] {strides = array<i32: 16, 1>} : memref<32x32xf32, #tpu.memory_space<vmem>>, vector<2x32xf32>
    %c2_138 = arith.constant 2 : index
    %c0_139 = arith.constant 0 : index
    %273 = tpu.strided_load %arg4[%c2_138, %c0_139] {strides = array<i32: 16, 1>} : memref<32x32xf32, #tpu.memory_space<vmem>>, vector<2x32xf32>
    %c2_140 = arith.constant 2 : index
    %c0_141 = arith.constant 0 : index
    %274 = tpu.strided_load %arg5[%c2_140, %c0_141] {strides = array<i32: 16, 1>} : memref<32x32xf32, #tpu.memory_space<vmem>>, vector<2x32xf32>
    %c2_142 = arith.constant 2 : index
    %c0_143 = arith.constant 0 : index
    %275 = tpu.strided_load %arg6[%c2_142, %c0_143] {strides = array<i32: 16, 1>} : memref<32x32xf32, #tpu.memory_space<vmem>>, vector<2x32xf32>
    %cst_144 = arith.constant dense<0.000000e+00> : vector<2x32xf32>
    %276 = tpu.matmul %270, %195, %cst_144 {dimension_numbers = #tpu.dot_dimension_numbers<[1], [0], [0], [1], [0, 0, 1, 1], [], []>} : vector<2x32xf32>, vector<32x32xf32>, vector<2x32xf32> -> vector<2x32xf32>
    %277 = arith.addf %272, %276 : vector<2x32xf32>
    %cst_145 = arith.constant dense<0.000000e+00> : vector<2x32xf32>
    %278 = tpu.matmul %270, %196, %cst_145 {dimension_numbers = #tpu.dot_dimension_numbers<[1], [0], [0], [1], [0, 0, 1, 1], [], []>} : vector<2x32xf32>, vector<32x32xf32>, vector<2x32xf32> -> vector<2x32xf32>
    %279 = arith.addf %273, %278 : vector<2x32xf32>
    %cst_146 = arith.constant dense<0.000000e+00> : vector<2x32xf32>
    %280 = tpu.matmul %270, %197, %cst_146 {dimension_numbers = #tpu.dot_dimension_numbers<[1], [0], [0], [1], [0, 0, 1, 1], [], []>} : vector<2x32xf32>, vector<32x32xf32>, vector<2x32xf32> -> vector<2x32xf32>
    %281 = arith.addf %274, %280 : vector<2x32xf32>
    %cst_147 = arith.constant dense<0.000000e+00> : vector<2x32xf32>
    %282 = tpu.matmul %270, %198, %cst_147 {dimension_numbers = #tpu.dot_dimension_numbers<[1], [0], [0], [1], [0, 0, 1, 1], [], []>} : vector<2x32xf32>, vector<32x32xf32>, vector<2x32xf32> -> vector<2x32xf32>
    %283 = arith.addf %275, %282 : vector<2x32xf32>
    %cst_148 = arith.constant 5.000000e-01 : f32
    %284 = vector.broadcast %cst_148 : f32 to vector<2x32xf32>
    %285 = arith.mulf %284, %277 : vector<2x32xf32>
    %286 = math.tanh %285 : vector<2x32xf32>
    %cst_149 = arith.constant 1.000000e+00 : f32
    %287 = vector.broadcast %cst_149 : f32 to vector<2x32xf32>
    %288 = arith.addf %286, %287 : vector<2x32xf32>
    %cst_150 = arith.constant 5.000000e-01 : f32
    %289 = vector.broadcast %cst_150 : f32 to vector<2x32xf32>
    %290 = arith.mulf %289, %288 : vector<2x32xf32>
    %cst_151 = arith.constant 5.000000e-01 : f32
    %291 = vector.broadcast %cst_151 : f32 to vector<2x32xf32>
    %292 = arith.mulf %291, %279 : vector<2x32xf32>
    %293 = math.tanh %292 : vector<2x32xf32>
    %cst_152 = arith.constant 1.000000e+00 : f32
    %294 = vector.broadcast %cst_152 : f32 to vector<2x32xf32>
    %295 = arith.addf %293, %294 : vector<2x32xf32>
    %cst_153 = arith.constant 5.000000e-01 : f32
    %296 = vector.broadcast %cst_153 : f32 to vector<2x32xf32>
    %297 = arith.mulf %296, %295 : vector<2x32xf32>
    %298 = math.tanh %281 : vector<2x32xf32>
    %cst_154 = arith.constant 5.000000e-01 : f32
    %299 = vector.broadcast %cst_154 : f32 to vector<2x32xf32>
    %300 = arith.mulf %299, %283 : vector<2x32xf32>
    %301 = math.tanh %300 : vector<2x32xf32>
    %cst_155 = arith.constant 1.000000e+00 : f32
    %302 = vector.broadcast %cst_155 : f32 to vector<2x32xf32>
    %303 = arith.addf %301, %302 : vector<2x32xf32>
    %cst_156 = arith.constant 5.000000e-01 : f32
    %304 = vector.broadcast %cst_156 : f32 to vector<2x32xf32>
    %305 = arith.mulf %304, %303 : vector<2x32xf32>
    %306 = arith.mulf %297, %268 : vector<2x32xf32>
    %307 = arith.mulf %290, %298 : vector<2x32xf32>
    %308 = arith.addf %306, %307 : vector<2x32xf32>
    %309 = math.tanh %308 : vector<2x32xf32>
    %310 = arith.mulf %305, %309 : vector<2x32xf32>
    %c4 = arith.constant 4 : index
    %c0_157 = arith.constant 0 : index
    %311 = vector.load %arg7[%c4, %c0_157] : memref<32x32xf32, #tpu.memory_space<vmem>>, vector<2x32xf32>
    tpu.vector_store %arg7[%c4, %c0_157], %310 {strides = array<i32>} : memref<32x32xf32, #tpu.memory_space<vmem>>, vector<2x32xf32>,
    %c3 = arith.constant 3 : index
    %c0_158 = arith.constant 0 : index
    %312 = tpu.strided_load %arg3[%c3, %c0_158] {strides = array<i32: 16, 1>} : memref<32x32xf32, #tpu.memory_space<vmem>>, vector<2x32xf32>
    %c3_159 = arith.constant 3 : index
    %c0_160 = arith.constant 0 : index
    %313 = tpu.strided_load %arg4[%c3_159, %c0_160] {strides = array<i32: 16, 1>} : memref<32x32xf32, #tpu.memory_space<vmem>>, vector<2x32xf32>
    %c3_161 = arith.constant 3 : index
    %c0_162 = arith.constant 0 : index
    %314 = tpu.strided_load %arg5[%c3_161, %c0_162] {strides = array<i32: 16, 1>} : memref<32x32xf32, #tpu.memory_space<vmem>>, vector<2x32xf32>
    %c3_163 = arith.constant 3 : index
    %c0_164 = arith.constant 0 : index
    %315 = tpu.strided_load %arg6[%c3_163, %c0_164] {strides = array<i32: 16, 1>} : memref<32x32xf32, #tpu.memory_space<vmem>>, vector<2x32xf32>
    %cst_165 = arith.constant dense<0.000000e+00> : vector<2x32xf32>
    %316 = tpu.matmul %310, %195, %cst_165 {dimension_numbers = #tpu.dot_dimension_numbers<[1], [0], [0], [1], [0, 0, 1, 1], [], []>} : vector<2x32xf32>, vector<32x32xf32>, vector<2x32xf32> -> vector<2x32xf32>
    %317 = arith.addf %312, %316 : vector<2x32xf32>
    %cst_166 = arith.constant dense<0.000000e+00> : vector<2x32xf32>
    %318 = tpu.matmul %310, %196, %cst_166 {dimension_numbers = #tpu.dot_dimension_numbers<[1], [0], [0], [1], [0, 0, 1, 1], [], []>} : vector<2x32xf32>, vector<32x32xf32>, vector<2x32xf32> -> vector<2x32xf32>
    %319 = arith.addf %313, %318 : vector<2x32xf32>
    %cst_167 = arith.constant dense<0.000000e+00> : vector<2x32xf32>
    %320 = tpu.matmul %310, %197, %cst_167 {dimension_numbers = #tpu.dot_dimension_numbers<[1], [0], [0], [1], [0, 0, 1, 1], [], []>} : vector<2x32xf32>, vector<32x32xf32>, vector<2x32xf32> -> vector<2x32xf32>
    %321 = arith.addf %314, %320 : vector<2x32xf32>
    %cst_168 = arith.constant dense<0.000000e+00> : vector<2x32xf32>
    %322 = tpu.matmul %310, %198, %cst_168 {dimension_numbers = #tpu.dot_dimension_numbers<[1], [0], [0], [1], [0, 0, 1, 1], [], []>} : vector<2x32xf32>, vector<32x32xf32>, vector<2x32xf32> -> vector<2x32xf32>
    %323 = arith.addf %315, %322 : vector<2x32xf32>
    %cst_169 = arith.constant 5.000000e-01 : f32
    %324 = vector.broadcast %cst_169 : f32 to vector<2x32xf32>
    %325 = arith.mulf %324, %317 : vector<2x32xf32>
    %326 = math.tanh %325 : vector<2x32xf32>
    %cst_170 = arith.constant 1.000000e+00 : f32
    %327 = vector.broadcast %cst_170 : f32 to vector<2x32xf32>
    %328 = arith.addf %326, %327 : vector<2x32xf32>
    %cst_171 = arith.constant 5.000000e-01 : f32
    %329 = vector.broadcast %cst_171 : f32 to vector<2x32xf32>
    %330 = arith.mulf %329, %328 : vector<2x32xf32>
    %cst_172 = arith.constant 5.000000e-01 : f32
    %331 = vector.broadcast %cst_172 : f32 to vector<2x32xf32>
    %332 = arith.mulf %331, %319 : vector<2x32xf32>
    %333 = math.tanh %332 : vector<2x32xf32>
    %cst_173 = arith.constant 1.000000e+00 : f32
    %334 = vector.broadcast %cst_173 : f32 to vector<2x32xf32>
    %335 = arith.addf %333, %334 : vector<2x32xf32>
    %cst_174 = arith.constant 5.000000e-01 : f32
    %336 = vector.broadcast %cst_174 : f32 to vector<2x32xf32>
    %337 = arith.mulf %336, %335 : vector<2x32xf32>
    %338 = math.tanh %321 : vector<2x32xf32>
    %cst_175 = arith.constant 5.000000e-01 : f32
    %339 = vector.broadcast %cst_175 : f32 to vector<2x32xf32>
    %340 = arith.mulf %339, %323 : vector<2x32xf32>
    %341 = math.tanh %340 : vector<2x32xf32>
    %cst_176 = arith.constant 1.000000e+00 : f32
    %342 = vector.broadcast %cst_176 : f32 to vector<2x32xf32>
    %343 = arith.addf %341, %342 : vector<2x32xf32>
    %cst_177 = arith.constant 5.000000e-01 : f32
    %344 = vector.broadcast %cst_177 : f32 to vector<2x32xf32>
    %345 = arith.mulf %344, %343 : vector<2x32xf32>
    %346 = arith.mulf %337, %308 : vector<2x32xf32>
    %347 = arith.mulf %330, %338 : vector<2x32xf32>
    %348 = arith.addf %346, %347 : vector<2x32xf32>
    %349 = math.tanh %348 : vector<2x32xf32>
    %350 = arith.mulf %345, %349 : vector<2x32xf32>
    %c6 = arith.constant 6 : index
    %c0_178 = arith.constant 0 : index
    %351 = vector.load %arg7[%c6, %c0_178] : memref<32x32xf32, #tpu.memory_space<vmem>>, vector<2x32xf32>
    tpu.vector_store %arg7[%c6, %c0_178], %350 {strides = array<i32>} : memref<32x32xf32, #tpu.memory_space<vmem>>, vector<2x32xf32>,
    %c4_179 = arith.constant 4 : index
    %c0_180 = arith.constant 0 : index
    %352 = tpu.strided_load %arg3[%c4_179, %c0_180] {strides = array<i32: 16, 1>} : memref<32x32xf32, #tpu.memory_space<vmem>>, vector<2x32xf32>
    %c4_181 = arith.constant 4 : index
    %c0_182 = arith.constant 0 : index
    %353 = tpu.strided_load %arg4[%c4_181, %c0_182] {strides = array<i32: 16, 1>} : memref<32x32xf32, #tpu.memory_space<vmem>>, vector<2x32xf32>
    %c4_183 = arith.constant 4 : index
    %c0_184 = arith.constant 0 : index
    %354 = tpu.strided_load %arg5[%c4_183, %c0_184] {strides = array<i32: 16, 1>} : memref<32x32xf32, #tpu.memory_space<vmem>>, vector<2x32xf32>
    %c4_185 = arith.constant 4 : index
    %c0_186 = arith.constant 0 : index
    %355 = tpu.strided_load %arg6[%c4_185, %c0_186] {strides = array<i32: 16, 1>} : memref<32x32xf32, #tpu.memory_space<vmem>>, vector<2x32xf32>
    %cst_187 = arith.constant dense<0.000000e+00> : vector<2x32xf32>
    %356 = tpu.matmul %350, %195, %cst_187 {dimension_numbers = #tpu.dot_dimension_numbers<[1], [0], [0], [1], [0, 0, 1, 1], [], []>} : vector<2x32xf32>, vector<32x32xf32>, vector<2x32xf32> -> vector<2x32xf32>
    %357 = arith.addf %352, %356 : vector<2x32xf32>
    %cst_188 = arith.constant dense<0.000000e+00> : vector<2x32xf32>
    %358 = tpu.matmul %350, %196, %cst_188 {dimension_numbers = #tpu.dot_dimension_numbers<[1], [0], [0], [1], [0, 0, 1, 1], [], []>} : vector<2x32xf32>, vector<32x32xf32>, vector<2x32xf32> -> vector<2x32xf32>
    %359 = arith.addf %353, %358 : vector<2x32xf32>
    %cst_189 = arith.constant dense<0.000000e+00> : vector<2x32xf32>
    %360 = tpu.matmul %350, %197, %cst_189 {dimension_numbers = #tpu.dot_dimension_numbers<[1], [0], [0], [1], [0, 0, 1, 1], [], []>} : vector<2x32xf32>, vector<32x32xf32>, vector<2x32xf32> -> vector<2x32xf32>
    %361 = arith.addf %354, %360 : vector<2x32xf32>
    %cst_190 = arith.constant dense<0.000000e+00> : vector<2x32xf32>
    %362 = tpu.matmul %350, %198, %cst_190 {dimension_numbers = #tpu.dot_dimension_numbers<[1], [0], [0], [1], [0, 0, 1, 1], [], []>} : vector<2x32xf32>, vector<32x32xf32>, vector<2x32xf32> -> vector<2x32xf32>
    %363 = arith.addf %355, %362 : vector<2x32xf32>
    %cst_191 = arith.constant 5.000000e-01 : f32
    %364 = vector.broadcast %cst_191 : f32 to vector<2x32xf32>
    %365 = arith.mulf %364, %357 : vector<2x32xf32>
    %366 = math.tanh %365 : vector<2x32xf32>
    %cst_192 = arith.constant 1.000000e+00 : f32
    %367 = vector.broadcast %cst_192 : f32 to vector<2x32xf32>
    %368 = arith.addf %366, %367 : vector<2x32xf32>
    %cst_193 = arith.constant 5.000000e-01 : f32
    %369 = vector.broadcast %cst_193 : f32 to vector<2x32xf32>
    %370 = arith.mulf %369, %368 : vector<2x32xf32>
    %cst_194 = arith.constant 5.000000e-01 : f32
    %371 = vector.broadcast %cst_194 : f32 to vector<2x32xf32>
    %372 = arith.mulf %371, %359 : vector<2x32xf32>
    %373 = math.tanh %372 : vector<2x32xf32>
    %cst_195 = arith.constant 1.000000e+00 : f32
    %374 = vector.broadcast %cst_195 : f32 to vector<2x32xf32>
    %375 = arith.addf %373, %374 : vector<2x32xf32>
    %cst_196 = arith.constant 5.000000e-01 : f32
    %376 = vector.broadcast %cst_196 : f32 to vector<2x32xf32>
    %377 = arith.mulf %376, %375 : vector<2x32xf32>
    %378 = math.tanh %361 : vector<2x32xf32>
    %cst_197 = arith.constant 5.000000e-01 : f32
    %379 = vector.broadcast %cst_197 : f32 to vector<2x32xf32>
    %380 = arith.mulf %379, %363 : vector<2x32xf32>
    %381 = math.tanh %380 : vector<2x32xf32>
    %cst_198 = arith.constant 1.000000e+00 : f32
    %382 = vector.broadcast %cst_198 : f32 to vector<2x32xf32>
    %383 = arith.addf %381, %382 : vector<2x32xf32>
    %cst_199 = arith.constant 5.000000e-01 : f32
    %384 = vector.broadcast %cst_199 : f32 to vector<2x32xf32>
    %385 = arith.mulf %384, %383 : vector<2x32xf32>
    %386 = arith.mulf %377, %348 : vector<2x32xf32>
    %387 = arith.mulf %370, %378 : vector<2x32xf32>
    %388 = arith.addf %386, %387 : vector<2x32xf32>
    %389 = math.tanh %388 : vector<2x32xf32>
    %390 = arith.mulf %385, %389 : vector<2x32xf32>
    %c8_200 = arith.constant 8 : index
    %c0_201 = arith.constant 0 : index
    %391 = vector.load %arg7[%c8_200, %c0_201] : memref<32x32xf32, #tpu.memory_space<vmem>>, vector<2x32xf32>
    tpu.vector_store %arg7[%c8_200, %c0_201], %390 {strides = array<i32>} : memref<32x32xf32, #tpu.memory_space<vmem>>, vector<2x32xf32>,
    %c5 = arith.constant 5 : index
    %c0_202 = arith.constant 0 : index
    %392 = tpu.strided_load %arg3[%c5, %c0_202] {strides = array<i32: 16, 1>} : memref<32x32xf32, #tpu.memory_space<vmem>>, vector<2x32xf32>
    %c5_203 = arith.constant 5 : index
    %c0_204 = arith.constant 0 : index
    %393 = tpu.strided_load %arg4[%c5_203, %c0_204] {strides = array<i32: 16, 1>} : memref<32x32xf32, #tpu.memory_space<vmem>>, vector<2x32xf32>
    %c5_205 = arith.constant 5 : index
    %c0_206 = arith.constant 0 : index
    %394 = tpu.strided_load %arg5[%c5_205, %c0_206] {strides = array<i32: 16, 1>} : memref<32x32xf32, #tpu.memory_space<vmem>>, vector<2x32xf32>
    %c5_207 = arith.constant 5 : index
    %c0_208 = arith.constant 0 : index
    %395 = tpu.strided_load %arg6[%c5_207, %c0_208] {strides = array<i32: 16, 1>} : memref<32x32xf32, #tpu.memory_space<vmem>>, vector<2x32xf32>
    %cst_209 = arith.constant dense<0.000000e+00> : vector<2x32xf32>
    %396 = tpu.matmul %390, %195, %cst_209 {dimension_numbers = #tpu.dot_dimension_numbers<[1], [0], [0], [1], [0, 0, 1, 1], [], []>} : vector<2x32xf32>, vector<32x32xf32>, vector<2x32xf32> -> vector<2x32xf32>
    %397 = arith.addf %392, %396 : vector<2x32xf32>
    %cst_210 = arith.constant dense<0.000000e+00> : vector<2x32xf32>
    %398 = tpu.matmul %390, %196, %cst_210 {dimension_numbers = #tpu.dot_dimension_numbers<[1], [0], [0], [1], [0, 0, 1, 1], [], []>} : vector<2x32xf32>, vector<32x32xf32>, vector<2x32xf32> -> vector<2x32xf32>
    %399 = arith.addf %393, %398 : vector<2x32xf32>
    %cst_211 = arith.constant dense<0.000000e+00> : vector<2x32xf32>
    %400 = tpu.matmul %390, %197, %cst_211 {dimension_numbers = #tpu.dot_dimension_numbers<[1], [0], [0], [1], [0, 0, 1, 1], [], []>} : vector<2x32xf32>, vector<32x32xf32>, vector<2x32xf32> -> vector<2x32xf32>
    %401 = arith.addf %394, %400 : vector<2x32xf32>
    %cst_212 = arith.constant dense<0.000000e+00> : vector<2x32xf32>
    %402 = tpu.matmul %390, %198, %cst_212 {dimension_numbers = #tpu.dot_dimension_numbers<[1], [0], [0], [1], [0, 0, 1, 1], [], []>} : vector<2x32xf32>, vector<32x32xf32>, vector<2x32xf32> -> vector<2x32xf32>
    %403 = arith.addf %395, %402 : vector<2x32xf32>
    %cst_213 = arith.constant 5.000000e-01 : f32
    %404 = vector.broadcast %cst_213 : f32 to vector<2x32xf32>
    %405 = arith.mulf %404, %397 : vector<2x32xf32>
    %406 = math.tanh %405 : vector<2x32xf32>
    %cst_214 = arith.constant 1.000000e+00 : f32
    %407 = vector.broadcast %cst_214 : f32 to vector<2x32xf32>
    %408 = arith.addf %406, %407 : vector<2x32xf32>
    %cst_215 = arith.constant 5.000000e-01 : f32
    %409 = vector.broadcast %cst_215 : f32 to vector<2x32xf32>
    %410 = arith.mulf %409, %408 : vector<2x32xf32>
    %cst_216 = arith.constant 5.000000e-01 : f32
    %411 = vector.broadcast %cst_216 : f32 to vector<2x32xf32>
    %412 = arith.mulf %411, %399 : vector<2x32xf32>
    %413 = math.tanh %412 : vector<2x32xf32>
    %cst_217 = arith.constant 1.000000e+00 : f32
    %414 = vector.broadcast %cst_217 : f32 to vector<2x32xf32>
    %415 = arith.addf %413, %414 : vector<2x32xf32>
    %cst_218 = arith.constant 5.000000e-01 : f32
    %416 = vector.broadcast %cst_218 : f32 to vector<2x32xf32>
    %417 = arith.mulf %416, %415 : vector<2x32xf32>
    %418 = math.tanh %401 : vector<2x32xf32>
    %cst_219 = arith.constant 5.000000e-01 : f32
    %419 = vector.broadcast %cst_219 : f32 to vector<2x32xf32>
    %420 = arith.mulf %419, %403 : vector<2x32xf32>
    %421 = math.tanh %420 : vector<2x32xf32>
    %cst_220 = arith.constant 1.000000e+00 : f32
    %422 = vector.broadcast %cst_220 : f32 to vector<2x32xf32>
    %423 = arith.addf %421, %422 : vector<2x32xf32>
    %cst_221 = arith.constant 5.000000e-01 : f32
    %424 = vector.broadcast %cst_221 : f32 to vector<2x32xf32>
    %425 = arith.mulf %424, %423 : vector<2x32xf32>
    %426 = arith.mulf %417, %388 : vector<2x32xf32>
    %427 = arith.mulf %410, %418 : vector<2x32xf32>
    %428 = arith.addf %426, %427 : vector<2x32xf32>
    %429 = math.tanh %428 : vector<2x32xf32>
    %430 = arith.mulf %425, %429 : vector<2x32xf32>
    %c10 = arith.constant 10 : index
    %c0_222 = arith.constant 0 : index
    %431 = vector.load %arg7[%c10, %c0_222] : memref<32x32xf32, #tpu.memory_space<vmem>>, vector<2x32xf32>
    tpu.vector_store %arg7[%c10, %c0_222], %430 {strides = array<i32>} : memref<32x32xf32, #tpu.memory_space<vmem>>, vector<2x32xf32>,
    %c6_223 = arith.constant 6 : index
    %c0_224 = arith.constant 0 : index
    %432 = tpu.strided_load %arg3[%c6_223, %c0_224] {strides = array<i32: 16, 1>} : memref<32x32xf32, #tpu.memory_space<vmem>>, vector<2x32xf32>
    %c6_225 = arith.constant 6 : index
    %c0_226 = arith.constant 0 : index
    %433 = tpu.strided_load %arg4[%c6_225, %c0_226] {strides = array<i32: 16, 1>} : memref<32x32xf32, #tpu.memory_space<vmem>>, vector<2x32xf32>
    %c6_227 = arith.constant 6 : index
    %c0_228 = arith.constant 0 : index
    %434 = tpu.strided_load %arg5[%c6_227, %c0_228] {strides = array<i32: 16, 1>} : memref<32x32xf32, #tpu.memory_space<vmem>>, vector<2x32xf32>
    %c6_229 = arith.constant 6 : index
    %c0_230 = arith.constant 0 : index
    %435 = tpu.strided_load %arg6[%c6_229, %c0_230] {strides = array<i32: 16, 1>} : memref<32x32xf32, #tpu.memory_space<vmem>>, vector<2x32xf32>
    %cst_231 = arith.constant dense<0.000000e+00> : vector<2x32xf32>
    %436 = tpu.matmul %430, %195, %cst_231 {dimension_numbers = #tpu.dot_dimension_numbers<[1], [0], [0], [1], [0, 0, 1, 1], [], []>} : vector<2x32xf32>, vector<32x32xf32>, vector<2x32xf32> -> vector<2x32xf32>
    %437 = arith.addf %432, %436 : vector<2x32xf32>
    %cst_232 = arith.constant dense<0.000000e+00> : vector<2x32xf32>
    %438 = tpu.matmul %430, %196, %cst_232 {dimension_numbers = #tpu.dot_dimension_numbers<[1], [0], [0], [1], [0, 0, 1, 1], [], []>} : vector<2x32xf32>, vector<32x32xf32>, vector<2x32xf32> -> vector<2x32xf32>
    %439 = arith.addf %433, %438 : vector<2x32xf32>
    %cst_233 = arith.constant dense<0.000000e+00> : vector<2x32xf32>
    %440 = tpu.matmul %430, %197, %cst_233 {dimension_numbers = #tpu.dot_dimension_numbers<[1], [0], [0], [1], [0, 0, 1, 1], [], []>} : vector<2x32xf32>, vector<32x32xf32>, vector<2x32xf32> -> vector<2x32xf32>
    %441 = arith.addf %434, %440 : vector<2x32xf32>
    %cst_234 = arith.constant dense<0.000000e+00> : vector<2x32xf32>
    %442 = tpu.matmul %430, %198, %cst_234 {dimension_numbers = #tpu.dot_dimension_numbers<[1], [0], [0], [1], [0, 0, 1, 1], [], []>} : vector<2x32xf32>, vector<32x32xf32>, vector<2x32xf32> -> vector<2x32xf32>
    %443 = arith.addf %435, %442 : vector<2x32xf32>
    %cst_235 = arith.constant 5.000000e-01 : f32
    %444 = vector.broadcast %cst_235 : f32 to vector<2x32xf32>
    %445 = arith.mulf %444, %437 : vector<2x32xf32>
    %446 = math.tanh %445 : vector<2x32xf32>
    %cst_236 = arith.constant 1.000000e+00 : f32
    %447 = vector.broadcast %cst_236 : f32 to vector<2x32xf32>
    %448 = arith.addf %446, %447 : vector<2x32xf32>
    %cst_237 = arith.constant 5.000000e-01 : f32
    %449 = vector.broadcast %cst_237 : f32 to vector<2x32xf32>
    %450 = arith.mulf %449, %448 : vector<2x32xf32>
    %cst_238 = arith.constant 5.000000e-01 : f32
    %451 = vector.broadcast %cst_238 : f32 to vector<2x32xf32>
    %452 = arith.mulf %451, %439 : vector<2x32xf32>
    %453 = math.tanh %452 : vector<2x32xf32>
    %cst_239 = arith.constant 1.000000e+00 : f32
    %454 = vector.broadcast %cst_239 : f32 to vector<2x32xf32>
    %455 = arith.addf %453, %454 : vector<2x32xf32>
    %cst_240 = arith.constant 5.000000e-01 : f32
    %456 = vector.broadcast %cst_240 : f32 to vector<2x32xf32>
    %457 = arith.mulf %456, %455 : vector<2x32xf32>
    %458 = math.tanh %441 : vector<2x32xf32>
    %cst_241 = arith.constant 5.000000e-01 : f32
    %459 = vector.broadcast %cst_241 : f32 to vector<2x32xf32>
    %460 = arith.mulf %459, %443 : vector<2x32xf32>
    %461 = math.tanh %460 : vector<2x32xf32>
    %cst_242 = arith.constant 1.000000e+00 : f32
    %462 = vector.broadcast %cst_242 : f32 to vector<2x32xf32>
    %463 = arith.addf %461, %462 : vector<2x32xf32>
    %cst_243 = arith.constant 5.000000e-01 : f32
    %464 = vector.broadcast %cst_243 : f32 to vector<2x32xf32>
    %465 = arith.mulf %464, %463 : vector<2x32xf32>
    %466 = arith.mulf %457, %428 : vector<2x32xf32>
    %467 = arith.mulf %450, %458 : vector<2x32xf32>
    %468 = arith.addf %466, %467 : vector<2x32xf32>
    %469 = math.tanh %468 : vector<2x32xf32>
    %470 = arith.mulf %465, %469 : vector<2x32xf32>
    %c12 = arith.constant 12 : index
    %c0_244 = arith.constant 0 : index
    %471 = vector.load %arg7[%c12, %c0_244] : memref<32x32xf32, #tpu.memory_space<vmem>>, vector<2x32xf32>
    tpu.vector_store %arg7[%c12, %c0_244], %470 {strides = array<i32>} : memref<32x32xf32, #tpu.memory_space<vmem>>, vector<2x32xf32>,
    %c7 = arith.constant 7 : index
    %c0_245 = arith.constant 0 : index
    %472 = tpu.strided_load %arg3[%c7, %c0_245] {strides = array<i32: 16, 1>} : memref<32x32xf32, #tpu.memory_space<vmem>>, vector<2x32xf32>
    %c7_246 = arith.constant 7 : index
    %c0_247 = arith.constant 0 : index
    %473 = tpu.strided_load %arg4[%c7_246, %c0_247] {strides = array<i32: 16, 1>} : memref<32x32xf32, #tpu.memory_space<vmem>>, vector<2x32xf32>
    %c7_248 = arith.constant 7 : index
    %c0_249 = arith.constant 0 : index
    %474 = tpu.strided_load %arg5[%c7_248, %c0_249] {strides = array<i32: 16, 1>} : memref<32x32xf32, #tpu.memory_space<vmem>>, vector<2x32xf32>
    %c7_250 = arith.constant 7 : index
    %c0_251 = arith.constant 0 : index
    %475 = tpu.strided_load %arg6[%c7_250, %c0_251] {strides = array<i32: 16, 1>} : memref<32x32xf32, #tpu.memory_space<vmem>>, vector<2x32xf32>
    %cst_252 = arith.constant dense<0.000000e+00> : vector<2x32xf32>
    %476 = tpu.matmul %470, %195, %cst_252 {dimension_numbers = #tpu.dot_dimension_numbers<[1], [0], [0], [1], [0, 0, 1, 1], [], []>} : vector<2x32xf32>, vector<32x32xf32>, vector<2x32xf32> -> vector<2x32xf32>
    %477 = arith.addf %472, %476 : vector<2x32xf32>
    %cst_253 = arith.constant dense<0.000000e+00> : vector<2x32xf32>
    %478 = tpu.matmul %470, %196, %cst_253 {dimension_numbers = #tpu.dot_dimension_numbers<[1], [0], [0], [1], [0, 0, 1, 1], [], []>} : vector<2x32xf32>, vector<32x32xf32>, vector<2x32xf32> -> vector<2x32xf32>
    %479 = arith.addf %473, %478 : vector<2x32xf32>
    %cst_254 = arith.constant dense<0.000000e+00> : vector<2x32xf32>
    %480 = tpu.matmul %470, %197, %cst_254 {dimension_numbers = #tpu.dot_dimension_numbers<[1], [0], [0], [1], [0, 0, 1, 1], [], []>} : vector<2x32xf32>, vector<32x32xf32>, vector<2x32xf32> -> vector<2x32xf32>
    %481 = arith.addf %474, %480 : vector<2x32xf32>
    %cst_255 = arith.constant dense<0.000000e+00> : vector<2x32xf32>
    %482 = tpu.matmul %470, %198, %cst_255 {dimension_numbers = #tpu.dot_dimension_numbers<[1], [0], [0], [1], [0, 0, 1, 1], [], []>} : vector<2x32xf32>, vector<32x32xf32>, vector<2x32xf32> -> vector<2x32xf32>
    %483 = arith.addf %475, %482 : vector<2x32xf32>
    %cst_256 = arith.constant 5.000000e-01 : f32
    %484 = vector.broadcast %cst_256 : f32 to vector<2x32xf32>
    %485 = arith.mulf %484, %477 : vector<2x32xf32>
    %486 = math.tanh %485 : vector<2x32xf32>
    %cst_257 = arith.constant 1.000000e+00 : f32
    %487 = vector.broadcast %cst_257 : f32 to vector<2x32xf32>
    %488 = arith.addf %486, %487 : vector<2x32xf32>
    %cst_258 = arith.constant 5.000000e-01 : f32
    %489 = vector.broadcast %cst_258 : f32 to vector<2x32xf32>
    %490 = arith.mulf %489, %488 : vector<2x32xf32>
    %cst_259 = arith.constant 5.000000e-01 : f32
    %491 = vector.broadcast %cst_259 : f32 to vector<2x32xf32>
    %492 = arith.mulf %491, %479 : vector<2x32xf32>
    %493 = math.tanh %492 : vector<2x32xf32>
    %cst_260 = arith.constant 1.000000e+00 : f32
    %494 = vector.broadcast %cst_260 : f32 to vector<2x32xf32>
    %495 = arith.addf %493, %494 : vector<2x32xf32>
    %cst_261 = arith.constant 5.000000e-01 : f32
    %496 = vector.broadcast %cst_261 : f32 to vector<2x32xf32>
    %497 = arith.mulf %496, %495 : vector<2x32xf32>
    %498 = math.tanh %481 : vector<2x32xf32>
    %cst_262 = arith.constant 5.000000e-01 : f32
    %499 = vector.broadcast %cst_262 : f32 to vector<2x32xf32>
    %500 = arith.mulf %499, %483 : vector<2x32xf32>
    %501 = math.tanh %500 : vector<2x32xf32>
    %cst_263 = arith.constant 1.000000e+00 : f32
    %502 = vector.broadcast %cst_263 : f32 to vector<2x32xf32>
    %503 = arith.addf %501, %502 : vector<2x32xf32>
    %cst_264 = arith.constant 5.000000e-01 : f32
    %504 = vector.broadcast %cst_264 : f32 to vector<2x32xf32>
    %505 = arith.mulf %504, %503 : vector<2x32xf32>
    %506 = arith.mulf %497, %468 : vector<2x32xf32>
    %507 = arith.mulf %490, %498 : vector<2x32xf32>
    %508 = arith.addf %506, %507 : vector<2x32xf32>
    %509 = math.tanh %508 : vector<2x32xf32>
    %510 = arith.mulf %505, %509 : vector<2x32xf32>
    %c14 = arith.constant 14 : index
    %c0_265 = arith.constant 0 : index
    %511 = vector.load %arg7[%c14, %c0_265] : memref<32x32xf32, #tpu.memory_space<vmem>>, vector<2x32xf32>
    tpu.vector_store %arg7[%c14, %c0_265], %510 {strides = array<i32>} : memref<32x32xf32, #tpu.memory_space<vmem>>, vector<2x32xf32>,
    %c8_266 = arith.constant 8 : index
    %c0_267 = arith.constant 0 : index
    %512 = tpu.strided_load %arg3[%c8_266, %c0_267] {strides = array<i32: 16, 1>} : memref<32x32xf32, #tpu.memory_space<vmem>>, vector<2x32xf32>
    %c8_268 = arith.constant 8 : index
    %c0_269 = arith.constant 0 : index
    %513 = tpu.strided_load %arg4[%c8_268, %c0_269] {strides = array<i32: 16, 1>} : memref<32x32xf32, #tpu.memory_space<vmem>>, vector<2x32xf32>
    %c8_270 = arith.constant 8 : index
    %c0_271 = arith.constant 0 : index
    %514 = tpu.strided_load %arg5[%c8_270, %c0_271] {strides = array<i32: 16, 1>} : memref<32x32xf32, #tpu.memory_space<vmem>>, vector<2x32xf32>
    %c8_272 = arith.constant 8 : index
    %c0_273 = arith.constant 0 : index
    %515 = tpu.strided_load %arg6[%c8_272, %c0_273] {strides = array<i32: 16, 1>} : memref<32x32xf32, #tpu.memory_space<vmem>>, vector<2x32xf32>
    %cst_274 = arith.constant dense<0.000000e+00> : vector<2x32xf32>
    %516 = tpu.matmul %510, %195, %cst_274 {dimension_numbers = #tpu.dot_dimension_numbers<[1], [0], [0], [1], [0, 0, 1, 1], [], []>} : vector<2x32xf32>, vector<32x32xf32>, vector<2x32xf32> -> vector<2x32xf32>
    %517 = arith.addf %512, %516 : vector<2x32xf32>
    %cst_275 = arith.constant dense<0.000000e+00> : vector<2x32xf32>
    %518 = tpu.matmul %510, %196, %cst_275 {dimension_numbers = #tpu.dot_dimension_numbers<[1], [0], [0], [1], [0, 0, 1, 1], [], []>} : vector<2x32xf32>, vector<32x32xf32>, vector<2x32xf32> -> vector<2x32xf32>
    %519 = arith.addf %513, %518 : vector<2x32xf32>
    %cst_276 = arith.constant dense<0.000000e+00> : vector<2x32xf32>
    %520 = tpu.matmul %510, %197, %cst_276 {dimension_numbers = #tpu.dot_dimension_numbers<[1], [0], [0], [1], [0, 0, 1, 1], [], []>} : vector<2x32xf32>, vector<32x32xf32>, vector<2x32xf32> -> vector<2x32xf32>
    %521 = arith.addf %514, %520 : vector<2x32xf32>
    %cst_277 = arith.constant dense<0.000000e+00> : vector<2x32xf32>
    %522 = tpu.matmul %510, %198, %cst_277 {dimension_numbers = #tpu.dot_dimension_numbers<[1], [0], [0], [1], [0, 0, 1, 1], [], []>} : vector<2x32xf32>, vector<32x32xf32>, vector<2x32xf32> -> vector<2x32xf32>
    %523 = arith.addf %515, %522 : vector<2x32xf32>
    %cst_278 = arith.constant 5.000000e-01 : f32
    %524 = vector.broadcast %cst_278 : f32 to vector<2x32xf32>
    %525 = arith.mulf %524, %517 : vector<2x32xf32>
    %526 = math.tanh %525 : vector<2x32xf32>
    %cst_279 = arith.constant 1.000000e+00 : f32
    %527 = vector.broadcast %cst_279 : f32 to vector<2x32xf32>
    %528 = arith.addf %526, %527 : vector<2x32xf32>
    %cst_280 = arith.constant 5.000000e-01 : f32
    %529 = vector.broadcast %cst_280 : f32 to vector<2x32xf32>
    %530 = arith.mulf %529, %528 : vector<2x32xf32>
    %cst_281 = arith.constant 5.000000e-01 : f32
    %531 = vector.broadcast %cst_281 : f32 to vector<2x32xf32>
    %532 = arith.mulf %531, %519 : vector<2x32xf32>
    %533 = math.tanh %532 : vector<2x32xf32>
    %cst_282 = arith.constant 1.000000e+00 : f32
    %534 = vector.broadcast %cst_282 : f32 to vector<2x32xf32>
    %535 = arith.addf %533, %534 : vector<2x32xf32>
    %cst_283 = arith.constant 5.000000e-01 : f32
    %536 = vector.broadcast %cst_283 : f32 to vector<2x32xf32>
    %537 = arith.mulf %536, %535 : vector<2x32xf32>
    %538 = math.tanh %521 : vector<2x32xf32>
    %cst_284 = arith.constant 5.000000e-01 : f32
    %539 = vector.broadcast %cst_284 : f32 to vector<2x32xf32>
    %540 = arith.mulf %539, %523 : vector<2x32xf32>
    %541 = math.tanh %540 : vector<2x32xf32>
    %cst_285 = arith.constant 1.000000e+00 : f32
    %542 = vector.broadcast %cst_285 : f32 to vector<2x32xf32>
    %543 = arith.addf %541, %542 : vector<2x32xf32>
    %cst_286 = arith.constant 5.000000e-01 : f32
    %544 = vector.broadcast %cst_286 : f32 to vector<2x32xf32>
    %545 = arith.mulf %544, %543 : vector<2x32xf32>
    %546 = arith.mulf %537, %508 : vector<2x32xf32>
    %547 = arith.mulf %530, %538 : vector<2x32xf32>
    %548 = arith.addf %546, %547 : vector<2x32xf32>
    %549 = math.tanh %548 : vector<2x32xf32>
    %550 = arith.mulf %545, %549 : vector<2x32xf32>
    %c16_287 = arith.constant 16 : index
    %c0_288 = arith.constant 0 : index
    %551 = vector.load %arg7[%c16_287, %c0_288] : memref<32x32xf32, #tpu.memory_space<vmem>>, vector<2x32xf32>
    tpu.vector_store %arg7[%c16_287, %c0_288], %550 {strides = array<i32>} : memref<32x32xf32, #tpu.memory_space<vmem>>, vector<2x32xf32>,
    %c9 = arith.constant 9 : index
    %c0_289 = arith.constant 0 : index
    %552 = tpu.strided_load %arg3[%c9, %c0_289] {strides = array<i32: 16, 1>} : memref<32x32xf32, #tpu.memory_space<vmem>>, vector<2x32xf32>
    %c9_290 = arith.constant 9 : index
    %c0_291 = arith.constant 0 : index
    %553 = tpu.strided_load %arg4[%c9_290, %c0_291] {strides = array<i32: 16, 1>} : memref<32x32xf32, #tpu.memory_space<vmem>>, vector<2x32xf32>
    %c9_292 = arith.constant 9 : index
    %c0_293 = arith.constant 0 : index
    %554 = tpu.strided_load %arg5[%c9_292, %c0_293] {strides = array<i32: 16, 1>} : memref<32x32xf32, #tpu.memory_space<vmem>>, vector<2x32xf32>
    %c9_294 = arith.constant 9 : index
    %c0_295 = arith.constant 0 : index
    %555 = tpu.strided_load %arg6[%c9_294, %c0_295] {strides = array<i32: 16, 1>} : memref<32x32xf32, #tpu.memory_space<vmem>>, vector<2x32xf32>
    %cst_296 = arith.constant dense<0.000000e+00> : vector<2x32xf32>
    %556 = tpu.matmul %550, %195, %cst_296 {dimension_numbers = #tpu.dot_dimension_numbers<[1], [0], [0], [1], [0, 0, 1, 1], [], []>} : vector<2x32xf32>, vector<32x32xf32>, vector<2x32xf32> -> vector<2x32xf32>
    %557 = arith.addf %552, %556 : vector<2x32xf32>
    %cst_297 = arith.constant dense<0.000000e+00> : vector<2x32xf32>
    %558 = tpu.matmul %550, %196, %cst_297 {dimension_numbers = #tpu.dot_dimension_numbers<[1], [0], [0], [1], [0, 0, 1, 1], [], []>} : vector<2x32xf32>, vector<32x32xf32>, vector<2x32xf32> -> vector<2x32xf32>
    %559 = arith.addf %553, %558 : vector<2x32xf32>
    %cst_298 = arith.constant dense<0.000000e+00> : vector<2x32xf32>
    %560 = tpu.matmul %550, %197, %cst_298 {dimension_numbers = #tpu.dot_dimension_numbers<[1], [0], [0], [1], [0, 0, 1, 1], [], []>} : vector<2x32xf32>, vector<32x32xf32>, vector<2x32xf32> -> vector<2x32xf32>
    %561 = arith.addf %554, %560 : vector<2x32xf32>
    %cst_299 = arith.constant dense<0.000000e+00> : vector<2x32xf32>
    %562 = tpu.matmul %550, %198, %cst_299 {dimension_numbers = #tpu.dot_dimension_numbers<[1], [0], [0], [1], [0, 0, 1, 1], [], []>} : vector<2x32xf32>, vector<32x32xf32>, vector<2x32xf32> -> vector<2x32xf32>
    %563 = arith.addf %555, %562 : vector<2x32xf32>
    %cst_300 = arith.constant 5.000000e-01 : f32
    %564 = vector.broadcast %cst_300 : f32 to vector<2x32xf32>
    %565 = arith.mulf %564, %557 : vector<2x32xf32>
    %566 = math.tanh %565 : vector<2x32xf32>
    %cst_301 = arith.constant 1.000000e+00 : f32
    %567 = vector.broadcast %cst_301 : f32 to vector<2x32xf32>
    %568 = arith.addf %566, %567 : vector<2x32xf32>
    %cst_302 = arith.constant 5.000000e-01 : f32
    %569 = vector.broadcast %cst_302 : f32 to vector<2x32xf32>
    %570 = arith.mulf %569, %568 : vector<2x32xf32>
    %cst_303 = arith.constant 5.000000e-01 : f32
    %571 = vector.broadcast %cst_303 : f32 to vector<2x32xf32>
    %572 = arith.mulf %571, %559 : vector<2x32xf32>
    %573 = math.tanh %572 : vector<2x32xf32>
    %cst_304 = arith.constant 1.000000e+00 : f32
    %574 = vector.broadcast %cst_304 : f32 to vector<2x32xf32>
    %575 = arith.addf %573, %574 : vector<2x32xf32>
    %cst_305 = arith.constant 5.000000e-01 : f32
    %576 = vector.broadcast %cst_305 : f32 to vector<2x32xf32>
    %577 = arith.mulf %576, %575 : vector<2x32xf32>
    %578 = math.tanh %561 : vector<2x32xf32>
    %cst_306 = arith.constant 5.000000e-01 : f32
    %579 = vector.broadcast %cst_306 : f32 to vector<2x32xf32>
    %580 = arith.mulf %579, %563 : vector<2x32xf32>
    %581 = math.tanh %580 : vector<2x32xf32>
    %cst_307 = arith.constant 1.000000e+00 : f32
    %582 = vector.broadcast %cst_307 : f32 to vector<2x32xf32>
    %583 = arith.addf %581, %582 : vector<2x32xf32>
    %cst_308 = arith.constant 5.000000e-01 : f32
    %584 = vector.broadcast %cst_308 : f32 to vector<2x32xf32>
    %585 = arith.mulf %584, %583 : vector<2x32xf32>
    %586 = arith.mulf %577, %548 : vector<2x32xf32>
    %587 = arith.mulf %570, %578 : vector<2x32xf32>
    %588 = arith.addf %586, %587 : vector<2x32xf32>
    %589 = math.tanh %588 : vector<2x32xf32>
    %590 = arith.mulf %585, %589 : vector<2x32xf32>
    %c18 = arith.constant 18 : index
    %c0_309 = arith.constant 0 : index
    %591 = vector.load %arg7[%c18, %c0_309] : memref<32x32xf32, #tpu.memory_space<vmem>>, vector<2x32xf32>
    tpu.vector_store %arg7[%c18, %c0_309], %590 {strides = array<i32>} : memref<32x32xf32, #tpu.memory_space<vmem>>, vector<2x32xf32>,
    %c10_310 = arith.constant 10 : index
    %c0_311 = arith.constant 0 : index
    %592 = tpu.strided_load %arg3[%c10_310, %c0_311] {strides = array<i32: 16, 1>} : memref<32x32xf32, #tpu.memory_space<vmem>>, vector<2x32xf32>
    %c10_312 = arith.constant 10 : index
    %c0_313 = arith.constant 0 : index
    %593 = tpu.strided_load %arg4[%c10_312, %c0_313] {strides = array<i32: 16, 1>} : memref<32x32xf32, #tpu.memory_space<vmem>>, vector<2x32xf32>
    %c10_314 = arith.constant 10 : index
    %c0_315 = arith.constant 0 : index
    %594 = tpu.strided_load %arg5[%c10_314, %c0_315] {strides = array<i32: 16, 1>} : memref<32x32xf32, #tpu.memory_space<vmem>>, vector<2x32xf32>
    %c10_316 = arith.constant 10 : index
    %c0_317 = arith.constant 0 : index
    %595 = tpu.strided_load %arg6[%c10_316, %c0_317] {strides = array<i32: 16, 1>} : memref<32x32xf32, #tpu.memory_space<vmem>>, vector<2x32xf32>
    %cst_318 = arith.constant dense<0.000000e+00> : vector<2x32xf32>
    %596 = tpu.matmul %590, %195, %cst_318 {dimension_numbers = #tpu.dot_dimension_numbers<[1], [0], [0], [1], [0, 0, 1, 1], [], []>} : vector<2x32xf32>, vector<32x32xf32>, vector<2x32xf32> -> vector<2x32xf32>
    %597 = arith.addf %592, %596 : vector<2x32xf32>
    %cst_319 = arith.constant dense<0.000000e+00> : vector<2x32xf32>
    %598 = tpu.matmul %590, %196, %cst_319 {dimension_numbers = #tpu.dot_dimension_numbers<[1], [0], [0], [1], [0, 0, 1, 1], [], []>} : vector<2x32xf32>, vector<32x32xf32>, vector<2x32xf32> -> vector<2x32xf32>
    %599 = arith.addf %593, %598 : vector<2x32xf32>
    %cst_320 = arith.constant dense<0.000000e+00> : vector<2x32xf32>
    %600 = tpu.matmul %590, %197, %cst_320 {dimension_numbers = #tpu.dot_dimension_numbers<[1], [0], [0], [1], [0, 0, 1, 1], [], []>} : vector<2x32xf32>, vector<32x32xf32>, vector<2x32xf32> -> vector<2x32xf32>
    %601 = arith.addf %594, %600 : vector<2x32xf32>
    %cst_321 = arith.constant dense<0.000000e+00> : vector<2x32xf32>
    %602 = tpu.matmul %590, %198, %cst_321 {dimension_numbers = #tpu.dot_dimension_numbers<[1], [0], [0], [1], [0, 0, 1, 1], [], []>} : vector<2x32xf32>, vector<32x32xf32>, vector<2x32xf32> -> vector<2x32xf32>
    %603 = arith.addf %595, %602 : vector<2x32xf32>
    %cst_322 = arith.constant 5.000000e-01 : f32
    %604 = vector.broadcast %cst_322 : f32 to vector<2x32xf32>
    %605 = arith.mulf %604, %597 : vector<2x32xf32>
    %606 = math.tanh %605 : vector<2x32xf32>
    %cst_323 = arith.constant 1.000000e+00 : f32
    %607 = vector.broadcast %cst_323 : f32 to vector<2x32xf32>
    %608 = arith.addf %606, %607 : vector<2x32xf32>
    %cst_324 = arith.constant 5.000000e-01 : f32
    %609 = vector.broadcast %cst_324 : f32 to vector<2x32xf32>
    %610 = arith.mulf %609, %608 : vector<2x32xf32>
    %cst_325 = arith.constant 5.000000e-01 : f32
    %611 = vector.broadcast %cst_325 : f32 to vector<2x32xf32>
    %612 = arith.mulf %611, %599 : vector<2x32xf32>
    %613 = math.tanh %612 : vector<2x32xf32>
    %cst_326 = arith.constant 1.000000e+00 : f32
    %614 = vector.broadcast %cst_326 : f32 to vector<2x32xf32>
    %615 = arith.addf %613, %614 : vector<2x32xf32>
    %cst_327 = arith.constant 5.000000e-01 : f32
    %616 = vector.broadcast %cst_327 : f32 to vector<2x32xf32>
    %617 = arith.mulf %616, %615 : vector<2x32xf32>
    %618 = math.tanh %601 : vector<2x32xf32>
    %cst_328 = arith.constant 5.000000e-01 : f32
    %619 = vector.broadcast %cst_328 : f32 to vector<2x32xf32>
    %620 = arith.mulf %619, %603 : vector<2x32xf32>
    %621 = math.tanh %620 : vector<2x32xf32>
    %cst_329 = arith.constant 1.000000e+00 : f32
    %622 = vector.broadcast %cst_329 : f32 to vector<2x32xf32>
    %623 = arith.addf %621, %622 : vector<2x32xf32>
    %cst_330 = arith.constant 5.000000e-01 : f32
    %624 = vector.broadcast %cst_330 : f32 to vector<2x32xf32>
    %625 = arith.mulf %624, %623 : vector<2x32xf32>
    %626 = arith.mulf %617, %588 : vector<2x32xf32>
    %627 = arith.mulf %610, %618 : vector<2x32xf32>
    %628 = arith.addf %626, %627 : vector<2x32xf32>
    %629 = math.tanh %628 : vector<2x32xf32>
    %630 = arith.mulf %625, %629 : vector<2x32xf32>
    %c20 = arith.constant 20 : index
    %c0_331 = arith.constant 0 : index
    %631 = vector.load %arg7[%c20, %c0_331] : memref<32x32xf32, #tpu.memory_space<vmem>>, vector<2x32xf32>
    tpu.vector_store %arg7[%c20, %c0_331], %630 {strides = array<i32>} : memref<32x32xf32, #tpu.memory_space<vmem>>, vector<2x32xf32>,
    %c11 = arith.constant 11 : index
    %c0_332 = arith.constant 0 : index
    %632 = tpu.strided_load %arg3[%c11, %c0_332] {strides = array<i32: 16, 1>} : memref<32x32xf32, #tpu.memory_space<vmem>>, vector<2x32xf32>
    %c11_333 = arith.constant 11 : index
    %c0_334 = arith.constant 0 : index
    %633 = tpu.strided_load %arg4[%c11_333, %c0_334] {strides = array<i32: 16, 1>} : memref<32x32xf32, #tpu.memory_space<vmem>>, vector<2x32xf32>
    %c11_335 = arith.constant 11 : index
    %c0_336 = arith.constant 0 : index
    %634 = tpu.strided_load %arg5[%c11_335, %c0_336] {strides = array<i32: 16, 1>} : memref<32x32xf32, #tpu.memory_space<vmem>>, vector<2x32xf32>
    %c11_337 = arith.constant 11 : index
    %c0_338 = arith.constant 0 : index
    %635 = tpu.strided_load %arg6[%c11_337, %c0_338] {strides = array<i32: 16, 1>} : memref<32x32xf32, #tpu.memory_space<vmem>>, vector<2x32xf32>
    %cst_339 = arith.constant dense<0.000000e+00> : vector<2x32xf32>
    %636 = tpu.matmul %630, %195, %cst_339 {dimension_numbers = #tpu.dot_dimension_numbers<[1], [0], [0], [1], [0, 0, 1, 1], [], []>} : vector<2x32xf32>, vector<32x32xf32>, vector<2x32xf32> -> vector<2x32xf32>
    %637 = arith.addf %632, %636 : vector<2x32xf32>
    %cst_340 = arith.constant dense<0.000000e+00> : vector<2x32xf32>
    %638 = tpu.matmul %630, %196, %cst_340 {dimension_numbers = #tpu.dot_dimension_numbers<[1], [0], [0], [1], [0, 0, 1, 1], [], []>} : vector<2x32xf32>, vector<32x32xf32>, vector<2x32xf32> -> vector<2x32xf32>
    %639 = arith.addf %633, %638 : vector<2x32xf32>
    %cst_341 = arith.constant dense<0.000000e+00> : vector<2x32xf32>
    %640 = tpu.matmul %630, %197, %cst_341 {dimension_numbers = #tpu.dot_dimension_numbers<[1], [0], [0], [1], [0, 0, 1, 1], [], []>} : vector<2x32xf32>, vector<32x32xf32>, vector<2x32xf32> -> vector<2x32xf32>
    %641 = arith.addf %634, %640 : vector<2x32xf32>
    %cst_342 = arith.constant dense<0.000000e+00> : vector<2x32xf32>
    %642 = tpu.matmul %630, %198, %cst_342 {dimension_numbers = #tpu.dot_dimension_numbers<[1], [0], [0], [1], [0, 0, 1, 1], [], []>} : vector<2x32xf32>, vector<32x32xf32>, vector<2x32xf32> -> vector<2x32xf32>
    %643 = arith.addf %635, %642 : vector<2x32xf32>
    %cst_343 = arith.constant 5.000000e-01 : f32
    %644 = vector.broadcast %cst_343 : f32 to vector<2x32xf32>
    %645 = arith.mulf %644, %637 : vector<2x32xf32>
    %646 = math.tanh %645 : vector<2x32xf32>
    %cst_344 = arith.constant 1.000000e+00 : f32
    %647 = vector.broadcast %cst_344 : f32 to vector<2x32xf32>
    %648 = arith.addf %646, %647 : vector<2x32xf32>
    %cst_345 = arith.constant 5.000000e-01 : f32
    %649 = vector.broadcast %cst_345 : f32 to vector<2x32xf32>
    %650 = arith.mulf %649, %648 : vector<2x32xf32>
    %cst_346 = arith.constant 5.000000e-01 : f32
    %651 = vector.broadcast %cst_346 : f32 to vector<2x32xf32>
    %652 = arith.mulf %651, %639 : vector<2x32xf32>
    %653 = math.tanh %652 : vector<2x32xf32>
    %cst_347 = arith.constant 1.000000e+00 : f32
    %654 = vector.broadcast %cst_347 : f32 to vector<2x32xf32>
    %655 = arith.addf %653, %654 : vector<2x32xf32>
    %cst_348 = arith.constant 5.000000e-01 : f32
    %656 = vector.broadcast %cst_348 : f32 to vector<2x32xf32>
    %657 = arith.mulf %656, %655 : vector<2x32xf32>
    %658 = math.tanh %641 : vector<2x32xf32>
    %cst_349 = arith.constant 5.000000e-01 : f32
    %659 = vector.broadcast %cst_349 : f32 to vector<2x32xf32>
    %660 = arith.mulf %659, %643 : vector<2x32xf32>
    %661 = math.tanh %660 : vector<2x32xf32>
    %cst_350 = arith.constant 1.000000e+00 : f32
    %662 = vector.broadcast %cst_350 : f32 to vector<2x32xf32>
    %663 = arith.addf %661, %662 : vector<2x32xf32>
    %cst_351 = arith.constant 5.000000e-01 : f32
    %664 = vector.broadcast %cst_351 : f32 to vector<2x32xf32>
    %665 = arith.mulf %664, %663 : vector<2x32xf32>
    %666 = arith.mulf %657, %628 : vector<2x32xf32>
    %667 = arith.mulf %650, %658 : vector<2x32xf32>
    %668 = arith.addf %666, %667 : vector<2x32xf32>
    %669 = math.tanh %668 : vector<2x32xf32>
    %670 = arith.mulf %665, %669 : vector<2x32xf32>
    %c22 = arith.constant 22 : index
    %c0_352 = arith.constant 0 : index
    %671 = vector.load %arg7[%c22, %c0_352] : memref<32x32xf32, #tpu.memory_space<vmem>>, vector<2x32xf32>
    tpu.vector_store %arg7[%c22, %c0_352], %670 {strides = array<i32>} : memref<32x32xf32, #tpu.memory_space<vmem>>, vector<2x32xf32>,
    %c12_353 = arith.constant 12 : index
    %c0_354 = arith.constant 0 : index
    %672 = tpu.strided_load %arg3[%c12_353, %c0_354] {strides = array<i32: 16, 1>} : memref<32x32xf32, #tpu.memory_space<vmem>>, vector<2x32xf32>
    %c12_355 = arith.constant 12 : index
    %c0_356 = arith.constant 0 : index
    %673 = tpu.strided_load %arg4[%c12_355, %c0_356] {strides = array<i32: 16, 1>} : memref<32x32xf32, #tpu.memory_space<vmem>>, vector<2x32xf32>
    %c12_357 = arith.constant 12 : index
    %c0_358 = arith.constant 0 : index
    %674 = tpu.strided_load %arg5[%c12_357, %c0_358] {strides = array<i32: 16, 1>} : memref<32x32xf32, #tpu.memory_space<vmem>>, vector<2x32xf32>
    %c12_359 = arith.constant 12 : index
    %c0_360 = arith.constant 0 : index
    %675 = tpu.strided_load %arg6[%c12_359, %c0_360] {strides = array<i32: 16, 1>} : memref<32x32xf32, #tpu.memory_space<vmem>>, vector<2x32xf32>
    %cst_361 = arith.constant dense<0.000000e+00> : vector<2x32xf32>
    %676 = tpu.matmul %670, %195, %cst_361 {dimension_numbers = #tpu.dot_dimension_numbers<[1], [0], [0], [1], [0, 0, 1, 1], [], []>} : vector<2x32xf32>, vector<32x32xf32>, vector<2x32xf32> -> vector<2x32xf32>
    %677 = arith.addf %672, %676 : vector<2x32xf32>
    %cst_362 = arith.constant dense<0.000000e+00> : vector<2x32xf32>
    %678 = tpu.matmul %670, %196, %cst_362 {dimension_numbers = #tpu.dot_dimension_numbers<[1], [0], [0], [1], [0, 0, 1, 1], [], []>} : vector<2x32xf32>, vector<32x32xf32>, vector<2x32xf32> -> vector<2x32xf32>
    %679 = arith.addf %673, %678 : vector<2x32xf32>
    %cst_363 = arith.constant dense<0.000000e+00> : vector<2x32xf32>
    %680 = tpu.matmul %670, %197, %cst_363 {dimension_numbers = #tpu.dot_dimension_numbers<[1], [0], [0], [1], [0, 0, 1, 1], [], []>} : vector<2x32xf32>, vector<32x32xf32>, vector<2x32xf32> -> vector<2x32xf32>
    %681 = arith.addf %674, %680 : vector<2x32xf32>
    %cst_364 = arith.constant dense<0.000000e+00> : vector<2x32xf32>
    %682 = tpu.matmul %670, %198, %cst_364 {dimension_numbers = #tpu.dot_dimension_numbers<[1], [0], [0], [1], [0, 0, 1, 1], [], []>} : vector<2x32xf32>, vector<32x32xf32>, vector<2x32xf32> -> vector<2x32xf32>
    %683 = arith.addf %675, %682 : vector<2x32xf32>
    %cst_365 = arith.constant 5.000000e-01 : f32
    %684 = vector.broadcast %cst_365 : f32 to vector<2x32xf32>
    %685 = arith.mulf %684, %677 : vector<2x32xf32>
    %686 = math.tanh %685 : vector<2x32xf32>
    %cst_366 = arith.constant 1.000000e+00 : f32
    %687 = vector.broadcast %cst_366 : f32 to vector<2x32xf32>
    %688 = arith.addf %686, %687 : vector<2x32xf32>
    %cst_367 = arith.constant 5.000000e-01 : f32
    %689 = vector.broadcast %cst_367 : f32 to vector<2x32xf32>
    %690 = arith.mulf %689, %688 : vector<2x32xf32>
    %cst_368 = arith.constant 5.000000e-01 : f32
    %691 = vector.broadcast %cst_368 : f32 to vector<2x32xf32>
    %692 = arith.mulf %691, %679 : vector<2x32xf32>
    %693 = math.tanh %692 : vector<2x32xf32>
    %cst_369 = arith.constant 1.000000e+00 : f32
    %694 = vector.broadcast %cst_369 : f32 to vector<2x32xf32>
    %695 = arith.addf %693, %694 : vector<2x32xf32>
    %cst_370 = arith.constant 5.000000e-01 : f32
    %696 = vector.broadcast %cst_370 : f32 to vector<2x32xf32>
    %697 = arith.mulf %696, %695 : vector<2x32xf32>
    %698 = math.tanh %681 : vector<2x32xf32>
    %cst_371 = arith.constant 5.000000e-01 : f32
    %699 = vector.broadcast %cst_371 : f32 to vector<2x32xf32>
    %700 = arith.mulf %699, %683 : vector<2x32xf32>
    %701 = math.tanh %700 : vector<2x32xf32>
    %cst_372 = arith.constant 1.000000e+00 : f32
    %702 = vector.broadcast %cst_372 : f32 to vector<2x32xf32>
    %703 = arith.addf %701, %702 : vector<2x32xf32>
    %cst_373 = arith.constant 5.000000e-01 : f32
    %704 = vector.broadcast %cst_373 : f32 to vector<2x32xf32>
    %705 = arith.mulf %704, %703 : vector<2x32xf32>
    %706 = arith.mulf %697, %668 : vector<2x32xf32>
    %707 = arith.mulf %690, %698 : vector<2x32xf32>
    %708 = arith.addf %706, %707 : vector<2x32xf32>
    %709 = math.tanh %708 : vector<2x32xf32>
    %710 = arith.mulf %705, %709 : vector<2x32xf32>
    %c24_374 = arith.constant 24 : index
    %c0_375 = arith.constant 0 : index
    %711 = vector.load %arg7[%c24_374, %c0_375] : memref<32x32xf32, #tpu.memory_space<vmem>>, vector<2x32xf32>
    tpu.vector_store %arg7[%c24_374, %c0_375], %710 {strides = array<i32>} : memref<32x32xf32, #tpu.memory_space<vmem>>, vector<2x32xf32>,
    %c13 = arith.constant 13 : index
    %c0_376 = arith.constant 0 : index
    %712 = tpu.strided_load %arg3[%c13, %c0_376] {strides = array<i32: 16, 1>} : memref<32x32xf32, #tpu.memory_space<vmem>>, vector<2x32xf32>
    %c13_377 = arith.constant 13 : index
    %c0_378 = arith.constant 0 : index
    %713 = tpu.strided_load %arg4[%c13_377, %c0_378] {strides = array<i32: 16, 1>} : memref<32x32xf32, #tpu.memory_space<vmem>>, vector<2x32xf32>
    %c13_379 = arith.constant 13 : index
    %c0_380 = arith.constant 0 : index
    %714 = tpu.strided_load %arg5[%c13_379, %c0_380] {strides = array<i32: 16, 1>} : memref<32x32xf32, #tpu.memory_space<vmem>>, vector<2x32xf32>
    %c13_381 = arith.constant 13 : index
    %c0_382 = arith.constant 0 : index
    %715 = tpu.strided_load %arg6[%c13_381, %c0_382] {strides = array<i32: 16, 1>} : memref<32x32xf32, #tpu.memory_space<vmem>>, vector<2x32xf32>
    %cst_383 = arith.constant dense<0.000000e+00> : vector<2x32xf32>
    %716 = tpu.matmul %710, %195, %cst_383 {dimension_numbers = #tpu.dot_dimension_numbers<[1], [0], [0], [1], [0, 0, 1, 1], [], []>} : vector<2x32xf32>, vector<32x32xf32>, vector<2x32xf32> -> vector<2x32xf32>
    %717 = arith.addf %712, %716 : vector<2x32xf32>
    %cst_384 = arith.constant dense<0.000000e+00> : vector<2x32xf32>
    %718 = tpu.matmul %710, %196, %cst_384 {dimension_numbers = #tpu.dot_dimension_numbers<[1], [0], [0], [1], [0, 0, 1, 1], [], []>} : vector<2x32xf32>, vector<32x32xf32>, vector<2x32xf32> -> vector<2x32xf32>
    %719 = arith.addf %713, %718 : vector<2x32xf32>
    %cst_385 = arith.constant dense<0.000000e+00> : vector<2x32xf32>
    %720 = tpu.matmul %710, %197, %cst_385 {dimension_numbers = #tpu.dot_dimension_numbers<[1], [0], [0], [1], [0, 0, 1, 1], [], []>} : vector<2x32xf32>, vector<32x32xf32>, vector<2x32xf32> -> vector<2x32xf32>
    %721 = arith.addf %714, %720 : vector<2x32xf32>
    %cst_386 = arith.constant dense<0.000000e+00> : vector<2x32xf32>
    %722 = tpu.matmul %710, %198, %cst_386 {dimension_numbers = #tpu.dot_dimension_numbers<[1], [0], [0], [1], [0, 0, 1, 1], [], []>} : vector<2x32xf32>, vector<32x32xf32>, vector<2x32xf32> -> vector<2x32xf32>
    %723 = arith.addf %715, %722 : vector<2x32xf32>
    %cst_387 = arith.constant 5.000000e-01 : f32
    %724 = vector.broadcast %cst_387 : f32 to vector<2x32xf32>
    %725 = arith.mulf %724, %717 : vector<2x32xf32>
    %726 = math.tanh %725 : vector<2x32xf32>
    %cst_388 = arith.constant 1.000000e+00 : f32
    %727 = vector.broadcast %cst_388 : f32 to vector<2x32xf32>
    %728 = arith.addf %726, %727 : vector<2x32xf32>
    %cst_389 = arith.constant 5.000000e-01 : f32
    %729 = vector.broadcast %cst_389 : f32 to vector<2x32xf32>
    %730 = arith.mulf %729, %728 : vector<2x32xf32>
    %cst_390 = arith.constant 5.000000e-01 : f32
    %731 = vector.broadcast %cst_390 : f32 to vector<2x32xf32>
    %732 = arith.mulf %731, %719 : vector<2x32xf32>
    %733 = math.tanh %732 : vector<2x32xf32>
    %cst_391 = arith.constant 1.000000e+00 : f32
    %734 = vector.broadcast %cst_391 : f32 to vector<2x32xf32>
    %735 = arith.addf %733, %734 : vector<2x32xf32>
    %cst_392 = arith.constant 5.000000e-01 : f32
    %736 = vector.broadcast %cst_392 : f32 to vector<2x32xf32>
    %737 = arith.mulf %736, %735 : vector<2x32xf32>
    %738 = math.tanh %721 : vector<2x32xf32>
    %cst_393 = arith.constant 5.000000e-01 : f32
    %739 = vector.broadcast %cst_393 : f32 to vector<2x32xf32>
    %740 = arith.mulf %739, %723 : vector<2x32xf32>
    %741 = math.tanh %740 : vector<2x32xf32>
    %cst_394 = arith.constant 1.000000e+00 : f32
    %742 = vector.broadcast %cst_394 : f32 to vector<2x32xf32>
    %743 = arith.addf %741, %742 : vector<2x32xf32>
    %cst_395 = arith.constant 5.000000e-01 : f32
    %744 = vector.broadcast %cst_395 : f32 to vector<2x32xf32>
    %745 = arith.mulf %744, %743 : vector<2x32xf32>
    %746 = arith.mulf %737, %708 : vector<2x32xf32>
    %747 = arith.mulf %730, %738 : vector<2x32xf32>
    %748 = arith.addf %746, %747 : vector<2x32xf32>
    %749 = math.tanh %748 : vector<2x32xf32>
    %750 = arith.mulf %745, %749 : vector<2x32xf32>
    %c26 = arith.constant 26 : index
    %c0_396 = arith.constant 0 : index
    %751 = vector.load %arg7[%c26, %c0_396] : memref<32x32xf32, #tpu.memory_space<vmem>>, vector<2x32xf32>
    tpu.vector_store %arg7[%c26, %c0_396], %750 {strides = array<i32>} : memref<32x32xf32, #tpu.memory_space<vmem>>, vector<2x32xf32>,
    %c14_397 = arith.constant 14 : index
    %c0_398 = arith.constant 0 : index
    %752 = tpu.strided_load %arg3[%c14_397, %c0_398] {strides = array<i32: 16, 1>} : memref<32x32xf32, #tpu.memory_space<vmem>>, vector<2x32xf32>
    %c14_399 = arith.constant 14 : index
    %c0_400 = arith.constant 0 : index
    %753 = tpu.strided_load %arg4[%c14_399, %c0_400] {strides = array<i32: 16, 1>} : memref<32x32xf32, #tpu.memory_space<vmem>>, vector<2x32xf32>
    %c14_401 = arith.constant 14 : index
    %c0_402 = arith.constant 0 : index
    %754 = tpu.strided_load %arg5[%c14_401, %c0_402] {strides = array<i32: 16, 1>} : memref<32x32xf32, #tpu.memory_space<vmem>>, vector<2x32xf32>
    %c14_403 = arith.constant 14 : index
    %c0_404 = arith.constant 0 : index
    %755 = tpu.strided_load %arg6[%c14_403, %c0_404] {strides = array<i32: 16, 1>} : memref<32x32xf32, #tpu.memory_space<vmem>>, vector<2x32xf32>
    %cst_405 = arith.constant dense<0.000000e+00> : vector<2x32xf32>
    %756 = tpu.matmul %750, %195, %cst_405 {dimension_numbers = #tpu.dot_dimension_numbers<[1], [0], [0], [1], [0, 0, 1, 1], [], []>} : vector<2x32xf32>, vector<32x32xf32>, vector<2x32xf32> -> vector<2x32xf32>
    %757 = arith.addf %752, %756 : vector<2x32xf32>
    %cst_406 = arith.constant dense<0.000000e+00> : vector<2x32xf32>
    %758 = tpu.matmul %750, %196, %cst_406 {dimension_numbers = #tpu.dot_dimension_numbers<[1], [0], [0], [1], [0, 0, 1, 1], [], []>} : vector<2x32xf32>, vector<32x32xf32>, vector<2x32xf32> -> vector<2x32xf32>
    %759 = arith.addf %753, %758 : vector<2x32xf32>
    %cst_407 = arith.constant dense<0.000000e+00> : vector<2x32xf32>
    %760 = tpu.matmul %750, %197, %cst_407 {dimension_numbers = #tpu.dot_dimension_numbers<[1], [0], [0], [1], [0, 0, 1, 1], [], []>} : vector<2x32xf32>, vector<32x32xf32>, vector<2x32xf32> -> vector<2x32xf32>
    %761 = arith.addf %754, %760 : vector<2x32xf32>
    %cst_408 = arith.constant dense<0.000000e+00> : vector<2x32xf32>
    %762 = tpu.matmul %750, %198, %cst_408 {dimension_numbers = #tpu.dot_dimension_numbers<[1], [0], [0], [1], [0, 0, 1, 1], [], []>} : vector<2x32xf32>, vector<32x32xf32>, vector<2x32xf32> -> vector<2x32xf32>
    %763 = arith.addf %755, %762 : vector<2x32xf32>
    %cst_409 = arith.constant 5.000000e-01 : f32
    %764 = vector.broadcast %cst_409 : f32 to vector<2x32xf32>
    %765 = arith.mulf %764, %757 : vector<2x32xf32>
    %766 = math.tanh %765 : vector<2x32xf32>
    %cst_410 = arith.constant 1.000000e+00 : f32
    %767 = vector.broadcast %cst_410 : f32 to vector<2x32xf32>
    %768 = arith.addf %766, %767 : vector<2x32xf32>
    %cst_411 = arith.constant 5.000000e-01 : f32
    %769 = vector.broadcast %cst_411 : f32 to vector<2x32xf32>
    %770 = arith.mulf %769, %768 : vector<2x32xf32>
    %cst_412 = arith.constant 5.000000e-01 : f32
    %771 = vector.broadcast %cst_412 : f32 to vector<2x32xf32>
    %772 = arith.mulf %771, %759 : vector<2x32xf32>
    %773 = math.tanh %772 : vector<2x32xf32>
    %cst_413 = arith.constant 1.000000e+00 : f32
    %774 = vector.broadcast %cst_413 : f32 to vector<2x32xf32>
    %775 = arith.addf %773, %774 : vector<2x32xf32>
    %cst_414 = arith.constant 5.000000e-01 : f32
    %776 = vector.broadcast %cst_414 : f32 to vector<2x32xf32>
    %777 = arith.mulf %776, %775 : vector<2x32xf32>
    %778 = math.tanh %761 : vector<2x32xf32>
    %cst_415 = arith.constant 5.000000e-01 : f32
    %779 = vector.broadcast %cst_415 : f32 to vector<2x32xf32>
    %780 = arith.mulf %779, %763 : vector<2x32xf32>
    %781 = math.tanh %780 : vector<2x32xf32>
    %cst_416 = arith.constant 1.000000e+00 : f32
    %782 = vector.broadcast %cst_416 : f32 to vector<2x32xf32>
    %783 = arith.addf %781, %782 : vector<2x32xf32>
    %cst_417 = arith.constant 5.000000e-01 : f32
    %784 = vector.broadcast %cst_417 : f32 to vector<2x32xf32>
    %785 = arith.mulf %784, %783 : vector<2x32xf32>
    %786 = arith.mulf %777, %748 : vector<2x32xf32>
    %787 = arith.mulf %770, %778 : vector<2x32xf32>
    %788 = arith.addf %786, %787 : vector<2x32xf32>
    %789 = math.tanh %788 : vector<2x32xf32>
    %790 = arith.mulf %785, %789 : vector<2x32xf32>
    %c28 = arith.constant 28 : index
    %c0_418 = arith.constant 0 : index
    %791 = vector.load %arg7[%c28, %c0_418] : memref<32x32xf32, #tpu.memory_space<vmem>>, vector<2x32xf32>
    tpu.vector_store %arg7[%c28, %c0_418], %790 {strides = array<i32>} : memref<32x32xf32, #tpu.memory_space<vmem>>, vector<2x32xf32>,
    %c15 = arith.constant 15 : index
    %c0_419 = arith.constant 0 : index
    %792 = tpu.strided_load %arg3[%c15, %c0_419] {strides = array<i32: 16, 1>} : memref<32x32xf32, #tpu.memory_space<vmem>>, vector<2x32xf32>
    %c15_420 = arith.constant 15 : index
    %c0_421 = arith.constant 0 : index
    %793 = tpu.strided_load %arg4[%c15_420, %c0_421] {strides = array<i32: 16, 1>} : memref<32x32xf32, #tpu.memory_space<vmem>>, vector<2x32xf32>
    %c15_422 = arith.constant 15 : index
    %c0_423 = arith.constant 0 : index
    %794 = tpu.strided_load %arg5[%c15_422, %c0_423] {strides = array<i32: 16, 1>} : memref<32x32xf32, #tpu.memory_space<vmem>>, vector<2x32xf32>
    %c15_424 = arith.constant 15 : index
    %c0_425 = arith.constant 0 : index
    %795 = tpu.strided_load %arg6[%c15_424, %c0_425] {strides = array<i32: 16, 1>} : memref<32x32xf32, #tpu.memory_space<vmem>>, vector<2x32xf32>
    %cst_426 = arith.constant dense<0.000000e+00> : vector<2x32xf32>
    %796 = tpu.matmul %790, %195, %cst_426 {dimension_numbers = #tpu.dot_dimension_numbers<[1], [0], [0], [1], [0, 0, 1, 1], [], []>} : vector<2x32xf32>, vector<32x32xf32>, vector<2x32xf32> -> vector<2x32xf32>
    %797 = arith.addf %792, %796 : vector<2x32xf32>
    %cst_427 = arith.constant dense<0.000000e+00> : vector<2x32xf32>
    %798 = tpu.matmul %790, %196, %cst_427 {dimension_numbers = #tpu.dot_dimension_numbers<[1], [0], [0], [1], [0, 0, 1, 1], [], []>} : vector<2x32xf32>, vector<32x32xf32>, vector<2x32xf32> -> vector<2x32xf32>
    %799 = arith.addf %793, %798 : vector<2x32xf32>
    %cst_428 = arith.constant dense<0.000000e+00> : vector<2x32xf32>
    %800 = tpu.matmul %790, %197, %cst_428 {dimension_numbers = #tpu.dot_dimension_numbers<[1], [0], [0], [1], [0, 0, 1, 1], [], []>} : vector<2x32xf32>, vector<32x32xf32>, vector<2x32xf32> -> vector<2x32xf32>
    %801 = arith.addf %794, %800 : vector<2x32xf32>
    %cst_429 = arith.constant dense<0.000000e+00> : vector<2x32xf32>
    %802 = tpu.matmul %790, %198, %cst_429 {dimension_numbers = #tpu.dot_dimension_numbers<[1], [0], [0], [1], [0, 0, 1, 1], [], []>} : vector<2x32xf32>, vector<32x32xf32>, vector<2x32xf32> -> vector<2x32xf32>
    %803 = arith.addf %795, %802 : vector<2x32xf32>
    %cst_430 = arith.constant 5.000000e-01 : f32
    %804 = vector.broadcast %cst_430 : f32 to vector<2x32xf32>
    %805 = arith.mulf %804, %797 : vector<2x32xf32>
    %806 = math.tanh %805 : vector<2x32xf32>
    %cst_431 = arith.constant 1.000000e+00 : f32
    %807 = vector.broadcast %cst_431 : f32 to vector<2x32xf32>
    %808 = arith.addf %806, %807 : vector<2x32xf32>
    %cst_432 = arith.constant 5.000000e-01 : f32
    %809 = vector.broadcast %cst_432 : f32 to vector<2x32xf32>
    %810 = arith.mulf %809, %808 : vector<2x32xf32>
    %cst_433 = arith.constant 5.000000e-01 : f32
    %811 = vector.broadcast %cst_433 : f32 to vector<2x32xf32>
    %812 = arith.mulf %811, %799 : vector<2x32xf32>
    %813 = math.tanh %812 : vector<2x32xf32>
    %cst_434 = arith.constant 1.000000e+00 : f32
    %814 = vector.broadcast %cst_434 : f32 to vector<2x32xf32>
    %815 = arith.addf %813, %814 : vector<2x32xf32>
    %cst_435 = arith.constant 5.000000e-01 : f32
    %816 = vector.broadcast %cst_435 : f32 to vector<2x32xf32>
    %817 = arith.mulf %816, %815 : vector<2x32xf32>
    %818 = math.tanh %801 : vector<2x32xf32>
    %cst_436 = arith.constant 5.000000e-01 : f32
    %819 = vector.broadcast %cst_436 : f32 to vector<2x32xf32>
    %820 = arith.mulf %819, %803 : vector<2x32xf32>
    %821 = math.tanh %820 : vector<2x32xf32>
    %cst_437 = arith.constant 1.000000e+00 : f32
    %822 = vector.broadcast %cst_437 : f32 to vector<2x32xf32>
    %823 = arith.addf %821, %822 : vector<2x32xf32>
    %cst_438 = arith.constant 5.000000e-01 : f32
    %824 = vector.broadcast %cst_438 : f32 to vector<2x32xf32>
    %825 = arith.mulf %824, %823 : vector<2x32xf32>
    %826 = arith.mulf %817, %788 : vector<2x32xf32>
    %827 = arith.mulf %810, %818 : vector<2x32xf32>
    %828 = arith.addf %826, %827 : vector<2x32xf32>
    %829 = math.tanh %828 : vector<2x32xf32>
    %830 = arith.mulf %825, %829 : vector<2x32xf32>
    %c30 = arith.constant 30 : index
    %c0_439 = arith.constant 0 : index
    %831 = vector.load %arg7[%c30, %c0_439] : memref<32x32xf32, #tpu.memory_space<vmem>>, vector<2x32xf32>
    tpu.vector_store %arg7[%c30, %c0_439], %830 {strides = array<i32>} : memref<32x32xf32, #tpu.memory_space<vmem>>, vector<2x32xf32>,
    %c0_440 = arith.constant 0 : index
    %c0_441 = arith.constant 0 : index
    %832 = vector.load %arg7[%c0_440, %c0_441] : memref<32x32xf32, #tpu.memory_space<vmem>>, vector<32x32xf32>
    %c416 = arith.constant 416 : index
    %c0_442 = arith.constant 0 : index
    %833 = vector.load %arg1[%c416, %c0_442] : memref<536x128xf32, #tpu.memory_space<vmem>>, vector<32x16xf32>
    %cst_443 = arith.constant dense<0.000000e+00> : vector<32x16xf32>
    %834 = tpu.matmul %832, %833, %cst_443 {dimension_numbers = #tpu.dot_dimension_numbers<[1], [0], [0], [1], [0, 0, 1, 1], [], []>} : vector<32x32xf32>, vector<32x16xf32>, vector<32x16xf32> -> vector<32x16xf32>
    %c448 = arith.constant 448 : index
    %c0_444 = arith.constant 0 : index
    %835 = vector.load %arg1[%c448, %c0_444] : memref<536x128xf32, #tpu.memory_space<vmem>>, vector<1x16xf32>
    %836 = vector.broadcast %835 : vector<1x16xf32> to vector<32x16xf32>
    %837 = arith.addf %834, %836 : vector<32x16xf32>
    %cst_445 = arith.constant 0.000000e+00 : f32
    %838 = vector.broadcast %cst_445 : f32 to vector<32x16xf32>
    %839 = arith.maximumf %837, %838 : vector<32x16xf32>
    %c456 = arith.constant 456 : index
    %c0_446 = arith.constant 0 : index
    %840 = vector.load %arg1[%c456, %c0_446] : memref<536x128xf32, #tpu.memory_space<vmem>>, vector<16x1xf32>
    %cst_447 = arith.constant dense<0.000000e+00> : vector<32x1xf32>
    %841 = tpu.matmul %839, %840, %cst_447 {dimension_numbers = #tpu.dot_dimension_numbers<[1], [0], [0], [1], [0, 0, 1, 1], [], []>} : vector<32x16xf32>, vector<16x1xf32>, vector<32x1xf32> -> vector<32x1xf32>
    %c472 = arith.constant 472 : index
    %c0_448 = arith.constant 0 : index
    %842 = vector.load %arg1[%c472, %c0_448] : memref<536x128xf32, #tpu.memory_space<vmem>>, vector<1x1xf32>
    %843 = vector.broadcast %842 : vector<1x1xf32> to vector<32x1xf32>
    %844 = arith.addf %841, %843 : vector<32x1xf32>
    %cst_449 = arith.constant 0.000000e+00 : f32
    %845 = vector.broadcast %cst_449 : f32 to vector<32x1xf32>
    %846 = arith.maximumf %844, %845 : vector<32x1xf32>
    %cst_450 = arith.constant 5.000000e-01 : f32
    %847 = vector.broadcast %cst_450 : f32 to vector<32x1xf32>
    %848 = arith.mulf %847, %846 : vector<32x1xf32>
    %849 = math.tanh %848 : vector<32x1xf32>
    %cst_451 = arith.constant 1.000000e+00 : f32
    %850 = vector.broadcast %cst_451 : f32 to vector<32x1xf32>
    %851 = arith.addf %849, %850 : vector<32x1xf32>
    %cst_452 = arith.constant 5.000000e-01 : f32
    %852 = vector.broadcast %cst_452 : f32 to vector<32x1xf32>
    %853 = arith.mulf %852, %851 : vector<32x1xf32>
    %c0_453 = arith.constant 0 : index
    %c0_454 = arith.constant 0 : index
    %854 = vector.load %arg2[%c0_453, %c0_454] : memref<32x1xf32, #tpu.memory_space<vmem>>, vector<32x1xf32>
    tpu.vector_store %arg2[%c0_453, %c0_454], %853 {strides = array<i32>} : memref<32x1xf32, #tpu.memory_space<vmem>>, vector<32x1xf32>,
    return
  }
}

</mosaic_0001>

<bundles_post_ra>
// kernel: tpu_custom_call.1
= control target key start
LH: loop header
LB: loop body
LE: loop exit
PB: predicated region body
PF: predicated region fallthrough
CT: control target
= control target key end

     0   :  { %7 = vsyncpa [#allocation8], 0  ;;  %s9863_s9 = smov [#allocation7]   ;;  %s10624_s0 = inlined_call_operand.vmem [shape: f32[32,4], index: 0, kind: input, shape index: {}]   ;;  %s10625_s1 = inlined_call_operand.hbm [shape: f32[536,128], index: 1, kind: input, shape index: {}]   ;;  %s10626_s2 = inlined_call_operand.vmem [shape: f32[32,1], index: 2, kind: output, shape index: {}]  }
   0x1   :  { %s15_s10 = sshll.u32 %s9863_s9, 4  ;;  %s9839_s13 = scalar_lea.hbm %s10625_s1, 8576  ;;  %s16_s10 = int_to_ptr.vmem [resolvable:$true] %s15_s10 }
   0x2   :  { %p9840_p0 = scmp.ne.s32.totalorder %s10625_s1, %s9839_s13  ;;  %p9843_p1 = scmp.lt.u32.totalorder %s9839_s13, %s10625_s1 }
   0x4   :  { %p9845_p2 = pnand %p9843_p1, %p9840_p0 }
   0x6   :  { %9848 = shalt.err (!%p9845_p2)
}
   0x7   :  { %s9849_s18 = scalar_lea.vmem %s16_s10, 8576  ;;  %p9854_p4 = scmp.lt.s32.totalorder %s16_s10, %s16_s10 }
   0x8   :  { %p9850_p3 = scmp.ne.s32.totalorder %s16_s10, %s9849_s18  ;;  %p9855_p5 = scmp.lt.s32.totalorder %s9849_s18, %s9849_s18 }
   0xa   :  { %p9856_p6 = por %p9855_p5, %p9854_p4 }
   0xc   :  { %p9857_p7 = pnand %p9856_p6, %p9850_p3 }
   0xe   :  { %9860 = shalt.err (!%p9857_p7)
}
   0xf   :  { %s9864_s19 = smov 128   ;;  %s9865_s20 = smov 8  }
  0x10   :  { %21 = dma.hbm_to_vmem [thread:$0]  %s10625_s1, 8576, %s16_s10, [#allocation8], %s9864_s19, %s9864_s19, %s9865_s20  }
  0x11   :  { %9861 = dma.done.wait [#allocation8], 8576  }
  0x12   :  { %9862 = vsyncadd [#allocation8], 4294958720  ;;  %v25_v0 = vlaneseq  ;;  %vm147_vm0 = vcmask 1043456   ;;  %vm134_vm1 = vcmask 31744   ;;  %v133_v5 = vld [vmem:[#allocation7 + $0x8] sm:$0xf] }
  0x13   :  { %v102_v6 = vld [vmem:[%s10624_s0] sm:$0xff]  ;;  %v103_v7 = vld [vmem:[%s10624_s0 + $0x8] sm:$0xff]  ;;  %8267 = vmatprep.subr.msk.mxu0 %vm147_vm0, %v133_v5  ;;  %v104_v12 = vld [vmem:[%s10624_s0 + $0x10] sm:$0xff]  ;;  %v9866_v17 = vmov 0.0   ;;  %vm450_vm8 = vcmask 64512   ;;  %vm877_vm9 = vcmask 130048  }
  0x14   :  { %v9896_v1 = vshrl.u32 %v25_v0, 7  ;;  %v106_v9 = vrot.slane %v102_v6, 7  ;;  %8269 = vmatprep.mubr.msk.f32.mxu0 %vm134_vm1, %v102_v6  ;;  %v107_v10 = vrot.slane %v103_v7, 7  ;;  %v105_v13 = vld [vmem:[%s10624_s0 + $0x18] sm:$0xff]  ;;  %8268 = vmatpush3.msk.msra.mxu0 %vm147_vm0, %v133_v5  ;;  %v108_v14 = vrot.slane %v104_v12, 7  ;;  %v543_v42 = vld [vmem:[#allocation7 + $0x20] sm:$0xff] }
  0x15   :  { %v109_v15 = vrot.slane %v105_v13, 7  ;;  %v132_v16 = vld [vmem:[#allocation7] sm:$0xf]  ;;  %8270 = vmatmul.mubr.msk.f32.vlgmr.msra.gmra.mrb[0].mxu0 %vm134_vm1, %v103_v7  ;;  %v336_v19 = vld [vmem:[#allocation7 + $0x10] sm:$0xf]  ;;  %v120_v26 = vrot.slane %v103_v7, 1  ;;  %8291 = vmatprep.subr.mxu1 %v543_v42 }
  0x16   :  { %v34_v2 = vand.u32 15, %v9896_v1  ;;  %v28_v3 = vadd.s32 16, %v9896_v1  ;;  %v27_v11 = vadd.s32 8, %v9896_v1  ;;  %vm110_vm3 = vcmp.lt.s32.totalorder %v9896_v1, 1  ;;  %8275 = vmatprep.subr.msk.mxu0 %vm147_vm0, %v132_v16  ;;  %8272 = vmatprep.mubr.msk.f32.mxu0 %vm134_vm1, %v104_v12  ;;  %v9972_v43 = vld [vmem:[#allocation7 + $0x18] sm:$0xff] }
  0x17   :  { %8276 = vmatpush3.msk.msra.mxu0 %vm147_vm0, %v132_v16  ;;  %v114_v20 = vsel %vm110_vm3, %v109_v15, %v106_v9  ;;  %v29_v21 = vadd.s32 24, %v9896_v1  ;;  %v112_v25 = vsel %vm110_vm3, %v107_v10, %v108_v14  ;;  %v121_v27 = vrot.slane %v104_v12, 1  ;;  %8292 = vmatpush3.msra.mxu1 %v543_v42  ;;  %v7680_v44 = vld [vmem:[#allocation7 + $0x1e0] ss:$0 sm:$0xff] }
  0x18   :  { %vm9900_vm2 = vcmp.ne.s32.totalorder %v34_v2, 0  ;;  %v48_v8 = vand.u32 15, %v28_v3  ;;  %v41_v22 = vand.u32 15, %v27_v11  ;;  %8283 = vmatprep.subr.msk.mxu0 %vm147_vm0, %v336_v19  ;;  %v113_v28 = vsel %vm110_vm3, %v106_v9, %v107_v10  ;;  %8299 = vmatprep.subr.mxu1 %v9972_v43 }
  0x19   :  { %v9924_v18 = vsel %vm9900_vm2, 1.0, %v9866_v17  ;;  %8273 = vmatmul.mubr.msk.f32.gmra.mrb[2].mxu0 %vm134_vm1, %v105_v13  ;;  %v119_v30 = vrot.slane %v102_v6, 1  ;;  %vm123_vm6 = vcmp.lt.s32.totalorder %v9896_v1, 7  ;;  %v55_v31 = vand.u32 15, %v29_v21  ;;  %v1458_v1 = vld [vmem:[#allocation7 + $0x90] sm:$0xff] }
  0x1a   :  { %vm80_vm4 = vcmp.ne.s32.totalorder %v48_v8, 0  ;;  %v115_v23 = vmul.f32 %v9924_v18, %v114_v20  ;;  %vm91_vm5 = vcmp.ne.s32.totalorder %v41_v22, 15  ;;  %v125_v33 = vsel %vm123_vm6, %v120_v26, %v121_v27 }
  0x1b   :  { %v9935_v24 = vsel %vm80_vm4, 1.0, %v9866_v17  ;;  %v9948_v32 = vsel %vm91_vm5, 1.0, %v9866_v17  ;;  %v122_v34 = vrot.slane %v105_v13, 1  ;;  %v111_v35 = vsel %vm110_vm3, %v108_v14, %v109_v15 }
  0x1c   :  { %8277 = vmatprep.mubr.msk.f32.mxu0 %vm134_vm1, %v115_v23  ;;  %v117_v29 = vmul.f32 %v9935_v24, %v112_v25  ;;  %v126_v36 = vsel %vm123_vm6, %v119_v30, %v120_v26  ;;  %vm93_vm7 = vcmp.ne.s32.totalorder %v55_v31, 15  ;;  %v129_v37 = vmul.f32 %v9948_v32, %v125_v33 }
  0x1d   :  { %8278 = vmatmul.mubr.msk.f32.vlgmr.msra.gmra.mrb[0].mxu0 %vm134_vm1, %v113_v28  ;;  %v9962_v38 = vsel %vm93_vm7, 1.0, %v9866_v17  ;;  %v127_v39 = vsel %vm123_vm6, %v122_v34, %v119_v30  ;;  %v124_v40 = vsel %vm123_vm6, %v121_v27, %v122_v34  ;;  %v7681_v34 = vld [vmem:[#allocation7 + $0x1e8] ss:$0 sm:$0xff]  ;;  %vm9868_vm10 = vmmov 0  }
  0x1e   :  { %8280 = vmatprep.mubr.msk.f32.mxu0 %vm134_vm1, %v117_v29  ;;  %8284 = vmatpush3.msk.msra.mxu0 %vm147_vm0, %v336_v19  ;;  %v131_v41 = vmul.f32 %v9962_v38, %v127_v39  ;;  %vm2062_vm11 = vcmask 261120   ;;  %vm2701_vm12 = vcmask 254976   ;;  %vm7651_vm13 = vcmask 7168  }
  0x21   :  { %8281 = vmatmul.mubr.msk.f32.gmra.mrb[2].mxu0 %vm134_vm1, %v111_v35 }
  0x22   :  { %8285 = vmatprep.mubr.msk.f32.mxu0 %vm134_vm1, %v126_v36 }
  0x25   :  { %8286 = vmatmul.mubr.msk.f32.vlgmr.msra.gmra.mrb[0].mxu0 %vm134_vm1, %v129_v37 }
  0x26   :  { %8288 = vmatprep.mubr.msk.f32.mxu0 %vm134_vm1, %v124_v40  ;;  %v7682_v40 = vld [vmem:[#allocation7 + $0x1f0] ss:$0 sm:$0xff] }
  0x29   :  { %8289 = vmatmul.mubr.msk.f32.gmra.mrb[2].mxu0 %vm134_vm1, %v131_v41 }
  0xf8   :  { %v8287_v45 = vpop.f32.mrb[0].mxu0 }
  0xf9   :  { %v447_v46 = vadd.f32 %v8287_v45, %v7680_v44  ;;  %v418_v47 = vpop.f32.mrb[1].mxu0 }
  0xfa   :  { %v446_v48 = vadd.f32 %v7680_v44, %v418_v47 }
  0xfb   :  { %v452_v49 = vsel %vm450_vm8, %v447_v46, 0.0  ;;  %v467_v50 = vmul.f32 %v447_v46, %v447_v46 }
  0xfc   :  { %v451_v51 = vsel %vm450_vm8, %v446_v48, 0.0  ;;  %v466_v52 = vmul.f32 %v446_v48, %v446_v48  ;;  %v8290_v53 = vpop.f32.mrb[2].mxu0 }
  0xfd   :  { %v471_v54 = vsel %vm450_vm8, %v467_v50, 0.0  ;;  %v453_v55 = vadd.f32 %v452_v49, %v451_v51  ;;  %v449_v56 = vadd.f32 %v8290_v53, %v7680_v44  ;;  %v428_v57 = vpop.f32.mrb[3].mxu0 }
  0xfe   :  { %v470_v58 = vsel %vm450_vm8, %v466_v52, 0.0  ;;  %v448_v59 = vadd.f32 %v7680_v44, %v428_v57 }
  0xff   :  { %v472_v60 = vadd.f32 %v471_v54, %v470_v58  ;;  %v469_v61 = vmul.f32 %v449_v56, %v449_v56  ;;  %v456_v2 = vsel %vm450_vm8, %v449_v56, 0.0  ;;  %v738_v58 = vld [vmem:[#allocation7 + $0x28] sm:$0xff] }
 0x100   :  { %v454_v62 = vsel %vm450_vm8, %v448_v59, 0.0  ;;  %v468_v63 = vmul.f32 %v448_v59, %v448_v59 }
 0x101   :  { %v455_v0 = vadd.f32 %v454_v62, %v453_v55  ;;  %v475_v6 = vsel %vm450_vm8, %v469_v61, 0.0 }
 0x102   :  { %v473_v3 = vsel %vm450_vm8, %v468_v63, 0.0 }
 0x103   :  { %v457_v4 = vadd.f32 %v456_v2, %v455_v0  ;;  %v474_v5 = vadd.f32 %v473_v3, %v472_v60 }
 0x105   :  { %v458_v7 = vrot.slane %v457_v4, 4  ;;  %v476_v8 = vadd.f32 %v475_v6, %v474_v5 }
 0x107   :  { %v459_v9 = vadd.f32 %v458_v7, %v457_v4  ;;  %v477_v10 = vrot.slane %v476_v8, 4 }
 0x109   :  { %v460_v11 = vrot.slane %v459_v9, 2  ;;  %v478_v12 = vadd.f32 %v477_v10, %v476_v8 }
 0x10b   :  { %v461_v13 = vadd.f32 %v460_v11, %v459_v9  ;;  %v479_v14 = vrot.slane %v478_v12, 2  ;;  %v875_v11 = vld [vmem:[#allocation7 + $0x40] sm:$0xff] }
 0x10d   :  { %v462_v15 = vrot.slane %v461_v13, 1  ;;  %v480_v16 = vadd.f32 %v479_v14, %v478_v12  ;;  %v876_v12 = vld [vmem:[#allocation7 + $0x48] sm:$0xff] }
 0x10e   :  { %v9159_v14 = vpack.c.bf16 %v876_v12, %v875_v11 }
 0x10f   :  { %v463_v19 = vadd.f32 %v462_v15, %v461_v13  ;;  %v481_v20 = vrot.slane %v480_v16, 1  ;;  %v1186_v13 = vld [vmem:[#allocation7 + $0x70] sm:$0xff]  ;;  %v1187_v15 = vld [vmem:[#allocation7 + $0x78] sm:$0xff] }
 0x110   :  { %9160 = vmatprep.subr.bf16.mxu0 %v9159_v14 }
 0x111   :  { %v465_v21 = vmul.f32 0.03125, %v463_v19  ;;  %v482_v22 = vadd.f32 %v481_v20, %v480_v16  ;;  %v9171_v16 = vpack.c.bf16 %v1187_v15, %v1186_v13  ;;  %9162 = vmatpush3.bf16.msra.mxu0 %v9159_v14  ;;  %v873_v19 = vld [vmem:[#allocation7 + $0x30] sm:$0xff]  ;;  %v874_v20 = vld [vmem:[#allocation7 + $0x38] sm:$0xff] }
 0x113   :  { %v483_v23 = vmul.f32 0.03125, %v482_v22  ;;  %v486_v25 = vsub.f32 %v448_v59, %v465_v21  ;;  %v488_v26 = vmul.f32 %v465_v21, %v465_v21  ;;  %v484_v27 = vsub.f32 %v446_v48, %v465_v21 }
 0x114   :  { %v485_v28 = vsub.f32 %v447_v46, %v465_v21  ;;  %v487_v29 = vsub.f32 %v449_v56, %v465_v21  ;;  %v1184_v21 = vld [vmem:[#allocation7 + $0x60] sm:$0xff]  ;;  %v9163_v22 = vpack.c.bf16 %v874_v20, %v873_v19 }
 0x115   :  { %v489_v30 = vsub.f32 %v483_v23, %v488_v26  ;;  %v1185_v23 = vld [vmem:[#allocation7 + $0x68] sm:$0xff]  ;;  %v7695_v26 = vld [vmem:[#allocation7 + $0x1f8] ss:$0 sm:$0xff] }
 0x116   :  { %9164 = vmatprep.subr.bf16.mxu0 %v9163_v22 }
 0x117   :  { %v490_v31 = vadd.f32 1e-05, %v489_v30  ;;  %v1358_v30 = vld [vmem:[#allocation7 + $0x80] sm:$0xff] }
 0x119   :  { %9653 = vrsqrt.f32 %v490_v31  ;;  %v1359_v31 = vld [vmem:[#allocation7 + $0x88] sm:$0xff] }
 0x123   :  { %v9654_v33 = vpop.eup %9653 }
 0x124   :  { %v494_v35 = vmul.f32 %v9654_v33, %v486_v25  ;;  %v492_v36 = vmul.f32 %v9654_v33, %v484_v27  ;;  %v493_v37 = vmul.f32 %v9654_v33, %v485_v28  ;;  %v495_v39 = vmul.f32 %v9654_v33, %v487_v29  ;;  %v1072_v27 = vld [vmem:[#allocation7 + $0x50] sm:$0xff]  ;;  %v1073_v29 = vld [vmem:[#allocation7 + $0x58] sm:$0xff] }
 0x125   :  { %v9175_v25 = vpack.c.bf16 %v1185_v23, %v1184_v21 }
 0x126   :  { %v503_v41 = vmul.f32 %v7681_v34, %v494_v35  ;;  %v501_v42 = vmul.f32 %v7681_v34, %v492_v36  ;;  %v502_v44 = vmul.f32 %v7681_v34, %v493_v37  ;;  %v504_v45 = vmul.f32 %v7681_v34, %v495_v39 }
 0x127   :  { %v9167_v37 = vpack.c.bf16 %v1073_v29, %v1072_v27  ;;  %v9179_v39 = vpack.c.bf16 %v1359_v31, %v1358_v30 }
 0x128   :  { %v510_v47 = vadd.f32 %v7682_v40, %v501_v42  ;;  %v511_v49 = vadd.f32 %v7682_v40, %v502_v44  ;;  %v512_v50 = vadd.f32 %v7682_v40, %v503_v41  ;;  %v513_v48 = vadd.f32 %v7682_v40, %v504_v45 }
 0x12a   :  { %v514_v46 = vmax.f32 %v510_v47, 0.0  ;;  %v515_v51 = vmax.f32 %v511_v49, 0.0  ;;  %v516_v52 = vmax.f32 %v512_v50, 0.0  ;;  %v517_v53 = vmax.f32 %v513_v48, 0.0 }
 0x12c   :  { %v518_v54 = vrot.slane %v514_v46, 7  ;;  %8293 = vmatprep.mubr.msk.f32.mxu1 %vm450_vm8, %v514_v46  ;;  %v519_v55 = vrot.slane %v515_v51, 7  ;;  %v520_v56 = vrot.slane %v516_v52, 7  ;;  %v532_v57 = vrot.slane %v516_v52, 1 }
 0x12d   :  { %8294 = vmatmul.mubr.msk.f32.vlgmr.msra.gmra.mrb[0].mxu1 %vm450_vm8, %v515_v51  ;;  %v521_v59 = vrot.slane %v517_v53, 7  ;;  %v530_v60 = vrot.slane %v514_v46, 1  ;;  %v531_v61 = vrot.slane %v515_v51, 1  ;;  %v533_v62 = vrot.slane %v517_v53, 1 }
 0x12e   :  { %8296 = vmatprep.mubr.msk.f32.mxu1 %vm450_vm8, %v516_v52  ;;  %8300 = vmatpush3.msra.mxu1 %v9972_v43  ;;  %v524_v63 = vsel %vm110_vm3, %v518_v54, %v519_v55  ;;  %v523_v0 = vsel %vm110_vm3, %v519_v55, %v520_v56 }
 0x12f   :  { %v525_v2 = vsel %vm110_vm3, %v521_v59, %v518_v54  ;;  %v522_v3 = vsel %vm110_vm3, %v520_v56, %v521_v59  ;;  %8307 = vmatprep.subr.mxu1 %v738_v58  ;;  %v535_v4 = vsel %vm123_vm6, %v531_v61, %v532_v57  ;;  %v536_v43 = vsel %vm123_vm6, %v530_v60, %v531_v61  ;;  %v1460_v56 = vld [vmem:[#allocation7 + $0xa0] sm:$0xff] }
 0x130   :  { %v526_v5 = vmul.f32 %v9924_v18, %v525_v2  ;;  %v534_v6 = vsel %vm123_vm6, %v532_v57, %v533_v62  ;;  %v537_v7 = vsel %vm123_vm6, %v533_v62, %v530_v60  ;;  %v528_v8 = vmul.f32 %v9935_v24, %v523_v0  ;;  %v1461_v57 = vld [vmem:[#allocation7 + $0xa8] sm:$0xff] }
 0x131   :  { %8297 = vmatmul.mubr.msk.f32.gmra.mrb[2].mxu1 %vm450_vm8, %v517_v53  ;;  %v539_v9 = vmul.f32 %v9948_v32, %v535_v4  ;;  %v541_v10 = vmul.f32 %v9962_v38, %v537_v7  ;;  %v9183_v0 = vpack.c.bf16 %v1461_v57, %v1460_v56  ;;  %v1632_v4 = vld [vmem:[#allocation7 + $0xb0] sm:$0xff] }
 0x132   :  { %8301 = vmatprep.mubr.msk.f32.mxu1 %vm450_vm8, %v526_v5  ;;  %v1633_v5 = vld [vmem:[#allocation7 + $0xb8] sm:$0xff] }
 0x135   :  { %8302 = vmatmul.mubr.msk.f32.vlgmr.msra.gmra.mrb[0].mxu1 %vm450_vm8, %v524_v63 }
 0x136   :  { %8304 = vmatprep.mubr.msk.f32.mxu1 %vm450_vm8, %v528_v8  ;;  %8308 = vmatpush3.msra.mxu1 %v738_v58 }
 0x137   :  { %9172 = vmatprep.subr.bf16.mxu1 %v9171_v16 }
 0x139   :  { %8305 = vmatmul.mubr.msk.f32.gmra.mrb[2].mxu1 %vm450_vm8, %v522_v3 }
 0x13a   :  { %8309 = vmatprep.mubr.msk.f32.mxu1 %vm450_vm8, %v536_v43  ;;  %v7721_v43 = vld [vmem:[#allocation7 + $0x208] ss:$0 sm:$0xff] }
 0x13d   :  { %8310 = vmatmul.mubr.msk.f32.vlgmr.msra.gmra.mrb[0].mxu1 %vm450_vm8, %v539_v9 }
 0x13e   :  { %8312 = vmatprep.mubr.msk.f32.mxu1 %vm450_vm8, %v534_v6  ;;  %9174 = vmatpush3.bf16.msra.mxu1 %v9171_v16 }
 0x13f   :  { %9176 = vmatprep.subr.bf16.mxu1 %v9175_v25 }
 0x141   :  { %8313 = vmatmul.mubr.msk.f32.gmra.mrb[2].mxu1 %vm450_vm8, %v541_v10 }
 0x210   :  { %v8311_v28 = vpop.f32.mrb[0].mxu1 }
 0x211   :  { %v10016_v33 = vadd.f32 %v8311_v28, %v7695_v26  ;;  %v817_v34 = vpop.f32.mrb[1].mxu1 }
 0x212   :  { %v10018_v35 = vadd.f32 %v7695_v26, %v817_v34 }
 0x213   :  { %v850_v36 = vrot.slane %v10016_v33, 7  ;;  %v862_v40 = vrot.slane %v10016_v33, 1 }
 0x214   :  { %v8314_v41 = vpop.f32.mrb[2].mxu1  ;;  %8319 = vmatprep.mubr.msk.f32.mxu0 %vm877_vm9, %v10018_v35  ;;  %8349 = vmatprep.mubr.msk.f32.mxu1 %vm877_vm9, %v10018_v35  ;;  %v849_v42 = vrot.slane %v10018_v35, 7  ;;  %v861_v44 = vrot.slane %v10018_v35, 1 }
 0x215   :  { %v10028_v45 = vadd.f32 %v8314_v41, %v7695_v26  ;;  %v827_v47 = vpop.f32.mrb[3].mxu1  ;;  %8320 = vmatmul.mubr.msk.f32.vlgmr.msra.gmra.mrb[4].mxu0 %vm877_vm9, %v10016_v33  ;;  %8350 = vmatmul.mubr.msk.f32.vlgmr.msra.gmra.mrb[4].mxu1 %vm877_vm9, %v10016_v33 }
 0x216   :  { %v847_v49 = vadd.f32 %v7695_v26, %v827_v47  ;;  %9166 = vmatpush3.bf16.msra.mxu0 %v9163_v22  ;;  %9178 = vmatpush3.bf16.msra.mxu1 %v9175_v25  ;;  %v855_v50 = vsel %vm110_vm3, %v849_v42, %v850_v36  ;;  %v867_v48 = vsel %vm123_vm6, %v861_v44, %v862_v40 }
 0x217   :  { %v852_v46 = vrot.slane %v10028_v45, 7  ;;  %9168 = vmatprep.subr.bf16.mxu0 %v9167_v37  ;;  %9180 = vmatprep.subr.bf16.mxu1 %v9179_v39  ;;  %v864_v51 = vrot.slane %v10028_v45, 1 }
 0x218   :  { %v863_v52 = vrot.slane %v847_v49, 1  ;;  %8322 = vmatprep.mubr.msk.f32.mxu0 %vm877_vm9, %v847_v49  ;;  %8352 = vmatprep.mubr.msk.f32.mxu1 %vm877_vm9, %v847_v49  ;;  %v851_v53 = vrot.slane %v847_v49, 7 }
 0x219   :  { %8323 = vmatmul.mubr.msk.f32.gmra.mrb[6].mxu0 %vm877_vm9, %v10028_v45  ;;  %8353 = vmatmul.mubr.msk.f32.gmra.mrb[6].mxu1 %vm877_vm9, %v10028_v45  ;;  %v856_v54 = vsel %vm110_vm3, %v852_v46, %v849_v42  ;;  %v868_v55 = vsel %vm123_vm6, %v864_v51, %v861_v44 }
 0x21a   :  { %v857_v58 = vmul.f32 %v9924_v18, %v856_v54  ;;  %v854_v59 = vsel %vm110_vm3, %v850_v36, %v851_v53  ;;  %v853_v60 = vsel %vm110_vm3, %v851_v53, %v852_v46  ;;  %v866_v61 = vsel %vm123_vm6, %v862_v40, %v863_v52  ;;  %v1459_v18 = vld [vmem:[#allocation7 + $0x98] sm:$0xff] }
 0x21b   :  { %v859_v62 = vmul.f32 %v9935_v24, %v854_v59  ;;  %v865_v63 = vsel %vm123_vm6, %v863_v52, %v864_v51  ;;  %v870_v24 = vmul.f32 %v9948_v32, %v866_v61  ;;  %v9187_v2 = vpack.c.bf16 %v1459_v18, %v1458_v1  ;;  %v7734_v18 = vld [vmem:[#allocation7 + $0x210] ss:$0 sm:$0xff] }
 0x21c   :  { %8329 = vmatprep.mubr.msk.f32.mxu0 %vm877_vm9, %v857_v58  ;;  %8359 = vmatprep.mubr.msk.f32.mxu1 %vm877_vm9, %v857_v58  ;;  %v872_v3 = vmul.f32 %v9962_v38, %v868_v55  ;;  %v9191_v32 = vpack.c.bf16 %v1633_v5, %v1632_v4  ;;  %v7708_v38 = vld [vmem:[#allocation7 + $0x200] ss:$0 sm:$0xff] }
 0x21d   :  { %8330 = vmatmul.mubr.msk.f32.vlgmr.msra.gmra.mrb[4].mxu0 %vm877_vm9, %v855_v50  ;;  %8360 = vmatmul.mubr.msk.f32.vlgmr.msra.gmra.mrb[4].mxu1 %vm877_vm9, %v855_v50 }
 0x21e   :  { %8332 = vmatprep.mubr.msk.f32.mxu0 %vm877_vm9, %v859_v62  ;;  %8362 = vmatprep.mubr.msk.f32.mxu1 %vm877_vm9, %v859_v62 }
 0x21f   :  { %9170 = vmatpush3.bf16.msra.mxu0 %v9167_v37  ;;  %9182 = vmatpush3.bf16.msra.mxu1 %v9179_v39 }
 0x220   :  { %9184 = vmatprep.subr.bf16.mxu0 %v9183_v0 }
 0x221   :  { %8333 = vmatmul.mubr.msk.f32.gmra.mrb[6].mxu0 %vm877_vm9, %v853_v60  ;;  %8363 = vmatmul.mubr.msk.f32.gmra.mrb[6].mxu1 %vm877_vm9, %v853_v60 }
 0x222   :  { %8339 = vmatprep.mubr.msk.f32.mxu0 %vm877_vm9, %v867_v48  ;;  %8369 = vmatprep.mubr.msk.f32.mxu1 %vm877_vm9, %v867_v48 }
 0x225   :  { %8340 = vmatmul.mubr.msk.f32.vlgmr.msra.gmra.mrb[4].mxu0 %vm877_vm9, %v870_v24  ;;  %8370 = vmatmul.mubr.msk.f32.vlgmr.msra.gmra.mrb[4].mxu1 %vm877_vm9, %v870_v24 }
 0x226   :  { %8342 = vmatprep.mubr.msk.f32.mxu0 %vm877_vm9, %v865_v63  ;;  %8372 = vmatprep.mubr.msk.f32.mxu1 %vm877_vm9, %v865_v63 }
 0x227   :  { %9186 = vmatpush3.bf16.msra.mxu0 %v9183_v0 }
 0x228   :  { %9188 = vmatprep.subr.bf16.mxu0 %v9187_v2 }
 0x229   :  { %8343 = vmatmul.mubr.msk.f32.gmra.mrb[6].mxu0 %vm877_vm9, %v872_v3  ;;  %8373 = vmatmul.mubr.msk.f32.gmra.mrb[6].mxu1 %vm877_vm9, %v872_v3 }
 0x22a   :  { %8379 = vmatprep.mubr.msk.f32.mxu0 %vm877_vm9, %v10018_v35 }
 0x22d   :  { %8380 = vmatmul.mubr.msk.f32.vlgmr.msra.gmra.mrb[8].mxu0 %vm877_vm9, %v10016_v33 }
 0x22e   :  { %8382 = vmatprep.mubr.msk.f32.mxu0 %vm877_vm9, %v847_v49  ;;  %9190 = vmatpush3.bf16.msra.mxu0 %v9187_v2 }
 0x22f   :  { %9192 = vmatprep.subr.bf16.mxu0 %v9191_v32 }
 0x231   :  { %8383 = vmatmul.mubr.msk.f32.gmra.mrb[10].mxu0 %vm877_vm9, %v10028_v45 }
 0x232   :  { %8389 = vmatprep.mubr.msk.f32.mxu0 %vm877_vm9, %v857_v58 }
 0x235   :  { %8390 = vmatmul.mubr.msk.f32.vlgmr.msra.gmra.mrb[8].mxu0 %vm877_vm9, %v855_v50 }
 0x236   :  { %8392 = vmatprep.mubr.msk.f32.mxu0 %vm877_vm9, %v859_v62  ;;  %9194 = vmatpush3.bf16.msra.mxu0 %v9191_v32 }
 0x239   :  { %8393 = vmatmul.mubr.msk.f32.gmra.mrb[10].mxu0 %vm877_vm9, %v853_v60 }
 0x23a   :  { %8399 = vmatprep.mubr.msk.f32.mxu0 %vm877_vm9, %v867_v48 }
 0x23d   :  { %8400 = vmatmul.mubr.msk.f32.vlgmr.msra.gmra.mrb[8].mxu0 %vm877_vm9, %v870_v24 }
 0x23e   :  { %8402 = vmatprep.mubr.msk.f32.mxu0 %vm877_vm9, %v865_v63 }
 0x241   :  { %8403 = vmatmul.mubr.msk.f32.gmra.mrb[10].mxu0 %vm877_vm9, %v872_v3 }
 0x2f8   :  { %v8341_v6 = vpop.f32.mrb[4].mxu0  ;;  %v8371_v7 = vpop.f32.mrb[4].mxu1 }
 0x2f9   :  { %v1181_v8 = vadd.f32 %v8341_v6, %v7708_v38  ;;  %v1152_v9 = vpop.f32.mrb[5].mxu0  ;;  %v1426_v10 = vpop.f32.mrb[5].mxu1  ;;  %v1455_v22 = vadd.f32 %v8371_v7, %v7721_v43  ;;  %v1942_v6 = vld [vmem:[#allocation7 + $0xc0] sm:$0xff]  ;;  %v1943_v7 = vld [vmem:[#allocation7 + $0xc8] sm:$0xff] }
 0x2fa   :  { %v1180_v11 = vadd.f32 %v7708_v38, %v1152_v9  ;;  %v1454_v12 = vadd.f32 %v7721_v43, %v1426_v10 }
 0x2fc   :  { %v9195_v13 = vpack.c.bf16 %v1181_v8, %v1180_v11  ;;  %v8344_v14 = vpop.f32.mrb[6].mxu0  ;;  %v8374_v15 = vpop.f32.mrb[6].mxu1  ;;  %8409 = vmatprep.mubr.msk.f32.mxu1 %vm877_vm9, %v1454_v12  ;;  %v2341_v8 = vld [vmem:[#allocation7 + $0x130] sm:$0xff]  ;;  %v9203_v11 = vpack.c.bf16 %v1943_v7, %v1942_v6  ;;  %v2342_v12 = vld [vmem:[#allocation7 + $0x138] sm:$0xff] }
 0x2fd   :  { %v1183_v16 = vadd.f32 %v8344_v14, %v7708_v38  ;;  %v1162_v19 = vpop.f32.mrb[7].mxu0  ;;  %v1436_v20 = vpop.f32.mrb[7].mxu1  ;;  %v1457_v26 = vadd.f32 %v8374_v15, %v7721_v43  ;;  %v9219_v14 = vpack.c.bf16 %v2342_v12, %v2341_v8 }
 0x2fe   :  { %v1182_v21 = vadd.f32 %v7708_v38, %v1162_v19  ;;  %9196 = vmatprep.subr.bf16.mxu1 %v9195_v13  ;;  %v1456_v25 = vadd.f32 %v7721_v43, %v1436_v20 }
 0x2ff   :  { %9198 = vmatpush3.bf16.msra.mxu1 %v9195_v13  ;;  %9220 = vmatprep.subr.bf16.mxu0 %v9219_v14 }
 0x300   :  { %v9199_v23 = vpack.c.bf16 %v1183_v16, %v1182_v21  ;;  %v2502_v21 = vld [vmem:[#allocation7 + $0x168] sm:$0xff]  ;;  %9222 = vmatpush3.bf16.msra.mxu0 %v9219_v14 }
 0x302   :  { %8410 = vmatmul.mubr.msk.f32.vlgmr.msra.gmra.mrb[8].mxu1 %vm877_vm9, %v1455_v22  ;;  %9200 = vmatprep.subr.bf16.mxu1 %v9199_v23  ;;  %v2503_v22 = vld [vmem:[#allocation7 + $0x170] sm:$0xff] }
 0x303   :  { %9202 = vmatpush3.bf16.msra.mxu1 %v9199_v23  ;;  %8416 = vmatprep.mubr.msk.f32.mxu1 %vm877_vm9, %v1456_v25  ;;  %v9227_v25 = vpack.c.bf16 %v2503_v22, %v2502_v21 }
 0x304   :  { %9204 = vmatprep.subr.bf16.mxu1 %v9203_v11 }
 0x305   :  { %9228 = vmatprep.subr.bf16.mxu0 %v9227_v25 }
 0x306   :  { %8417 = vmatmul.mubr.msk.f32.vlgmr.msra.gmra.mrb[10].mxu1 %vm877_vm9, %v1457_v26 }
 0x307   :  { %9206 = vmatpush3.bf16.msra.mxu1 %v9203_v11 }
 0x308   :  { %9208 = vmatprep.subr.bf16.mxu1 %v9203_v11 }
 0x310   :  { %v8401_v27 = vpop.f32.mrb[8].mxu0 }
 0x311   :  { %v1700_v28 = vpop.f32.mrb[9].mxu0  ;;  %v1729_v38 = vadd.f32 %v8401_v27, %v7734_v18  ;;  %v2180_v27 = vld [vmem:[#allocation7 + $0xf8] sm:$0xff] }
 0x312   :  { %v1728_v2 = vadd.f32 %v7734_v18, %v1700_v28  ;;  %v2181_v28 = vld [vmem:[#allocation7 + $0x100] sm:$0xff] }
 0x314   :  { %v10097_v29 = vpop.f32.mrb[10].mxu0 }
 0x315   :  { %v1710_v30 = vpop.f32.mrb[11].mxu0  ;;  %v1731_v19 = vadd.f32 %v10097_v29, %v7734_v18 }
 0x316   :  { %v1730_v9 = vadd.f32 %v7734_v18, %v1710_v30  ;;  %v9211_v30 = vpack.c.bf16 %v2181_v28, %v2180_v27 }
 0x3d5   :  { %v8411_v31 = vpop.f32.mrb[8].mxu1 }
 0x3d6   :  { %v1804_v33 = vpop.f32.mrb[9].mxu1  ;;  %v1816_v37 = vsel %vm877_vm9, %v8411_v31, -inf }
 0x3d7   :  { %v1813_v34 = vsel %vm877_vm9, %v1804_v33, -inf }
 0x3d8   :  { %1814 = vmax.xlane.f32.xlu0 %v1813_v34  ;;  %v2663_v34 = vld [vmem:[#allocation7 + $0xd0] sm:$0xff] }
 0x3d9   :  { %v8418_v35 = vpop.f32.mrb[10].mxu1 }
 0x3da   :  { %v1909_v36 = vpop.f32.mrb[11].mxu1  ;;  %v1921_v40 = vsel %vm877_vm9, %v8418_v35, -inf }
 0x3db   :  { %v1918_v39 = vsel %vm877_vm9, %v1909_v36, -inf }
 0x3dc   :  { %1817 = vmax.xlane.f32.xlu0 %v1816_v37  ;;  %1919 = vmax.xlane.f32.xlu1 %v1918_v39  ;;  %v9867_v37 = vmov 0.0|0.0  }
 0x3e0   :  { %1922 = vmax.xlane.f32.xlu1 %v1921_v40  ;;  %v2668_v40 = vld [vmem:[#allocation7 + $0x110] sm:$0xff] }
 0x465   :  { %v1815_v41 = vpop.xlane.xlu0 %1814 }
 0x466   :  { %v1819_v42 = vsub.f32 %v1804_v33, %v1815_v41  ;;  %v2665_v41 = vld [vmem:[#allocation7 + $0xe0] sm:$0xff] }
 0x468   :  { %v1821_v44 = vmul.f32 1.442695, %v1819_v42  ;;  %v2666_v42 = vld [vmem:[#allocation7 + $0xe8] sm:$0xff] }
 0x469   :  { %v1818_v45 = vpop.xlane.xlu0 %1817  ;;  %v1920_v47 = vpop.xlane.xlu1 %1919 }
 0x46a   :  { %9655 = vpow2.f32 %v1821_v44  ;;  %v1820_v49 = vsub.f32 %v8411_v31, %v1818_v45  ;;  %v1924_v50 = vsub.f32 %v1909_v36, %v1920_v47  ;;  %v2667_v36 = vld [vmem:[#allocation7 + $0x108] sm:$0xff]  ;;  %v2669_v45 = vld [vmem:[#allocation7 + $0x118] sm:$0xff]  ;;  %v2670_v47 = vld [vmem:[#allocation7 + $0x120] sm:$0xff] }
 0x46b   :  { %v10128_v44 = vpack.c.bf16 %v2668_v40, %v2667_v36 }
 0x46c   :  { %v1823_v48 = vmul.f32 1.442695, %v1820_v49  ;;  %v1926_v46 = vmul.f32 1.442695, %v1924_v50  ;;  %v10135_v49 = vpack.c.bf16 %v2666_v42, %v2665_v41  ;;  %v10139_v50 = vpack.c.bf16 %v2670_v47, %v2669_v45  ;;  %v2671_v42 = vld [vmem:[#allocation7 + $0x140] sm:$0xff]  ;;  %v2672_v45 = vld [vmem:[#allocation7 + $0x148] sm:$0xff] }
 0x46d   :  { %v1923_v51 = vpop.xlane.xlu1 %1922  ;;  %v2675_v47 = vld [vmem:[#allocation7 + $0x178] sm:$0xff] }
 0x46e   :  { %9657 = vpow2.f32 %v1823_v48  ;;  %v1925_v52 = vsub.f32 %v8418_v35, %v1923_v51  ;;  %v2664_v35 = vld [vmem:[#allocation7 + $0xd8] sm:$0xff]  ;;  %v7739_v48 = vld [vmem:[#allocation7 + $0xf0] ss:$0 sm:$0xff] }
 0x46f   :  { %9659 = vpow2.f32 %v1926_v46  ;;  %v10126_v39 = vpack.c.bf16 %v2664_v35, %v2663_v34  ;;  %v7749_v46 = vld [vmem:[#allocation7 + $0x160] ss:$0 sm:$0xff] }
 0x470   :  { %v1928_v53 = vmul.f32 1.442695, %v1925_v52 }
 0x472   :  { %9661 = vpow2.f32 %v1928_v53 }
 0x474   :  { %v9656_v54 = vpop.eup %9655 }
 0x475   :  { %v1825_v55 = vsel %vm877_vm9, %v9656_v54, 0.0 }
 0x476   :  { %1826 = vadd.xlane.f32.xlu0 %v1825_v55 }
 0x478   :  { %v9658_v56 = vpop.eup %9657 }
 0x479   :  { %v9660_v57 = vpop.eup %9659  ;;  %v1828_v58 = vsel %vm877_vm9, %v9658_v56, 0.0 }
 0x47a   :  { %1829 = vadd.xlane.f32.xlu1 %v1828_v58  ;;  %v1930_v59 = vsel %vm877_vm9, %v9660_v57, 0.0 }
 0x47b   :  { %1931 = vadd.xlane.f32.xlu0 %v1930_v59  ;;  %v7754_v59 = vld [vmem:[#allocation7 + $0x198] ss:$0 sm:$0xff] }
 0x47c   :  { %v9662_v60 = vpop.eup %9661 }
 0x47d   :  { %v1933_v61 = vsel %vm877_vm9, %v9662_v60, 0.0 }
 0x47e   :  { %1934 = vadd.xlane.f32.xlu1 %v1933_v61 }
 0x503   :  { %v1827_v62 = vpop.xlane.xlu0 %1826 }
 0x504   :  { %9663 = vrcp.f32 %v1827_v62 }
 0x507   :  { %v1830_v63 = vpop.xlane.xlu1 %1829 }
 0x508   :  { %v1932_v0 = vpop.xlane.xlu0 %1931  ;;  %9665 = vrcp.f32 %v1830_v63 }
 0x509   :  { %9667 = vrcp.f32 %v1932_v0 }
 0x50b   :  { %v1935_v1 = vpop.xlane.xlu1 %1934 }
 0x50c   :  { %9669 = vrcp.f32 %v1935_v1 }
 0x50e   :  { %v9664_v24 = vpop.eup %9663 }
 0x50f   :  { %v1833_v3 = vmul.f32 %v9664_v24, %v9656_v54 }
 0x511   :  { %v1835_v4 = vmul.f32 %v1833_v3, %v1728_v2  ;;  %v7744_v2 = vld [vmem:[#allocation7 + $0x128] ss:$0 sm:$0xff] }
 0x512   :  { %v9666_v5 = vpop.eup %9665 }
 0x513   :  { %v9668_v32 = vpop.eup %9667  ;;  %1949 = vxpose.xlu0.b32.start [1/2] (short) (narrow) %v1835_v4, 16  ;;  %v1834_v43 = vmul.f32 %v9666_v5, %v9658_v56 }
 0x514   :  { %v1938_v10 = vmul.f32 %v9668_v32, %v9660_v57 }
 0x515   :  { %v1836_v13 = vmul.f32 %v1834_v43, %v1729_v38 }
 0x516   :  { %v9670_v15 = vpop.eup %9669  ;;  %v1940_v16 = vmul.f32 %v1938_v10, %v1730_v9 }
 0x517   :  { %1950 = vxpose.xlu0.b32.end [2/2] (short) (narrow) %v1836_v13, 16  ;;  %v1939_v20 = vmul.f32 %v9670_v15, %v9662_v60 }
 0x518   :  { %2065 = vxpose.xlu1.b32.start [1/2] (short) (narrow) %v1940_v16, 16 }
 0x519   :  { %v1941_v23 = vmul.f32 %v1939_v20, %v1731_v19 }
 0x51c   :  { %2066 = vxpose.xlu1.b32.end [2/2] (short) (narrow) %v1941_v23, 16 }
 0x593   :  { %v1965_v26 = vpop.trf.xlu0 }
 0x594   :  { %8423 = vmatprep.mubr.msk.f32.mxu1 %vm877_vm9, %v1965_v26  ;;  %8451 = vmatprep.mubr.msk.f32.mxu0 %vm877_vm9, %v1965_v26 }
 0x597   :  { %v1966_v29 = vpop.trf.xlu0 }
 0x598   :  { %v2081_v31 = vpop.trf.xlu1  ;;  %8424 = vmatmul.mubr.msk.f32.vlgmr.msra.gmra.mrb[12].mxu1 %vm877_vm9, %v1966_v29  ;;  %8452 = vmatmul.mubr.msk.f32.vlgmr.msra.gmra.mrb[12].mxu0 %vm877_vm9, %v1966_v29 }
 0x599   :  { %9210 = vmatpush3.bf16.msra.mxu1 %v9203_v11  ;;  %9230 = vmatpush3.bf16.msra.mxu0 %v9227_v25 }
 0x59a   :  { %8465 = vmatprep.mubr.msk.f32.mxu0 %vm877_vm9, %v1965_v26  ;;  %8430 = vmatprep.mubr.msk.f32.mxu1 %vm877_vm9, %v2081_v31 }
 0x59b   :  { %9212 = vmatprep.subr.bf16.mxu1 %v9211_v30  ;;  %9235 = vmatprep.subr.bf16.mxu0 %v9867_v37 }
 0x59c   :  { %v2082_v33 = vpop.trf.xlu1  ;;  %8466 = vmatmul.mubr.msk.f32.vlgmr.msra.gmra.mrb[14].mxu0 %vm877_vm9, %v1966_v29 }
 0x59d   :  { %8431 = vmatmul.mubr.msk.f32.vlgmr.msra.gmra.mrb[14].mxu1 %vm877_vm9, %v2082_v33  ;;  %8483 = vmatprep.mubr.msk.f32.mxu0 %vm9868_vm10, %v9866_v17 }
 0x59e   :  { %9214 = vmatpush3.bf16.msra.mxu1 %v9211_v30  ;;  %8437 = vmatprep.mubr.msk.f32.mxu1 %vm877_vm9, %v1965_v26 }
 0x59f   :  { %9216 = vmatprep.subr.bf16.mxu1 %v9211_v30  ;;  %9237 = vmatpush3.bf16.msra.mxu0 %v10126_v39 }
 0x5a0   :  { %9238 = vmatprep.subr.bf16.mxu0 %v9867_v37 }
 0x5a1   :  { %8438 = vmatmul.mubr.msk.f32.vlgmr.msra.gmra.mrb[16].mxu1 %vm877_vm9, %v1966_v29 }
 0x5a2   :  { %9218 = vmatpush3.bf16.msra.mxu1 %v9211_v30  ;;  %8444 = vmatprep.mubr.msk.f32.mxu1 %vm877_vm9, %v2081_v31 }
 0x5a3   :  { %9224 = vmatprep.subr.bf16.mxu1 %v9219_v14  ;;  %9240 = vmatpush3.bf16.msra.mxu0 %v10135_v49 }
 0x5a4   :  { %9247 = vmatprep.subr.bf16.mxu0 %v9867_v37 }
 0x5a5   :  { %8445 = vmatmul.mubr.msk.f32.vlgmr.msra.gmra.mrb[18].mxu1 %vm877_vm9, %v2082_v33 }
 0x5a6   :  { %9226 = vmatpush3.bf16.msra.mxu1 %v9219_v14  ;;  %8458 = vmatprep.mubr.msk.f32.mxu1 %vm877_vm9, %v2081_v31 }
 0x5a7   :  { %9232 = vmatprep.subr.bf16.mxu1 %v9227_v25 }
 0x5a9   :  { %8459 = vmatmul.mubr.msk.f32.vlgmr.msra.gmra.mrb[20].mxu1 %vm877_vm9, %v2082_v33 }
 0x5aa   :  { %9234 = vmatpush3.bf16.msra.mxu1 %v9227_v25  ;;  %8472 = vmatprep.mubr.msk.f32.mxu1 %vm877_vm9, %v2081_v31 }
 0x5ab   :  { %9241 = vmatprep.subr.bf16.mxu1 %v9867_v37 }
 0x5ad   :  { %8473 = vmatmul.mubr.msk.f32.vlgmr.msra.gmra.mrb[22].mxu1 %vm877_vm9, %v2082_v33 }
 0x5ae   :  { %8494 = vmatprep.mubr.msk.f32.mxu1 %vm9868_vm10, %v9866_v17  ;;  %9243 = vmatpush3.bf16.msra.mxu1 %v10128_v44 }
 0x5af   :  { %9244 = vmatprep.subr.bf16.mxu1 %v9867_v37 }
 0x5b2   :  { %9246 = vmatpush3.bf16.msra.mxu1 %v10139_v50 }
 0x5b3   :  { %9253 = vmatprep.subr.bf16.mxu1 %v9867_v37 }
 0x66b   :  { %v8425_v51 = vpop.f32.mrb[12].mxu1  ;;  %v8453_v52 = vpop.f32.mrb[12].mxu0 }
 0x66c   :  { %v2059_v53 = vadd.f32 %v8425_v51, %v7739_v48  ;;  %v2420_v54 = vadd.f32 %v8453_v52, %v7749_v46  ;;  %v2053_v55 = vpop.f32.mrb[13].mxu1  ;;  %v2414_v56 = vpop.f32.mrb[13].mxu0  ;;  %v10165_v52 = vpack.c.bf16 %v2672_v45, %v2671_v42 }
 0x66d   :  { %v2054_v57 = vadd.f32 %v7739_v48, %v2053_v55  ;;  %v2415_v58 = vadd.f32 %v7749_v46, %v2414_v56  ;;  %v2674_v56 = vld [vmem:[#allocation7 + $0x158] sm:$0xff] }
 0x66e   :  { %2064 = vst.msk [vmem:[#allocation2 + $0x8] sm:$0xff] %vm2062_vm11, %v2059_v53  ;;  %2424 = vst.msk [vmem:[#allocation4 + $0x8] sm:$0xff] %vm2062_vm11, %v2420_v54  ;;  %v2673_v54 = vld [vmem:[#allocation7 + $0x150] sm:$0xff] }
 0x66f   :  { %2063 = vst.msk [vmem:[#allocation2] sm:$0xff] %vm2062_vm11, %v2054_v57  ;;  %2423 = vst.msk [vmem:[#allocation4] sm:$0xff] %vm2062_vm11, %v2415_v58  ;;  %v8467_v60 = vpop.f32.mrb[14].mxu0  ;;  %v2677_v57 = vld [vmem:[#allocation7 + $0x188] sm:$0xff]  ;;  %v2678_v58 = vld [vmem:[#allocation7 + $0x190] sm:$0xff] }
 0x670   :  { %v8432_v61 = vpop.f32.mrb[14].mxu1  ;;  %v2581_v62 = vadd.f32 %v8467_v60, %v7754_v59  ;;  %v2575_v63 = vpop.f32.mrb[15].mxu0  ;;  %v10176_v60 = vpack.c.bf16 %v2678_v58, %v2677_v57 }
 0x671   :  { %v2175_v0 = vadd.f32 %v8432_v61, %v7739_v48  ;;  %v2169_v1 = vpop.f32.mrb[15].mxu1  ;;  %v2576_v18 = vadd.f32 %v7754_v59, %v2575_v63 }
 0x672   :  { %2585 = vst.msk [vmem:[#allocation5 + $0x8] sm:$0xff] %vm2062_vm11, %v2581_v62  ;;  %v2170_v24 = vadd.f32 %v7739_v48, %v2169_v1  ;;  %v2676_v48 = vld [vmem:[#allocation7 + $0x180] sm:$0xff] }
 0x673   :  { %2179 = vst.msk [vmem:[#allocation2 + $0x18] sm:$0xff] %vm2062_vm11, %v2175_v0  ;;  %2584 = vst.msk [vmem:[#allocation5] sm:$0xff] %vm2062_vm11, %v2576_v18  ;;  %v10167_v53 = vpack.c.bf16 %v2676_v48, %v2675_v47 }
 0x674   :  { %2178 = vst.msk [vmem:[#allocation2 + $0x10] sm:$0xff] %vm2062_vm11, %v2170_v24  ;;  %v8439_v3 = vpop.f32.mrb[16].mxu1 }
 0x675   :  { %v2259_v4 = vadd.f32 %v8439_v3, %v7744_v2  ;;  %v2253_v5 = vpop.f32.mrb[17].mxu1 }
 0x676   :  { %v2254_v32 = vadd.f32 %v7744_v2, %v2253_v5 }
 0x677   :  { %2263 = vst.msk [vmem:[#allocation3 + $0x8] sm:$0xff] %vm2062_vm11, %v2259_v4 }
 0x678   :  { %2262 = vst.msk [vmem:[#allocation3] sm:$0xff] %vm2062_vm11, %v2254_v32  ;;  %v8446_v38 = vpop.f32.mrb[18].mxu1 }
 0x679   :  { %v2336_v43 = vadd.f32 %v8446_v38, %v7744_v2  ;;  %v2330_v6 = vpop.f32.mrb[19].mxu1 }
 0x67a   :  { %v2331_v7 = vadd.f32 %v7744_v2, %v2330_v6 }
 0x67b   :  { %2340 = vst.msk [vmem:[#allocation3 + $0x18] sm:$0xff] %vm2062_vm11, %v2336_v43  ;;  %v2679_v8 = vld [vmem:[#allocation2] ss:$16 sm:$0x3] }
 0x67c   :  { %2339 = vst.msk [vmem:[#allocation3 + $0x10] sm:$0xff] %vm2062_vm11, %v2331_v7  ;;  %v8460_v9 = vpop.f32.mrb[20].mxu1  ;;  %v2683_v13 = vmul.f32 0.5, %v2679_v8  ;;  %v2704_v61 = vld [vmem:[#allocation2 + $0x1] ss:$16 sm:$0x3] }
 0x67d   :  { %v2497_v10 = vadd.f32 %v8460_v9, %v7749_v46  ;;  %v2491_v11 = vpop.f32.mrb[21].mxu1 }
 0x67e   :  { %v2492_v12 = vadd.f32 %v7749_v46, %v2491_v11  ;;  %9671 = vtanh.f32 %v2683_v13 }
 0x67f   :  { %2501 = vst.msk [vmem:[#allocation4 + $0x18] sm:$0xff] %vm2062_vm11, %v2497_v10 }
 0x680   :  { %2500 = vst.msk [vmem:[#allocation4 + $0x10] sm:$0xff] %vm2062_vm11, %v2492_v12  ;;  %v8474_v14 = vpop.f32.mrb[22].mxu1 }
 0x681   :  { %v2658_v15 = vadd.f32 %v8474_v14, %v7754_v59  ;;  %v2652_v16 = vpop.f32.mrb[23].mxu1 }
 0x682   :  { %v2653_v19 = vadd.f32 %v7754_v59, %v2652_v16  ;;  %v10174_v59 = vpack.c.bf16 %v2674_v56, %v2673_v54 }
 0x683   :  { %2662 = vst.msk [vmem:[#allocation5 + $0x18] sm:$0xff] %vm2062_vm11, %v2658_v15  ;;  %v2680_v20 = vld [vmem:[#allocation3] ss:$16 sm:$0x3] }
 0x684   :  { %2661 = vst.msk [vmem:[#allocation5 + $0x10] sm:$0xff] %vm2062_vm11, %v2653_v19  ;;  %v2687_v21 = vmul.f32 0.5, %v2680_v20  ;;  %v2706_v63 = vld [vmem:[#allocation3 + $0x1] ss:$16 sm:$0x3] }
 0x686   :  { %9673 = vtanh.f32 %v2687_v21 }
 0x687   :  { %v2681_v22 = vld [vmem:[#allocation4] ss:$16 sm:$0x3]  ;;  %v2708_v5 = vld [vmem:[#allocation4 + $0x1] ss:$16 sm:$0x3] }
 0x688   :  { %9675 = vtanh.f32 %v2681_v22  ;;  %v9672_v25 = vpop.eup %9671  ;;  %v3022_v45 = vld [vmem:[#allocation4 + $0x2] ss:$16 sm:$0x3] }
 0x689   :  { %v2685_v27 = vadd.f32 1.0, %v9672_v25 }
 0x68b   :  { %v2682_v23 = vld [vmem:[#allocation5] ss:$16 sm:$0x3]  ;;  %v2686_v31 = vmul.f32 0.5, %v2685_v27 }
 0x68c   :  { %v2692_v26 = vmul.f32 0.5, %v2682_v23  ;;  %v2710_v6 = vld [vmem:[#allocation5 + $0x1] ss:$16 sm:$0x3] }
 0x68e   :  { %9677 = vtanh.f32 %v2692_v26 }
 0x690   :  { %v9674_v28 = vpop.eup %9673 }
 0x691   :  { %v2689_v29 = vadd.f32 1.0, %v9674_v28 }
 0x692   :  { %v9676_v30 = vpop.eup %9675 }
 0x693   :  { %v2690_v33 = vmul.f32 0.5, %v2689_v29  ;;  %v2697_v35 = vmul.f32 %v9676_v30, %v2686_v31  ;;  %v3018_v29 = vld [vmem:[#allocation2 + $0x2] ss:$16 sm:$0x3] }
 0x694   :  { %v3020_v31 = vld [vmem:[#allocation3 + $0x2] ss:$16 sm:$0x3] }
 0x695   :  { %v2696_v34 = vmul.f32 0.0, %v2690_v33 }
 0x697   :  { %v10162_v36 = vadd.f32 %v2697_v35, %v2696_v34 }
 0x698   :  { %v9678_v40 = vpop.eup %9677 }
 0x699   :  { %9679 = vtanh.f32 %v10162_v36  ;;  %v2694_v41 = vadd.f32 1.0, %v9678_v40 }
 0x69b   :  { %v2695_v46 = vmul.f32 0.5, %v2694_v41 }
 0x6a3   :  { %v9680_v51 = vpop.eup %9679 }
 0x6a4   :  { %v2700_v55 = vmul.f32 %v9680_v51, %v2695_v46  ;;  %v3024_v51 = vld [vmem:[#allocation5 + $0x2] ss:$16 sm:$0x3] }
 0x6a6   :  { %2702 = vst.msk [vmem:[#allocation6] sm:$0x3] %vm2701_vm12, %v2700_v55  ;;  %8484 = vmatmul.mubr.msk.f32.vlgmr.msra.gmra.mrb[16].mxu0 %vm2062_vm11, %v2700_v55  ;;  %8495 = vmatmul.mubr.msk.f32.vlgmr.msra.gmra.mrb[24].mxu1 %vm2062_vm11, %v2700_v55 }
 0x6a7   :  { %9249 = vmatpush3.bf16.msra.mxu0 %v10165_v52  ;;  %9255 = vmatpush3.bf16.msra.mxu1 %v10167_v53 }
 0x6a8   :  { %9250 = vmatprep.subr.bf16.mxu0 %v9867_v37  ;;  %9256 = vmatprep.subr.bf16.mxu1 %v9867_v37 }
 0x6a9   :  { %8505 = vmatprep.mubr.msk.f32.mxu0 %vm9868_vm10, %v9866_v17  ;;  %8516 = vmatprep.mubr.msk.f32.mxu1 %vm9868_vm10, %v9866_v17 }
 0x6ab   :  { %9252 = vmatpush3.bf16.msra.mxu0 %v10174_v59  ;;  %9258 = vmatpush3.bf16.msra.mxu1 %v10176_v60 }
 0x6ac   :  { %9259 = vmatprep.subr.bf16.mxu0 %v9867_v37  ;;  %9265 = vmatprep.subr.bf16.mxu1 %v9867_v37 }
 0x6ae   :  { %8506 = vmatmul.mubr.msk.f32.vlgmr.msra.gmra.mrb[18].mxu0 %vm2062_vm11, %v2700_v55  ;;  %8517 = vmatmul.mubr.msk.f32.vlgmr.msra.gmra.mrb[26].mxu1 %vm2062_vm11, %v2700_v55 }
 0x6af   :  { %9261 = vmatpush3.bf16.msra.mxu0 %v10126_v39  ;;  %9267 = vmatpush3.bf16.msra.mxu1 %v10128_v44 }
 0x6b0   :  { %9262 = vmatprep.subr.bf16.mxu0 %v9867_v37  ;;  %9268 = vmatprep.subr.bf16.mxu1 %v9867_v37 }
 0x6b1   :  { %8527 = vmatprep.mubr.msk.f32.mxu0 %vm9868_vm10, %v9866_v17  ;;  %8538 = vmatprep.mubr.msk.f32.mxu1 %vm9868_vm10, %v9866_v17 }
 0x6b3   :  { %9264 = vmatpush3.bf16.msra.mxu0 %v10135_v49  ;;  %9270 = vmatpush3.bf16.msra.mxu1 %v10139_v50 }
 0x6b4   :  { %9271 = vmatprep.subr.bf16.mxu0 %v9867_v37  ;;  %9277 = vmatprep.subr.bf16.mxu1 %v9867_v37 }
 0x779   :  { %v2780_v62 = vpop.f32.mrb[16].mxu0  ;;  %v2851_v0 = vpop.f32.mrb[24].mxu1 }
 0x77a   :  { %v2784_v1 = vadd.f32 %v2780_v62, %v2704_v61  ;;  %v2855_v18 = vadd.f32 %v2851_v0, %v2706_v63  ;;  %v8485_v24 = vpop.f32.mrb[17].mxu0  ;;  %v8496_v2 = vpop.f32.mrb[25].mxu1 }
 0x77c   :  { %v2998_v3 = vmul.f32 0.5, %v2784_v1  ;;  %v3002_v4 = vmul.f32 0.5, %v2855_v18 }
 0x77e   :  { %9681 = vtanh.f32 %v2998_v3 }
 0x77f   :  { %9683 = vtanh.f32 %v3002_v4 }
 0x781   :  { %v2922_v32 = vpop.f32.mrb[18].mxu0  ;;  %v2993_v38 = vpop.f32.mrb[26].mxu1 }
 0x782   :  { %v2926_v43 = vadd.f32 %v2922_v32, %v2708_v5  ;;  %v8507_v7 = vpop.f32.mrb[19].mxu0  ;;  %v8518_v8 = vpop.f32.mrb[27].mxu1  ;;  %v2997_v9 = vadd.f32 %v2993_v38, %v2710_v6  ;;  %v3332_v6 = vld [vmem:[#allocation2 + $0x3] ss:$16 sm:$0x3] }
 0x783   :  { %v3334_v8 = vld [vmem:[#allocation3 + $0x3] ss:$16 sm:$0x3] }
 0x784   :  { %9685 = vtanh.f32 %v2926_v43  ;;  %v3007_v10 = vmul.f32 0.5, %v2997_v9 }
 0x786   :  { %9687 = vtanh.f32 %v3007_v10 }
 0x788   :  { %v9682_v11 = vpop.eup %9681 }
 0x789   :  { %v9684_v12 = vpop.eup %9683  ;;  %v3000_v13 = vadd.f32 1.0, %v9682_v11 }
 0x78a   :  { %v3004_v14 = vadd.f32 1.0, %v9684_v12 }
 0x78b   :  { %v3001_v15 = vmul.f32 0.5, %v3000_v13 }
 0x78c   :  { %v3005_v16 = vmul.f32 0.5, %v3004_v14 }
 0x78e   :  { %v9686_v19 = vpop.eup %9685  ;;  %v3011_v20 = vmul.f32 %v3005_v16, %v10162_v36  ;;  %v3336_v16 = vld [vmem:[#allocation4 + $0x3] ss:$16 sm:$0x3] }
 0x78f   :  { %v3012_v21 = vmul.f32 %v9686_v19, %v3001_v15 }
 0x790   :  { %v9688_v23 = vpop.eup %9687 }
 0x791   :  { %v3013_v22 = vadd.f32 %v3012_v21, %v3011_v20  ;;  %v3009_v25 = vadd.f32 1.0, %v9688_v23 }
 0x793   :  { %9689 = vtanh.f32 %v3013_v22  ;;  %v3010_v26 = vmul.f32 0.5, %v3009_v25 }
 0x79d   :  { %v9690_v27 = vpop.eup %9689 }
 0x79e   :  { %v3015_v28 = vmul.f32 %v9690_v27, %v3010_v26 }
 0x7a0   :  { %3016 = vst.msk [vmem:[#allocation6 + $0x2] sm:$0x3] %vm2701_vm12, %v3015_v28  ;;  %8528 = vmatmul.mubr.msk.f32.vlgmr.msra.gmra.mrb[20].mxu0 %vm2062_vm11, %v3015_v28  ;;  %8539 = vmatmul.mubr.msk.f32.vlgmr.msra.gmra.mrb[28].mxu1 %vm2062_vm11, %v3015_v28 }
 0x7a1   :  { %9273 = vmatpush3.bf16.msra.mxu0 %v10165_v52  ;;  %9279 = vmatpush3.bf16.msra.mxu1 %v10167_v53 }
 0x7a2   :  { %9274 = vmatprep.subr.bf16.mxu0 %v9867_v37  ;;  %9280 = vmatprep.subr.bf16.mxu1 %v9867_v37 }
 0x7a3   :  { %8549 = vmatprep.mubr.msk.f32.mxu0 %vm9868_vm10, %v9866_v17  ;;  %8560 = vmatprep.mubr.msk.f32.mxu1 %vm9868_vm10, %v9866_v17 }
 0x7a5   :  { %9276 = vmatpush3.bf16.msra.mxu0 %v10174_v59  ;;  %9282 = vmatpush3.bf16.msra.mxu1 %v10176_v60 }
 0x7a6   :  { %9283 = vmatprep.subr.bf16.mxu0 %v9867_v37  ;;  %9289 = vmatprep.subr.bf16.mxu1 %v9867_v37 }
 0x7a8   :  { %8550 = vmatmul.mubr.msk.f32.vlgmr.msra.gmra.mrb[22].mxu0 %vm2062_vm11, %v3015_v28  ;;  %8561 = vmatmul.mubr.msk.f32.vlgmr.msra.gmra.mrb[30].mxu1 %vm2062_vm11, %v3015_v28 }
 0x7a9   :  { %9285 = vmatpush3.bf16.msra.mxu0 %v10126_v39  ;;  %9291 = vmatpush3.bf16.msra.mxu1 %v10128_v44 }
 0x7aa   :  { %9286 = vmatprep.subr.bf16.mxu0 %v9867_v37  ;;  %9292 = vmatprep.subr.bf16.mxu1 %v9867_v37 }
 0x7ab   :  { %8571 = vmatprep.mubr.msk.f32.mxu0 %vm9868_vm10, %v9866_v17  ;;  %8582 = vmatprep.mubr.msk.f32.mxu1 %vm9868_vm10, %v9866_v17 }
 0x7ad   :  { %9288 = vmatpush3.bf16.msra.mxu0 %v10135_v49  ;;  %9294 = vmatpush3.bf16.msra.mxu1 %v10139_v50 }
 0x7ae   :  { %9295 = vmatprep.subr.bf16.mxu0 %v9867_v37  ;;  %9301 = vmatprep.subr.bf16.mxu1 %v9867_v37 }
 0x873   :  { %v3094_v30 = vpop.f32.mrb[20].mxu0  ;;  %v3165_v33 = vpop.f32.mrb[28].mxu1 }
 0x874   :  { %v3098_v34 = vadd.f32 %v3094_v30, %v3018_v29  ;;  %v3169_v35 = vadd.f32 %v3165_v33, %v3020_v31  ;;  %v8529_v36 = vpop.f32.mrb[21].mxu0  ;;  %v8540_v40 = vpop.f32.mrb[29].mxu1 }
 0x876   :  { %v3312_v41 = vmul.f32 0.5, %v3098_v34  ;;  %v3316_v42 = vmul.f32 0.5, %v3169_v35 }
 0x878   :  { %9691 = vtanh.f32 %v3312_v41 }
 0x879   :  { %9693 = vtanh.f32 %v3316_v42 }
 0x87b   :  { %v3236_v47 = vpop.f32.mrb[22].mxu0  ;;  %v3307_v48 = vpop.f32.mrb[30].mxu1 }
 0x87c   :  { %v3240_v46 = vadd.f32 %v3236_v47, %v3022_v45  ;;  %v8551_v54 = vpop.f32.mrb[23].mxu0  ;;  %v8562_v55 = vpop.f32.mrb[31].mxu1  ;;  %v3311_v56 = vadd.f32 %v3307_v48, %v3024_v51  ;;  %v3646_v51 = vld [vmem:[#allocation2 + $0x4] ss:$16 sm:$0x3] }
 0x87d   :  { %v3648_v55 = vld [vmem:[#allocation3 + $0x4] ss:$16 sm:$0x3] }
 0x87e   :  { %9695 = vtanh.f32 %v3240_v46  ;;  %v3321_v57 = vmul.f32 0.5, %v3311_v56 }
 0x880   :  { %9697 = vtanh.f32 %v3321_v57 }
 0x882   :  { %v9692_v58 = vpop.eup %9691 }
 0x883   :  { %v9694_v61 = vpop.eup %9693  ;;  %v3314_v62 = vadd.f32 1.0, %v9692_v58 }
 0x884   :  { %v3318_v63 = vadd.f32 1.0, %v9694_v61 }
 0x885   :  { %v3315_v0 = vmul.f32 0.5, %v3314_v62 }
 0x886   :  { %v3319_v1 = vmul.f32 0.5, %v3318_v63 }
 0x888   :  { %v9696_v18 = vpop.eup %9695  ;;  %v3325_v24 = vmul.f32 %v3319_v1, %v3013_v22  ;;  %v3338_v22 = vld [vmem:[#allocation5 + $0x3] ss:$16 sm:$0x3]  ;;  %v3650_v1 = vld [vmem:[#allocation4 + $0x4] ss:$16 sm:$0x3] }
 0x889   :  { %v3326_v2 = vmul.f32 %v9696_v18, %v3315_v0 }
 0x88a   :  { %v9698_v4 = vpop.eup %9697 }
 0x88b   :  { %v3327_v3 = vadd.f32 %v3326_v2, %v3325_v24  ;;  %v3323_v5 = vadd.f32 1.0, %v9698_v4 }
 0x88d   :  { %9699 = vtanh.f32 %v3327_v3  ;;  %v3324_v32 = vmul.f32 0.5, %v3323_v5 }
 0x897   :  { %v9700_v38 = vpop.eup %9699 }
 0x898   :  { %v3329_v43 = vmul.f32 %v9700_v38, %v3324_v32 }
 0x89a   :  { %3330 = vst.msk [vmem:[#allocation6 + $0x4] sm:$0x3] %vm2701_vm12, %v3329_v43  ;;  %8572 = vmatmul.mubr.msk.f32.vlgmr.msra.gmra.mrb[24].mxu0 %vm2062_vm11, %v3329_v43  ;;  %8583 = vmatmul.mubr.msk.f32.vlgmr.msra.gmra.mrb[32].mxu1 %vm2062_vm11, %v3329_v43 }
 0x89b   :  { %9297 = vmatpush3.bf16.msra.mxu0 %v10165_v52  ;;  %9303 = vmatpush3.bf16.msra.mxu1 %v10167_v53 }
 0x89c   :  { %9298 = vmatprep.subr.bf16.mxu0 %v9867_v37  ;;  %9304 = vmatprep.subr.bf16.mxu1 %v9867_v37 }
 0x89d   :  { %8593 = vmatprep.mubr.msk.f32.mxu0 %vm9868_vm10, %v9866_v17  ;;  %8604 = vmatprep.mubr.msk.f32.mxu1 %vm9868_vm10, %v9866_v17 }
 0x89f   :  { %9300 = vmatpush3.bf16.msra.mxu0 %v10174_v59  ;;  %9306 = vmatpush3.bf16.msra.mxu1 %v10176_v60 }
 0x8a0   :  { %9307 = vmatprep.subr.bf16.mxu0 %v9867_v37  ;;  %9313 = vmatprep.subr.bf16.mxu1 %v9867_v37 }
 0x8a2   :  { %8594 = vmatmul.mubr.msk.f32.vlgmr.msra.gmra.mrb[26].mxu0 %vm2062_vm11, %v3329_v43  ;;  %8605 = vmatmul.mubr.msk.f32.vlgmr.msra.gmra.mrb[34].mxu1 %vm2062_vm11, %v3329_v43 }
 0x8a3   :  { %9309 = vmatpush3.bf16.msra.mxu0 %v10126_v39  ;;  %9315 = vmatpush3.bf16.msra.mxu1 %v10128_v44 }
 0x8a4   :  { %9310 = vmatprep.subr.bf16.mxu0 %v9867_v37  ;;  %9316 = vmatprep.subr.bf16.mxu1 %v9867_v37 }
 0x8a5   :  { %8615 = vmatprep.mubr.msk.f32.mxu0 %vm9868_vm10, %v9866_v17  ;;  %8626 = vmatprep.mubr.msk.f32.mxu1 %vm9868_vm10, %v9866_v17 }
 0x8a7   :  { %9312 = vmatpush3.bf16.msra.mxu0 %v10135_v49  ;;  %9318 = vmatpush3.bf16.msra.mxu1 %v10139_v50 }
 0x8a8   :  { %9319 = vmatprep.subr.bf16.mxu0 %v9867_v37  ;;  %9325 = vmatprep.subr.bf16.mxu1 %v9867_v37 }
 0x96d   :  { %v3408_v7 = vpop.f32.mrb[24].mxu0  ;;  %v3479_v9 = vpop.f32.mrb[32].mxu1 }
 0x96e   :  { %v3412_v10 = vadd.f32 %v3408_v7, %v3332_v6  ;;  %v3483_v11 = vadd.f32 %v3479_v9, %v3334_v8  ;;  %v8573_v12 = vpop.f32.mrb[25].mxu0  ;;  %v8584_v13 = vpop.f32.mrb[33].mxu1 }
 0x970   :  { %v3626_v14 = vmul.f32 0.5, %v3412_v10  ;;  %v3630_v15 = vmul.f32 0.5, %v3483_v11 }
 0x972   :  { %9701 = vtanh.f32 %v3626_v14 }
 0x973   :  { %9703 = vtanh.f32 %v3630_v15 }
 0x975   :  { %v3550_v19 = vpop.f32.mrb[26].mxu0  ;;  %v3621_v20 = vpop.f32.mrb[34].mxu1 }
 0x976   :  { %v3554_v21 = vadd.f32 %v3550_v19, %v3336_v16  ;;  %v8595_v23 = vpop.f32.mrb[27].mxu0  ;;  %v8606_v25 = vpop.f32.mrb[35].mxu1  ;;  %v3625_v26 = vadd.f32 %v3621_v20, %v3338_v22  ;;  %v3960_v22 = vld [vmem:[#allocation2 + $0x5] ss:$16 sm:$0x3] }
 0x977   :  { %v3962_v25 = vld [vmem:[#allocation3 + $0x5] ss:$16 sm:$0x3] }
 0x978   :  { %9705 = vtanh.f32 %v3554_v21  ;;  %v3635_v27 = vmul.f32 0.5, %v3625_v26 }
 0x97a   :  { %9707 = vtanh.f32 %v3635_v27 }
 0x97c   :  { %v9702_v28 = vpop.eup %9701 }
 0x97d   :  { %v9704_v29 = vpop.eup %9703  ;;  %v3628_v30 = vadd.f32 1.0, %v9702_v28 }
 0x97e   :  { %v3632_v31 = vadd.f32 1.0, %v9704_v29 }
 0x97f   :  { %v3629_v33 = vmul.f32 0.5, %v3628_v30 }
 0x980   :  { %v3633_v34 = vmul.f32 0.5, %v3632_v31 }
 0x982   :  { %v9706_v35 = vpop.eup %9705  ;;  %v3639_v36 = vmul.f32 %v3633_v34, %v3327_v3  ;;  %v3652_v3 = vld [vmem:[#allocation5 + $0x4] ss:$16 sm:$0x3]  ;;  %v3964_v34 = vld [vmem:[#allocation4 + $0x5] ss:$16 sm:$0x3] }
 0x983   :  { %v3640_v40 = vmul.f32 %v9706_v35, %v3629_v33 }
 0x984   :  { %v9708_v42 = vpop.eup %9707 }
 0x985   :  { %v3641_v41 = vadd.f32 %v3640_v40, %v3639_v36  ;;  %v3637_v45 = vadd.f32 1.0, %v9708_v42 }
 0x987   :  { %9709 = vtanh.f32 %v3641_v41  ;;  %v3638_v47 = vmul.f32 0.5, %v3637_v45 }
 0x991   :  { %v9710_v48 = vpop.eup %9709 }
 0x992   :  { %v3643_v46 = vmul.f32 %v9710_v48, %v3638_v47 }
 0x994   :  { %3644 = vst.msk [vmem:[#allocation6 + $0x6] sm:$0x3] %vm2701_vm12, %v3643_v46  ;;  %8616 = vmatmul.mubr.msk.f32.vlgmr.msra.gmra.mrb[28].mxu0 %vm2062_vm11, %v3643_v46  ;;  %8627 = vmatmul.mubr.msk.f32.vlgmr.msra.gmra.mrb[36].mxu1 %vm2062_vm11, %v3643_v46 }
 0x995   :  { %9321 = vmatpush3.bf16.msra.mxu0 %v10165_v52  ;;  %9327 = vmatpush3.bf16.msra.mxu1 %v10167_v53 }
 0x996   :  { %9322 = vmatprep.subr.bf16.mxu0 %v9867_v37  ;;  %9328 = vmatprep.subr.bf16.mxu1 %v9867_v37 }
 0x997   :  { %8637 = vmatprep.mubr.msk.f32.mxu0 %vm9868_vm10, %v9866_v17  ;;  %8648 = vmatprep.mubr.msk.f32.mxu1 %vm9868_vm10, %v9866_v17 }
 0x999   :  { %9324 = vmatpush3.bf16.msra.mxu0 %v10174_v59  ;;  %9330 = vmatpush3.bf16.msra.mxu1 %v10176_v60 }
 0x99a   :  { %9331 = vmatprep.subr.bf16.mxu0 %v9867_v37  ;;  %9337 = vmatprep.subr.bf16.mxu1 %v9867_v37 }
 0x99c   :  { %8638 = vmatmul.mubr.msk.f32.vlgmr.msra.gmra.mrb[30].mxu0 %vm2062_vm11, %v3643_v46  ;;  %8649 = vmatmul.mubr.msk.f32.vlgmr.msra.gmra.mrb[38].mxu1 %vm2062_vm11, %v3643_v46 }
 0x99d   :  { %9333 = vmatpush3.bf16.msra.mxu0 %v10126_v39  ;;  %9339 = vmatpush3.bf16.msra.mxu1 %v10128_v44 }
 0x99e   :  { %9334 = vmatprep.subr.bf16.mxu0 %v9867_v37  ;;  %9340 = vmatprep.subr.bf16.mxu1 %v9867_v37 }
 0x99f   :  { %8659 = vmatprep.mubr.msk.f32.mxu0 %vm9868_vm10, %v9866_v17  ;;  %8670 = vmatprep.mubr.msk.f32.mxu1 %vm9868_vm10, %v9866_v17 }
 0x9a1   :  { %9336 = vmatpush3.bf16.msra.mxu0 %v10135_v49  ;;  %9342 = vmatpush3.bf16.msra.mxu1 %v10139_v50 }
 0x9a2   :  { %9343 = vmatprep.subr.bf16.mxu0 %v9867_v37  ;;  %9349 = vmatprep.subr.bf16.mxu1 %v9867_v37 }
 0xa67   :  { %v3722_v54 = vpop.f32.mrb[28].mxu0  ;;  %v3793_v56 = vpop.f32.mrb[36].mxu1 }
 0xa68   :  { %v3726_v57 = vadd.f32 %v3722_v54, %v3646_v51  ;;  %v3797_v58 = vadd.f32 %v3793_v56, %v3648_v55  ;;  %v8617_v61 = vpop.f32.mrb[29].mxu0  ;;  %v8628_v62 = vpop.f32.mrb[37].mxu1 }
 0xa6a   :  { %v3940_v63 = vmul.f32 0.5, %v3726_v57  ;;  %v3944_v0 = vmul.f32 0.5, %v3797_v58 }
 0xa6c   :  { %9711 = vtanh.f32 %v3940_v63 }
 0xa6d   :  { %9713 = vtanh.f32 %v3944_v0 }
 0xa6f   :  { %v3864_v18 = vpop.f32.mrb[30].mxu0  ;;  %v3935_v24 = vpop.f32.mrb[38].mxu1 }
 0xa70   :  { %v3868_v2 = vadd.f32 %v3864_v18, %v3650_v1  ;;  %v8639_v4 = vpop.f32.mrb[31].mxu0  ;;  %v8650_v5 = vpop.f32.mrb[39].mxu1  ;;  %v3939_v32 = vadd.f32 %v3935_v24, %v3652_v3  ;;  %v4274_v3 = vld [vmem:[#allocation2 + $0x6] ss:$16 sm:$0x3] }
 0xa71   :  { %v4276_v5 = vld [vmem:[#allocation3 + $0x6] ss:$16 sm:$0x3] }
 0xa72   :  { %9715 = vtanh.f32 %v3868_v2  ;;  %v3949_v38 = vmul.f32 0.5, %v3939_v32 }
 0xa74   :  { %9717 = vtanh.f32 %v3949_v38 }
 0xa76   :  { %v9712_v43 = vpop.eup %9711 }
 0xa77   :  { %v9714_v6 = vpop.eup %9713  ;;  %v3942_v7 = vadd.f32 1.0, %v9712_v43 }
 0xa78   :  { %v3946_v8 = vadd.f32 1.0, %v9714_v6 }
 0xa79   :  { %v3943_v9 = vmul.f32 0.5, %v3942_v7 }
 0xa7a   :  { %v3947_v10 = vmul.f32 0.5, %v3946_v8 }
 0xa7c   :  { %v9716_v11 = vpop.eup %9715  ;;  %v3953_v12 = vmul.f32 %v3947_v10, %v3641_v41  ;;  %v3966_v41 = vld [vmem:[#allocation5 + $0x5] ss:$16 sm:$0x3]  ;;  %v4278_v10 = vld [vmem:[#allocation4 + $0x6] ss:$16 sm:$0x3] }
 0xa7d   :  { %v3954_v13 = vmul.f32 %v9716_v11, %v3943_v9 }
 0xa7e   :  { %v9718_v15 = vpop.eup %9717 }
 0xa7f   :  { %v3955_v14 = vadd.f32 %v3954_v13, %v3953_v12  ;;  %v3951_v16 = vadd.f32 1.0, %v9718_v15 }
 0xa81   :  { %9719 = vtanh.f32 %v3955_v14  ;;  %v3952_v19 = vmul.f32 0.5, %v3951_v16 }
 0xa8b   :  { %v9720_v20 = vpop.eup %9719 }
 0xa8c   :  { %v3957_v21 = vmul.f32 %v9720_v20, %v3952_v19 }
 0xa8e   :  { %3958 = vst.msk [vmem:[#allocation6 + $0x8] sm:$0x3] %vm2701_vm12, %v3957_v21  ;;  %8660 = vmatmul.mubr.msk.f32.vlgmr.msra.gmra.mrb[32].mxu0 %vm2062_vm11, %v3957_v21  ;;  %8671 = vmatmul.mubr.msk.f32.vlgmr.msra.gmra.mrb[40].mxu1 %vm2062_vm11, %v3957_v21 }
 0xa8f   :  { %9345 = vmatpush3.bf16.msra.mxu0 %v10165_v52  ;;  %9351 = vmatpush3.bf16.msra.mxu1 %v10167_v53 }
 0xa90   :  { %9346 = vmatprep.subr.bf16.mxu0 %v9867_v37  ;;  %9352 = vmatprep.subr.bf16.mxu1 %v9867_v37 }
 0xa91   :  { %8681 = vmatprep.mubr.msk.f32.mxu0 %vm9868_vm10, %v9866_v17  ;;  %8692 = vmatprep.mubr.msk.f32.mxu1 %vm9868_vm10, %v9866_v17 }
 0xa93   :  { %9348 = vmatpush3.bf16.msra.mxu0 %v10174_v59  ;;  %9354 = vmatpush3.bf16.msra.mxu1 %v10176_v60 }
 0xa94   :  { %9355 = vmatprep.subr.bf16.mxu0 %v9867_v37  ;;  %9361 = vmatprep.subr.bf16.mxu1 %v9867_v37 }
 0xa96   :  { %8682 = vmatmul.mubr.msk.f32.vlgmr.msra.gmra.mrb[34].mxu0 %vm2062_vm11, %v3957_v21  ;;  %8693 = vmatmul.mubr.msk.f32.vlgmr.msra.gmra.mrb[42].mxu1 %vm2062_vm11, %v3957_v21 }
 0xa97   :  { %9357 = vmatpush3.bf16.msra.mxu0 %v10126_v39  ;;  %9363 = vmatpush3.bf16.msra.mxu1 %v10128_v44 }
 0xa98   :  { %9358 = vmatprep.subr.bf16.mxu0 %v9867_v37  ;;  %9364 = vmatprep.subr.bf16.mxu1 %v9867_v37 }
 0xa99   :  { %8703 = vmatprep.mubr.msk.f32.mxu0 %vm9868_vm10, %v9866_v17  ;;  %8714 = vmatprep.mubr.msk.f32.mxu1 %vm9868_vm10, %v9866_v17 }
 0xa9b   :  { %9360 = vmatpush3.bf16.msra.mxu0 %v10135_v49  ;;  %9366 = vmatpush3.bf16.msra.mxu1 %v10139_v50 }
 0xa9c   :  { %9367 = vmatprep.subr.bf16.mxu0 %v9867_v37  ;;  %9373 = vmatprep.subr.bf16.mxu1 %v9867_v37 }
 0xb61   :  { %v4036_v23 = vpop.f32.mrb[32].mxu0  ;;  %v4107_v26 = vpop.f32.mrb[40].mxu1 }
 0xb62   :  { %v4040_v27 = vadd.f32 %v4036_v23, %v3960_v22  ;;  %v4111_v28 = vadd.f32 %v4107_v26, %v3962_v25  ;;  %v8661_v29 = vpop.f32.mrb[33].mxu0  ;;  %v8672_v30 = vpop.f32.mrb[41].mxu1 }
 0xb64   :  { %v4254_v31 = vmul.f32 0.5, %v4040_v27  ;;  %v4258_v33 = vmul.f32 0.5, %v4111_v28 }
 0xb66   :  { %9721 = vtanh.f32 %v4254_v31 }
 0xb67   :  { %9723 = vtanh.f32 %v4258_v33 }
 0xb69   :  { %v4178_v35 = vpop.f32.mrb[34].mxu0  ;;  %v4249_v36 = vpop.f32.mrb[42].mxu1 }
 0xb6a   :  { %v4182_v40 = vadd.f32 %v4178_v35, %v3964_v34  ;;  %v8683_v42 = vpop.f32.mrb[35].mxu0  ;;  %v8694_v45 = vpop.f32.mrb[43].mxu1  ;;  %v4253_v47 = vadd.f32 %v4249_v36, %v3966_v41  ;;  %v4588_v41 = vld [vmem:[#allocation2 + $0x7] ss:$16 sm:$0x3] }
 0xb6b   :  { %v4590_v45 = vld [vmem:[#allocation3 + $0x7] ss:$16 sm:$0x3] }
 0xb6c   :  { %9725 = vtanh.f32 %v4182_v40  ;;  %v4263_v48 = vmul.f32 0.5, %v4253_v47 }
 0xb6e   :  { %9727 = vtanh.f32 %v4263_v48 }
 0xb70   :  { %v9722_v46 = vpop.eup %9721 }
 0xb71   :  { %v9724_v51 = vpop.eup %9723  ;;  %v4256_v54 = vadd.f32 1.0, %v9722_v46 }
 0xb72   :  { %v4260_v55 = vadd.f32 1.0, %v9724_v51 }
 0xb73   :  { %v4257_v56 = vmul.f32 0.5, %v4256_v54 }
 0xb74   :  { %v4261_v57 = vmul.f32 0.5, %v4260_v55 }
 0xb76   :  { %v9726_v58 = vpop.eup %9725  ;;  %v4267_v61 = vmul.f32 %v4261_v57, %v3955_v14  ;;  %v4280_v14 = vld [vmem:[#allocation5 + $0x6] ss:$16 sm:$0x3]  ;;  %v4592_v57 = vld [vmem:[#allocation4 + $0x7] ss:$16 sm:$0x3] }
 0xb77   :  { %v4268_v62 = vmul.f32 %v9726_v58, %v4257_v56 }
 0xb78   :  { %v9728_v0 = vpop.eup %9727 }
 0xb79   :  { %v4269_v63 = vadd.f32 %v4268_v62, %v4267_v61  ;;  %v4265_v1 = vadd.f32 1.0, %v9728_v0 }
 0xb7b   :  { %9729 = vtanh.f32 %v4269_v63  ;;  %v4266_v18 = vmul.f32 0.5, %v4265_v1 }
 0xb85   :  { %v9730_v24 = vpop.eup %9729 }
 0xb86   :  { %v4271_v2 = vmul.f32 %v9730_v24, %v4266_v18 }
 0xb88   :  { %4272 = vst.msk [vmem:[#allocation6 + $0xa] sm:$0x3] %vm2701_vm12, %v4271_v2  ;;  %8704 = vmatmul.mubr.msk.f32.vlgmr.msra.gmra.mrb[36].mxu0 %vm2062_vm11, %v4271_v2  ;;  %8715 = vmatmul.mubr.msk.f32.vlgmr.msra.gmra.mrb[44].mxu1 %vm2062_vm11, %v4271_v2 }
 0xb89   :  { %9369 = vmatpush3.bf16.msra.mxu0 %v10165_v52  ;;  %9375 = vmatpush3.bf16.msra.mxu1 %v10167_v53 }
 0xb8a   :  { %9370 = vmatprep.subr.bf16.mxu0 %v9867_v37  ;;  %9376 = vmatprep.subr.bf16.mxu1 %v9867_v37 }
 0xb8b   :  { %8725 = vmatprep.mubr.msk.f32.mxu0 %vm9868_vm10, %v9866_v17  ;;  %8736 = vmatprep.mubr.msk.f32.mxu1 %vm9868_vm10, %v9866_v17 }
 0xb8d   :  { %9372 = vmatpush3.bf16.msra.mxu0 %v10174_v59  ;;  %9378 = vmatpush3.bf16.msra.mxu1 %v10176_v60 }
 0xb8e   :  { %9379 = vmatprep.subr.bf16.mxu0 %v9867_v37  ;;  %9385 = vmatprep.subr.bf16.mxu1 %v9867_v37 }
 0xb90   :  { %8726 = vmatmul.mubr.msk.f32.vlgmr.msra.gmra.mrb[38].mxu0 %vm2062_vm11, %v4271_v2  ;;  %8737 = vmatmul.mubr.msk.f32.vlgmr.msra.gmra.mrb[46].mxu1 %vm2062_vm11, %v4271_v2 }
 0xb91   :  { %9381 = vmatpush3.bf16.msra.mxu0 %v10126_v39  ;;  %9387 = vmatpush3.bf16.msra.mxu1 %v10128_v44 }
 0xb92   :  { %9382 = vmatprep.subr.bf16.mxu0 %v9867_v37  ;;  %9388 = vmatprep.subr.bf16.mxu1 %v9867_v37 }
 0xb93   :  { %8747 = vmatprep.mubr.msk.f32.mxu0 %vm9868_vm10, %v9866_v17  ;;  %8758 = vmatprep.mubr.msk.f32.mxu1 %vm9868_vm10, %v9866_v17 }
 0xb95   :  { %9384 = vmatpush3.bf16.msra.mxu0 %v10135_v49  ;;  %9390 = vmatpush3.bf16.msra.mxu1 %v10139_v50 }
 0xb96   :  { %9391 = vmatprep.subr.bf16.mxu0 %v9867_v37  ;;  %9397 = vmatprep.subr.bf16.mxu1 %v9867_v37 }
 0xc5b   :  { %v4350_v4 = vpop.f32.mrb[36].mxu0  ;;  %v4421_v32 = vpop.f32.mrb[44].mxu1 }
 0xc5c   :  { %v4354_v38 = vadd.f32 %v4350_v4, %v4274_v3  ;;  %v4425_v43 = vadd.f32 %v4421_v32, %v4276_v5  ;;  %v8705_v6 = vpop.f32.mrb[37].mxu0  ;;  %v8716_v7 = vpop.f32.mrb[45].mxu1 }
 0xc5e   :  { %v4568_v8 = vmul.f32 0.5, %v4354_v38  ;;  %v4572_v9 = vmul.f32 0.5, %v4425_v43 }
 0xc60   :  { %9731 = vtanh.f32 %v4568_v8 }
 0xc61   :  { %9733 = vtanh.f32 %v4572_v9 }
 0xc63   :  { %v4492_v11 = vpop.f32.mrb[38].mxu0  ;;  %v4563_v12 = vpop.f32.mrb[46].mxu1 }
 0xc64   :  { %v4496_v13 = vadd.f32 %v4492_v11, %v4278_v10  ;;  %v8727_v15 = vpop.f32.mrb[39].mxu0  ;;  %v8738_v16 = vpop.f32.mrb[47].mxu1  ;;  %v4567_v19 = vadd.f32 %v4563_v12, %v4280_v14  ;;  %v4902_v14 = vld [vmem:[#allocation2 + $0x8] ss:$16 sm:$0x3] }
 0xc65   :  { %v4904_v16 = vld [vmem:[#allocation3 + $0x8] ss:$16 sm:$0x3] }
 0xc66   :  { %9735 = vtanh.f32 %v4496_v13  ;;  %v4577_v20 = vmul.f32 0.5, %v4567_v19 }
 0xc68   :  { %9737 = vtanh.f32 %v4577_v20 }
 0xc6a   :  { %v9732_v21 = vpop.eup %9731 }
 0xc6b   :  { %v9734_v22 = vpop.eup %9733  ;;  %v4570_v23 = vadd.f32 1.0, %v9732_v21 }
 0xc6c   :  { %v4574_v25 = vadd.f32 1.0, %v9734_v22 }
 0xc6d   :  { %v4571_v26 = vmul.f32 0.5, %v4570_v23 }
 0xc6e   :  { %v4575_v27 = vmul.f32 0.5, %v4574_v25 }
 0xc70   :  { %v9736_v28 = vpop.eup %9735  ;;  %v4581_v29 = vmul.f32 %v4575_v27, %v4269_v63  ;;  %v4594_v63 = vld [vmem:[#allocation5 + $0x7] ss:$16 sm:$0x3]  ;;  %v4906_v27 = vld [vmem:[#allocation4 + $0x8] ss:$16 sm:$0x3] }
 0xc71   :  { %v4582_v30 = vmul.f32 %v9736_v28, %v4571_v26 }
 0xc72   :  { %v9738_v33 = vpop.eup %9737 }
 0xc73   :  { %v4583_v31 = vadd.f32 %v4582_v30, %v4581_v29  ;;  %v4579_v34 = vadd.f32 1.0, %v9738_v33 }
 0xc75   :  { %9739 = vtanh.f32 %v4583_v31  ;;  %v4580_v35 = vmul.f32 0.5, %v4579_v34 }
 0xc7f   :  { %v9740_v36 = vpop.eup %9739 }
 0xc80   :  { %v4585_v40 = vmul.f32 %v9740_v36, %v4580_v35 }
 0xc82   :  { %4586 = vst.msk [vmem:[#allocation6 + $0xc] sm:$0x3] %vm2701_vm12, %v4585_v40  ;;  %8748 = vmatmul.mubr.msk.f32.vlgmr.msra.gmra.mrb[40].mxu0 %vm2062_vm11, %v4585_v40  ;;  %8759 = vmatmul.mubr.msk.f32.vlgmr.msra.gmra.mrb[48].mxu1 %vm2062_vm11, %v4585_v40 }
 0xc83   :  { %9393 = vmatpush3.bf16.msra.mxu0 %v10165_v52  ;;  %9399 = vmatpush3.bf16.msra.mxu1 %v10167_v53 }
 0xc84   :  { %9394 = vmatprep.subr.bf16.mxu0 %v9867_v37  ;;  %9400 = vmatprep.subr.bf16.mxu1 %v9867_v37 }
 0xc85   :  { %8769 = vmatprep.mubr.msk.f32.mxu0 %vm9868_vm10, %v9866_v17  ;;  %8780 = vmatprep.mubr.msk.f32.mxu1 %vm9868_vm10, %v9866_v17 }
 0xc87   :  { %9396 = vmatpush3.bf16.msra.mxu0 %v10174_v59  ;;  %9402 = vmatpush3.bf16.msra.mxu1 %v10176_v60 }
 0xc88   :  { %9403 = vmatprep.subr.bf16.mxu0 %v9867_v37  ;;  %9409 = vmatprep.subr.bf16.mxu1 %v9867_v37 }
 0xc8a   :  { %8770 = vmatmul.mubr.msk.f32.vlgmr.msra.gmra.mrb[42].mxu0 %vm2062_vm11, %v4585_v40  ;;  %8781 = vmatmul.mubr.msk.f32.vlgmr.msra.gmra.mrb[50].mxu1 %vm2062_vm11, %v4585_v40 }
 0xc8b   :  { %9405 = vmatpush3.bf16.msra.mxu0 %v10126_v39  ;;  %9411 = vmatpush3.bf16.msra.mxu1 %v10128_v44 }
 0xc8c   :  { %9406 = vmatprep.subr.bf16.mxu0 %v9867_v37  ;;  %9412 = vmatprep.subr.bf16.mxu1 %v9867_v37 }
 0xc8d   :  { %8791 = vmatprep.mubr.msk.f32.mxu0 %vm9868_vm10, %v9866_v17  ;;  %8802 = vmatprep.mubr.msk.f32.mxu1 %vm9868_vm10, %v9866_v17 }
 0xc8f   :  { %9408 = vmatpush3.bf16.msra.mxu0 %v10135_v49  ;;  %9414 = vmatpush3.bf16.msra.mxu1 %v10139_v50 }
 0xc90   :  { %9415 = vmatprep.subr.bf16.mxu0 %v9867_v37  ;;  %9421 = vmatprep.subr.bf16.mxu1 %v9867_v37 }
 0xd55   :  { %v4664_v42 = vpop.f32.mrb[40].mxu0  ;;  %v4735_v47 = vpop.f32.mrb[48].mxu1 }
 0xd56   :  { %v4668_v48 = vadd.f32 %v4664_v42, %v4588_v41  ;;  %v4739_v46 = vadd.f32 %v4735_v47, %v4590_v45  ;;  %v8749_v51 = vpop.f32.mrb[41].mxu0  ;;  %v8760_v54 = vpop.f32.mrb[49].mxu1 }
 0xd58   :  { %v4882_v55 = vmul.f32 0.5, %v4668_v48  ;;  %v4886_v56 = vmul.f32 0.5, %v4739_v46 }
 0xd5a   :  { %9741 = vtanh.f32 %v4882_v55 }
 0xd5b   :  { %9743 = vtanh.f32 %v4886_v56 }
 0xd5d   :  { %v4806_v58 = vpop.f32.mrb[42].mxu0  ;;  %v4877_v61 = vpop.f32.mrb[50].mxu1 }
 0xd5e   :  { %v4810_v62 = vadd.f32 %v4806_v58, %v4592_v57  ;;  %v8771_v0 = vpop.f32.mrb[43].mxu0  ;;  %v8782_v1 = vpop.f32.mrb[51].mxu1  ;;  %v4881_v18 = vadd.f32 %v4877_v61, %v4594_v63  ;;  %v5216_v63 = vld [vmem:[#allocation2 + $0x9] ss:$16 sm:$0x3] }
 0xd5f   :  { %v5218_v1 = vld [vmem:[#allocation3 + $0x9] ss:$16 sm:$0x3] }
 0xd60   :  { %9745 = vtanh.f32 %v4810_v62  ;;  %v4891_v24 = vmul.f32 0.5, %v4881_v18 }
 0xd62   :  { %9747 = vtanh.f32 %v4891_v24 }
 0xd64   :  { %v9742_v2 = vpop.eup %9741 }
 0xd65   :  { %v9744_v3 = vpop.eup %9743  ;;  %v4884_v4 = vadd.f32 1.0, %v9742_v2 }
 0xd66   :  { %v4888_v5 = vadd.f32 1.0, %v9744_v3 }
 0xd67   :  { %v4885_v32 = vmul.f32 0.5, %v4884_v4 }
 0xd68   :  { %v4889_v38 = vmul.f32 0.5, %v4888_v5 }
 0xd6a   :  { %v9746_v43 = vpop.eup %9745  ;;  %v4895_v6 = vmul.f32 %v4889_v38, %v4583_v31  ;;  %v4908_v31 = vld [vmem:[#allocation5 + $0x8] ss:$16 sm:$0x3]  ;;  %v5220_v38 = vld [vmem:[#allocation4 + $0x9] ss:$16 sm:$0x3] }
 0xd6b   :  { %v4896_v7 = vmul.f32 %v9746_v43, %v4885_v32 }
 0xd6c   :  { %v9748_v9 = vpop.eup %9747 }
 0xd6d   :  { %v4897_v8 = vadd.f32 %v4896_v7, %v4895_v6  ;;  %v4893_v10 = vadd.f32 1.0, %v9748_v9 }
 0xd6f   :  { %9749 = vtanh.f32 %v4897_v8  ;;  %v4894_v11 = vmul.f32 0.5, %v4893_v10 }
 0xd79   :  { %v9750_v12 = vpop.eup %9749 }
 0xd7a   :  { %v4899_v13 = vmul.f32 %v9750_v12, %v4894_v11 }
 0xd7c   :  { %4900 = vst.msk [vmem:[#allocation6 + $0xe] sm:$0x3] %vm2701_vm12, %v4899_v13  ;;  %8792 = vmatmul.mubr.msk.f32.vlgmr.msra.gmra.mrb[44].mxu0 %vm2062_vm11, %v4899_v13  ;;  %8803 = vmatmul.mubr.msk.f32.vlgmr.msra.gmra.mrb[52].mxu1 %vm2062_vm11, %v4899_v13 }
 0xd7d   :  { %9417 = vmatpush3.bf16.msra.mxu0 %v10165_v52  ;;  %9423 = vmatpush3.bf16.msra.mxu1 %v10167_v53 }
 0xd7e   :  { %9418 = vmatprep.subr.bf16.mxu0 %v9867_v37  ;;  %9424 = vmatprep.subr.bf16.mxu1 %v9867_v37 }
 0xd7f   :  { %8813 = vmatprep.mubr.msk.f32.mxu0 %vm9868_vm10, %v9866_v17  ;;  %8824 = vmatprep.mubr.msk.f32.mxu1 %vm9868_vm10, %v9866_v17 }
 0xd81   :  { %9420 = vmatpush3.bf16.msra.mxu0 %v10174_v59  ;;  %9426 = vmatpush3.bf16.msra.mxu1 %v10176_v60 }
 0xd82   :  { %9427 = vmatprep.subr.bf16.mxu0 %v9867_v37  ;;  %9433 = vmatprep.subr.bf16.mxu1 %v9867_v37 }
 0xd84   :  { %8814 = vmatmul.mubr.msk.f32.vlgmr.msra.gmra.mrb[46].mxu0 %vm2062_vm11, %v4899_v13  ;;  %8825 = vmatmul.mubr.msk.f32.vlgmr.msra.gmra.mrb[54].mxu1 %vm2062_vm11, %v4899_v13 }
 0xd85   :  { %9429 = vmatpush3.bf16.msra.mxu0 %v10126_v39  ;;  %9435 = vmatpush3.bf16.msra.mxu1 %v10128_v44 }
 0xd86   :  { %9430 = vmatprep.subr.bf16.mxu0 %v9867_v37  ;;  %9436 = vmatprep.subr.bf16.mxu1 %v9867_v37 }
 0xd87   :  { %8835 = vmatprep.mubr.msk.f32.mxu0 %vm9868_vm10, %v9866_v17  ;;  %8846 = vmatprep.mubr.msk.f32.mxu1 %vm9868_vm10, %v9866_v17 }
 0xd89   :  { %9432 = vmatpush3.bf16.msra.mxu0 %v10135_v49  ;;  %9438 = vmatpush3.bf16.msra.mxu1 %v10139_v50 }
 0xd8a   :  { %9439 = vmatprep.subr.bf16.mxu0 %v9867_v37  ;;  %9445 = vmatprep.subr.bf16.mxu1 %v9867_v37 }
 0xe4f   :  { %v4978_v15 = vpop.f32.mrb[44].mxu0  ;;  %v5049_v19 = vpop.f32.mrb[52].mxu1 }
 0xe50   :  { %v4982_v20 = vadd.f32 %v4978_v15, %v4902_v14  ;;  %v5053_v21 = vadd.f32 %v5049_v19, %v4904_v16  ;;  %v8793_v22 = vpop.f32.mrb[45].mxu0  ;;  %v8804_v23 = vpop.f32.mrb[53].mxu1 }
 0xe52   :  { %v5196_v25 = vmul.f32 0.5, %v4982_v20  ;;  %v5200_v26 = vmul.f32 0.5, %v5053_v21 }
 0xe54   :  { %9751 = vtanh.f32 %v5196_v25 }
 0xe55   :  { %9753 = vtanh.f32 %v5200_v26 }
 0xe57   :  { %v5120_v28 = vpop.f32.mrb[46].mxu0  ;;  %v5191_v29 = vpop.f32.mrb[54].mxu1 }
 0xe58   :  { %v5124_v30 = vadd.f32 %v5120_v28, %v4906_v27  ;;  %v8815_v33 = vpop.f32.mrb[47].mxu0  ;;  %v8826_v34 = vpop.f32.mrb[55].mxu1  ;;  %v5195_v35 = vadd.f32 %v5191_v29, %v4908_v31  ;;  %v5530_v31 = vld [vmem:[#allocation2 + $0xa] ss:$16 sm:$0x3] }
 0xe59   :  { %v5532_v34 = vld [vmem:[#allocation3 + $0xa] ss:$16 sm:$0x3] }
 0xe5a   :  { %9755 = vtanh.f32 %v5124_v30  ;;  %v5205_v36 = vmul.f32 0.5, %v5195_v35 }
 0xe5c   :  { %9757 = vtanh.f32 %v5205_v36 }
 0xe5e   :  { %v9752_v40 = vpop.eup %9751 }
 0xe5f   :  { %v9754_v41 = vpop.eup %9753  ;;  %v5198_v42 = vadd.f32 1.0, %v9752_v40 }
 0xe60   :  { %v5202_v45 = vadd.f32 1.0, %v9754_v41 }
 0xe61   :  { %v5199_v47 = vmul.f32 0.5, %v5198_v42 }
 0xe62   :  { %v5203_v48 = vmul.f32 0.5, %v5202_v45 }
 0xe64   :  { %v9756_v46 = vpop.eup %9755  ;;  %v5209_v51 = vmul.f32 %v5203_v48, %v4897_v8  ;;  %v5222_v8 = vld [vmem:[#allocation5 + $0x9] ss:$16 sm:$0x3]  ;;  %v5534_v48 = vld [vmem:[#allocation4 + $0xa] ss:$16 sm:$0x3] }
 0xe65   :  { %v5210_v54 = vmul.f32 %v9756_v46, %v5199_v47 }
 0xe66   :  { %v9758_v56 = vpop.eup %9757 }
 0xe67   :  { %v5211_v55 = vadd.f32 %v5210_v54, %v5209_v51  ;;  %v5207_v57 = vadd.f32 1.0, %v9758_v56 }
 0xe69   :  { %9759 = vtanh.f32 %v5211_v55  ;;  %v5208_v58 = vmul.f32 0.5, %v5207_v57 }
 0xe73   :  { %v9760_v61 = vpop.eup %9759 }
 0xe74   :  { %v5213_v62 = vmul.f32 %v9760_v61, %v5208_v58 }
 0xe76   :  { %5214 = vst.msk [vmem:[#allocation6 + $0x10] sm:$0x3] %vm2701_vm12, %v5213_v62  ;;  %8836 = vmatmul.mubr.msk.f32.vlgmr.msra.gmra.mrb[48].mxu0 %vm2062_vm11, %v5213_v62  ;;  %8847 = vmatmul.mubr.msk.f32.vlgmr.msra.gmra.mrb[56].mxu1 %vm2062_vm11, %v5213_v62 }
 0xe77   :  { %9441 = vmatpush3.bf16.msra.mxu0 %v10165_v52  ;;  %9447 = vmatpush3.bf16.msra.mxu1 %v10167_v53 }
 0xe78   :  { %9442 = vmatprep.subr.bf16.mxu0 %v9867_v37  ;;  %9448 = vmatprep.subr.bf16.mxu1 %v9867_v37 }
 0xe79   :  { %8857 = vmatprep.mubr.msk.f32.mxu0 %vm9868_vm10, %v9866_v17  ;;  %8868 = vmatprep.mubr.msk.f32.mxu1 %vm9868_vm10, %v9866_v17 }
 0xe7b   :  { %9444 = vmatpush3.bf16.msra.mxu0 %v10174_v59  ;;  %9450 = vmatpush3.bf16.msra.mxu1 %v10176_v60 }
 0xe7c   :  { %9451 = vmatprep.subr.bf16.mxu0 %v9867_v37  ;;  %9457 = vmatprep.subr.bf16.mxu1 %v9867_v37 }
 0xe7e   :  { %8858 = vmatmul.mubr.msk.f32.vlgmr.msra.gmra.mrb[50].mxu0 %vm2062_vm11, %v5213_v62  ;;  %8869 = vmatmul.mubr.msk.f32.vlgmr.msra.gmra.mrb[58].mxu1 %vm2062_vm11, %v5213_v62 }
 0xe7f   :  { %9453 = vmatpush3.bf16.msra.mxu0 %v10126_v39  ;;  %9459 = vmatpush3.bf16.msra.mxu1 %v10128_v44 }
 0xe80   :  { %9454 = vmatprep.subr.bf16.mxu0 %v9867_v37  ;;  %9460 = vmatprep.subr.bf16.mxu1 %v9867_v37 }
 0xe81   :  { %8879 = vmatprep.mubr.msk.f32.mxu0 %vm9868_vm10, %v9866_v17  ;;  %8890 = vmatprep.mubr.msk.f32.mxu1 %vm9868_vm10, %v9866_v17 }
 0xe83   :  { %9456 = vmatpush3.bf16.msra.mxu0 %v10135_v49  ;;  %9462 = vmatpush3.bf16.msra.mxu1 %v10139_v50 }
 0xe84   :  { %9463 = vmatprep.subr.bf16.mxu0 %v9867_v37  ;;  %9469 = vmatprep.subr.bf16.mxu1 %v9867_v37 }
 0xf49   :  { %v5292_v0 = vpop.f32.mrb[48].mxu0  ;;  %v5363_v18 = vpop.f32.mrb[56].mxu1 }
 0xf4a   :  { %v5296_v24 = vadd.f32 %v5292_v0, %v5216_v63  ;;  %v5367_v2 = vadd.f32 %v5363_v18, %v5218_v1  ;;  %v8837_v3 = vpop.f32.mrb[49].mxu0  ;;  %v8848_v4 = vpop.f32.mrb[57].mxu1 }
 0xf4c   :  { %v5510_v5 = vmul.f32 0.5, %v5296_v24  ;;  %v5514_v32 = vmul.f32 0.5, %v5367_v2 }
 0xf4e   :  { %9761 = vtanh.f32 %v5510_v5 }
 0xf4f   :  { %9763 = vtanh.f32 %v5514_v32 }
 0xf51   :  { %v5434_v43 = vpop.f32.mrb[50].mxu0  ;;  %v5505_v6 = vpop.f32.mrb[58].mxu1 }
 0xf52   :  { %v5438_v7 = vadd.f32 %v5434_v43, %v5220_v38  ;;  %v8859_v9 = vpop.f32.mrb[51].mxu0  ;;  %v8870_v10 = vpop.f32.mrb[59].mxu1  ;;  %v5509_v11 = vadd.f32 %v5505_v6, %v5222_v8  ;;  %v5844_v8 = vld [vmem:[#allocation2 + $0xb] ss:$16 sm:$0x3] }
 0xf53   :  { %v5846_v10 = vld [vmem:[#allocation3 + $0xb] ss:$16 sm:$0x3] }
 0xf54   :  { %9765 = vtanh.f32 %v5438_v7  ;;  %v5519_v12 = vmul.f32 0.5, %v5509_v11 }
 0xf56   :  { %9767 = vtanh.f32 %v5519_v12 }
 0xf58   :  { %v9762_v13 = vpop.eup %9761 }
 0xf59   :  { %v9764_v14 = vpop.eup %9763  ;;  %v5512_v15 = vadd.f32 1.0, %v9762_v13 }
 0xf5a   :  { %v5516_v16 = vadd.f32 1.0, %v9764_v14 }
 0xf5b   :  { %v5513_v19 = vmul.f32 0.5, %v5512_v15 }
 0xf5c   :  { %v5517_v20 = vmul.f32 0.5, %v5516_v16 }
 0xf5e   :  { %v9766_v21 = vpop.eup %9765  ;;  %v5523_v22 = vmul.f32 %v5517_v20, %v5211_v55  ;;  %v5536_v55 = vld [vmem:[#allocation5 + $0xa] ss:$16 sm:$0x3]  ;;  %v5848_v20 = vld [vmem:[#allocation4 + $0xb] ss:$16 sm:$0x3] }
 0xf5f   :  { %v5524_v23 = vmul.f32 %v9766_v21, %v5513_v19 }
 0xf60   :  { %v9768_v26 = vpop.eup %9767 }
 0xf61   :  { %v5525_v25 = vadd.f32 %v5524_v23, %v5523_v22  ;;  %v5521_v27 = vadd.f32 1.0, %v9768_v26 }
 0xf63   :  { %9769 = vtanh.f32 %v5525_v25  ;;  %v5522_v28 = vmul.f32 0.5, %v5521_v27 }
 0xf6d   :  { %v9770_v29 = vpop.eup %9769 }
 0xf6e   :  { %v5527_v30 = vmul.f32 %v9770_v29, %v5522_v28 }
 0xf70   :  { %5528 = vst.msk [vmem:[#allocation6 + $0x12] sm:$0x3] %vm2701_vm12, %v5527_v30  ;;  %8880 = vmatmul.mubr.msk.f32.vlgmr.msra.gmra.mrb[52].mxu0 %vm2062_vm11, %v5527_v30  ;;  %8891 = vmatmul.mubr.msk.f32.vlgmr.msra.gmra.mrb[60].mxu1 %vm2062_vm11, %v5527_v30 }
 0xf71   :  { %9465 = vmatpush3.bf16.msra.mxu0 %v10165_v52  ;;  %9471 = vmatpush3.bf16.msra.mxu1 %v10167_v53 }
 0xf72   :  { %9466 = vmatprep.subr.bf16.mxu0 %v9867_v37  ;;  %9472 = vmatprep.subr.bf16.mxu1 %v9867_v37 }
 0xf73   :  { %8901 = vmatprep.mubr.msk.f32.mxu0 %vm9868_vm10, %v9866_v17  ;;  %8912 = vmatprep.mubr.msk.f32.mxu1 %vm9868_vm10, %v9866_v17 }
 0xf75   :  { %9468 = vmatpush3.bf16.msra.mxu0 %v10174_v59  ;;  %9474 = vmatpush3.bf16.msra.mxu1 %v10176_v60 }
 0xf76   :  { %9475 = vmatprep.subr.bf16.mxu0 %v9867_v37  ;;  %9481 = vmatprep.subr.bf16.mxu1 %v9867_v37 }
 0xf78   :  { %8902 = vmatmul.mubr.msk.f32.vlgmr.msra.gmra.mrb[54].mxu0 %vm2062_vm11, %v5527_v30  ;;  %8913 = vmatmul.mubr.msk.f32.vlgmr.msra.gmra.mrb[62].mxu1 %vm2062_vm11, %v5527_v30 }
 0xf79   :  { %9477 = vmatpush3.bf16.msra.mxu0 %v10126_v39  ;;  %9483 = vmatpush3.bf16.msra.mxu1 %v10128_v44 }
 0xf7a   :  { %9478 = vmatprep.subr.bf16.mxu0 %v9867_v37  ;;  %9484 = vmatprep.subr.bf16.mxu1 %v9867_v37 }
 0xf7b   :  { %8923 = vmatprep.mubr.msk.f32.mxu0 %vm9868_vm10, %v9866_v17  ;;  %8934 = vmatprep.mubr.msk.f32.mxu1 %vm9868_vm10, %v9866_v17 }
 0xf7d   :  { %9480 = vmatpush3.bf16.msra.mxu0 %v10135_v49  ;;  %9486 = vmatpush3.bf16.msra.mxu1 %v10139_v50 }
 0xf7e   :  { %9487 = vmatprep.subr.bf16.mxu0 %v9867_v37  ;;  %9493 = vmatprep.subr.bf16.mxu1 %v9867_v37 }
0x1043   :  { %v5606_v33 = vpop.f32.mrb[52].mxu0  ;;  %v5677_v35 = vpop.f32.mrb[60].mxu1 }
0x1044   :  { %v5610_v36 = vadd.f32 %v5606_v33, %v5530_v31  ;;  %v5681_v40 = vadd.f32 %v5677_v35, %v5532_v34  ;;  %v8881_v41 = vpop.f32.mrb[53].mxu0  ;;  %v8892_v42 = vpop.f32.mrb[61].mxu1 }
0x1046   :  { %v5824_v45 = vmul.f32 0.5, %v5610_v36  ;;  %v5828_v47 = vmul.f32 0.5, %v5681_v40 }
0x1048   :  { %9771 = vtanh.f32 %v5824_v45 }
0x1049   :  { %9773 = vtanh.f32 %v5828_v47 }
0x104b   :  { %v5748_v46 = vpop.f32.mrb[54].mxu0  ;;  %v5819_v51 = vpop.f32.mrb[62].mxu1 }
0x104c   :  { %v5752_v54 = vadd.f32 %v5748_v46, %v5534_v48  ;;  %v8903_v56 = vpop.f32.mrb[55].mxu0  ;;  %v8914_v57 = vpop.f32.mrb[63].mxu1  ;;  %v5823_v58 = vadd.f32 %v5819_v51, %v5536_v55  ;;  %v6158_v55 = vld [vmem:[#allocation2 + $0xc] ss:$16 sm:$0x3] }
0x104d   :  { %v6160_v57 = vld [vmem:[#allocation3 + $0xc] ss:$16 sm:$0x3] }
0x104e   :  { %9775 = vtanh.f32 %v5752_v54  ;;  %v5833_v61 = vmul.f32 0.5, %v5823_v58 }
0x1050   :  { %9777 = vtanh.f32 %v5833_v61 }
0x1052   :  { %v9772_v62 = vpop.eup %9771 }
0x1053   :  { %v9774_v63 = vpop.eup %9773  ;;  %v5826_v0 = vadd.f32 1.0, %v9772_v62 }
0x1054   :  { %v5830_v1 = vadd.f32 1.0, %v9774_v63 }
0x1055   :  { %v5827_v18 = vmul.f32 0.5, %v5826_v0 }
0x1056   :  { %v5831_v24 = vmul.f32 0.5, %v5830_v1 }
0x1058   :  { %v9776_v2 = vpop.eup %9775  ;;  %v5837_v3 = vmul.f32 %v5831_v24, %v5525_v25  ;;  %v5850_v25 = vld [vmem:[#allocation5 + $0xb] ss:$16 sm:$0x3]  ;;  %v6162_v24 = vld [vmem:[#allocation4 + $0xc] ss:$16 sm:$0x3] }
0x1059   :  { %v5838_v4 = vmul.f32 %v9776_v2, %v5827_v18 }
0x105a   :  { %v9778_v32 = vpop.eup %9777 }
0x105b   :  { %v5839_v5 = vadd.f32 %v5838_v4, %v5837_v3  ;;  %v5835_v38 = vadd.f32 1.0, %v9778_v32 }
0x105d   :  { %9779 = vtanh.f32 %v5839_v5  ;;  %v5836_v43 = vmul.f32 0.5, %v5835_v38 }
0x1067   :  { %v9780_v6 = vpop.eup %9779 }
0x1068   :  { %v5841_v7 = vmul.f32 %v9780_v6, %v5836_v43 }
0x106a   :  { %5842 = vst.msk [vmem:[#allocation6 + $0x14] sm:$0x3] %vm2701_vm12, %v5841_v7  ;;  %8924 = vmatmul.mubr.msk.f32.vlgmr.msra.gmra.mrb[56].mxu0 %vm2062_vm11, %v5841_v7  ;;  %8935 = vmatmul.mubr.msk.f32.vlgmr.msra.gmra.mrb[64].mxu1 %vm2062_vm11, %v5841_v7 }
0x106b   :  { %9489 = vmatpush3.bf16.msra.mxu0 %v10165_v52  ;;  %9495 = vmatpush3.bf16.msra.mxu1 %v10167_v53 }
0x106c   :  { %9490 = vmatprep.subr.bf16.mxu0 %v9867_v37  ;;  %9496 = vmatprep.subr.bf16.mxu1 %v9867_v37 }
0x106d   :  { %8945 = vmatprep.mubr.msk.f32.mxu0 %vm9868_vm10, %v9866_v17  ;;  %8956 = vmatprep.mubr.msk.f32.mxu1 %vm9868_vm10, %v9866_v17 }
0x106f   :  { %9492 = vmatpush3.bf16.msra.mxu0 %v10174_v59  ;;  %9498 = vmatpush3.bf16.msra.mxu1 %v10176_v60 }
0x1070   :  { %9499 = vmatprep.subr.bf16.mxu0 %v9867_v37  ;;  %9505 = vmatprep.subr.bf16.mxu1 %v9867_v37 }
0x1072   :  { %8946 = vmatmul.mubr.msk.f32.vlgmr.msra.gmra.mrb[58].mxu0 %vm2062_vm11, %v5841_v7  ;;  %8957 = vmatmul.mubr.msk.f32.vlgmr.msra.gmra.mrb[66].mxu1 %vm2062_vm11, %v5841_v7 }
0x1073   :  { %9501 = vmatpush3.bf16.msra.mxu0 %v10126_v39  ;;  %9507 = vmatpush3.bf16.msra.mxu1 %v10128_v44 }
0x1074   :  { %9502 = vmatprep.subr.bf16.mxu0 %v9867_v37  ;;  %9508 = vmatprep.subr.bf16.mxu1 %v9867_v37 }
0x1075   :  { %8967 = vmatprep.mubr.msk.f32.mxu0 %vm9868_vm10, %v9866_v17  ;;  %8978 = vmatprep.mubr.msk.f32.mxu1 %vm9868_vm10, %v9866_v17 }
0x1077   :  { %9504 = vmatpush3.bf16.msra.mxu0 %v10135_v49  ;;  %9510 = vmatpush3.bf16.msra.mxu1 %v10139_v50 }
0x1078   :  { %9511 = vmatprep.subr.bf16.mxu0 %v9867_v37  ;;  %9517 = vmatprep.subr.bf16.mxu1 %v9867_v37 }
0x113d   :  { %v5920_v9 = vpop.f32.mrb[56].mxu0  ;;  %v5991_v11 = vpop.f32.mrb[64].mxu1 }
0x113e   :  { %v5924_v12 = vadd.f32 %v5920_v9, %v5844_v8  ;;  %v5995_v13 = vadd.f32 %v5991_v11, %v5846_v10  ;;  %v8925_v14 = vpop.f32.mrb[57].mxu0  ;;  %v8936_v15 = vpop.f32.mrb[65].mxu1 }
0x1140   :  { %v6138_v16 = vmul.f32 0.5, %v5924_v12  ;;  %v6142_v19 = vmul.f32 0.5, %v5995_v13 }
0x1142   :  { %9781 = vtanh.f32 %v6138_v16 }
0x1143   :  { %9783 = vtanh.f32 %v6142_v19 }
0x1145   :  { %v6062_v21 = vpop.f32.mrb[58].mxu0  ;;  %v6133_v22 = vpop.f32.mrb[66].mxu1 }
0x1146   :  { %v6066_v23 = vadd.f32 %v6062_v21, %v5848_v20  ;;  %v8947_v26 = vpop.f32.mrb[59].mxu0  ;;  %v8958_v27 = vpop.f32.mrb[67].mxu1  ;;  %v6137_v28 = vadd.f32 %v6133_v22, %v5850_v25  ;;  %v6472_v25 = vld [vmem:[#allocation2 + $0xd] ss:$16 sm:$0x3] }
0x1147   :  { %v6474_v27 = vld [vmem:[#allocation3 + $0xd] ss:$16 sm:$0x3] }
0x1148   :  { %9785 = vtanh.f32 %v6066_v23  ;;  %v6147_v29 = vmul.f32 0.5, %v6137_v28 }
0x114a   :  { %9787 = vtanh.f32 %v6147_v29 }
0x114c   :  { %v9782_v30 = vpop.eup %9781 }
0x114d   :  { %v9784_v31 = vpop.eup %9783  ;;  %v6140_v33 = vadd.f32 1.0, %v9782_v30 }
0x114e   :  { %v6144_v34 = vadd.f32 1.0, %v9784_v31 }
0x114f   :  { %v6141_v35 = vmul.f32 0.5, %v6140_v33 }
0x1150   :  { %v6145_v36 = vmul.f32 0.5, %v6144_v34 }
0x1152   :  { %v9786_v40 = vpop.eup %9785  ;;  %v6151_v41 = vmul.f32 %v6145_v36, %v5839_v5  ;;  %v6164_v5 = vld [vmem:[#allocation5 + $0xc] ss:$16 sm:$0x3]  ;;  %v6476_v36 = vld [vmem:[#allocation4 + $0xd] ss:$16 sm:$0x3] }
0x1153   :  { %v6152_v42 = vmul.f32 %v9786_v40, %v6141_v35 }
0x1154   :  { %v9788_v47 = vpop.eup %9787 }
0x1155   :  { %v6153_v45 = vadd.f32 %v6152_v42, %v6151_v41  ;;  %v6149_v48 = vadd.f32 1.0, %v9788_v47 }
0x1157   :  { %9789 = vtanh.f32 %v6153_v45  ;;  %v6150_v46 = vmul.f32 0.5, %v6149_v48 }
0x1161   :  { %v9790_v51 = vpop.eup %9789 }
0x1162   :  { %v6155_v54 = vmul.f32 %v9790_v51, %v6150_v46 }
0x1164   :  { %6156 = vst.msk [vmem:[#allocation6 + $0x16] sm:$0x3] %vm2701_vm12, %v6155_v54  ;;  %8968 = vmatmul.mubr.msk.f32.vlgmr.msra.gmra.mrb[60].mxu0 %vm2062_vm11, %v6155_v54  ;;  %8979 = vmatmul.mubr.msk.f32.vlgmr.msra.gmra.mrb[68].mxu1 %vm2062_vm11, %v6155_v54 }
0x1165   :  { %9513 = vmatpush3.bf16.msra.mxu0 %v10165_v52  ;;  %9519 = vmatpush3.bf16.msra.mxu1 %v10167_v53 }
0x1166   :  { %9514 = vmatprep.subr.bf16.mxu0 %v9867_v37  ;;  %9520 = vmatprep.subr.bf16.mxu1 %v9867_v37 }
0x1167   :  { %8989 = vmatprep.mubr.msk.f32.mxu0 %vm9868_vm10, %v9866_v17  ;;  %9000 = vmatprep.mubr.msk.f32.mxu1 %vm9868_vm10, %v9866_v17 }
0x1169   :  { %9516 = vmatpush3.bf16.msra.mxu0 %v10174_v59  ;;  %9522 = vmatpush3.bf16.msra.mxu1 %v10176_v60 }
0x116a   :  { %9523 = vmatprep.subr.bf16.mxu0 %v9867_v37  ;;  %9529 = vmatprep.subr.bf16.mxu1 %v9867_v37 }
0x116c   :  { %8990 = vmatmul.mubr.msk.f32.vlgmr.msra.gmra.mrb[62].mxu0 %vm2062_vm11, %v6155_v54  ;;  %9001 = vmatmul.mubr.msk.f32.vlgmr.msra.gmra.mrb[70].mxu1 %vm2062_vm11, %v6155_v54 }
0x116d   :  { %9525 = vmatpush3.bf16.msra.mxu0 %v10126_v39  ;;  %9531 = vmatpush3.bf16.msra.mxu1 %v10128_v44 }
0x116e   :  { %9526 = vmatprep.subr.bf16.mxu0 %v9867_v37  ;;  %9532 = vmatprep.subr.bf16.mxu1 %v9867_v37 }
0x116f   :  { %9011 = vmatprep.mubr.msk.f32.mxu0 %vm9868_vm10, %v9866_v17  ;;  %9022 = vmatprep.mubr.msk.f32.mxu1 %vm9868_vm10, %v9866_v17 }
0x1171   :  { %9528 = vmatpush3.bf16.msra.mxu0 %v10135_v49  ;;  %9534 = vmatpush3.bf16.msra.mxu1 %v10139_v50 }
0x1172   :  { %9535 = vmatprep.subr.bf16.mxu0 %v9867_v37  ;;  %9541 = vmatprep.subr.bf16.mxu1 %v9867_v37 }
0x1237   :  { %v6234_v56 = vpop.f32.mrb[60].mxu0  ;;  %v6305_v58 = vpop.f32.mrb[68].mxu1 }
0x1238   :  { %v6238_v61 = vadd.f32 %v6234_v56, %v6158_v55  ;;  %v6309_v62 = vadd.f32 %v6305_v58, %v6160_v57  ;;  %v8969_v63 = vpop.f32.mrb[61].mxu0  ;;  %v8980_v0 = vpop.f32.mrb[69].mxu1 }
0x123a   :  { %v6452_v1 = vmul.f32 0.5, %v6238_v61  ;;  %v6456_v18 = vmul.f32 0.5, %v6309_v62 }
0x123c   :  { %9791 = vtanh.f32 %v6452_v1 }
0x123d   :  { %9793 = vtanh.f32 %v6456_v18 }
0x123f   :  { %v6376_v2 = vpop.f32.mrb[62].mxu0  ;;  %v6447_v3 = vpop.f32.mrb[70].mxu1 }
0x1240   :  { %v6380_v4 = vadd.f32 %v6376_v2, %v6162_v24  ;;  %v8991_v32 = vpop.f32.mrb[63].mxu0  ;;  %v9002_v38 = vpop.f32.mrb[71].mxu1  ;;  %v6451_v43 = vadd.f32 %v6447_v3, %v6164_v5  ;;  %v6788_v5 = vld [vmem:[#allocation3 + $0xe] ss:$16 sm:$0x3] }
0x1242   :  { %9795 = vtanh.f32 %v6380_v4  ;;  %v6461_v6 = vmul.f32 0.5, %v6451_v43 }
0x1244   :  { %9797 = vtanh.f32 %v6461_v6 }
0x1246   :  { %v9792_v7 = vpop.eup %9791 }
0x1247   :  { %v9794_v8 = vpop.eup %9793  ;;  %v6454_v9 = vadd.f32 1.0, %v9792_v7 }
0x1248   :  { %v6458_v10 = vadd.f32 1.0, %v9794_v8 }
0x1249   :  { %v6455_v11 = vmul.f32 0.5, %v6454_v9 }
0x124a   :  { %v6459_v12 = vmul.f32 0.5, %v6458_v10  ;;  %v6790_v10 = vld [vmem:[#allocation4 + $0xe] ss:$16 sm:$0x3] }
0x124c   :  { %v9796_v13 = vpop.eup %9795  ;;  %v6465_v14 = vmul.f32 %v6459_v12, %v6153_v45  ;;  %v6478_v45 = vld [vmem:[#allocation5 + $0xd] ss:$16 sm:$0x3]  ;;  %v6792_v12 = vld [vmem:[#allocation5 + $0xe] ss:$16 sm:$0x3] }
0x124d   :  { %v6466_v15 = vmul.f32 %v9796_v13, %v6455_v11 }
0x124e   :  { %v9798_v19 = vpop.eup %9797 }
0x124f   :  { %v6467_v16 = vadd.f32 %v6466_v15, %v6465_v14  ;;  %v6463_v20 = vadd.f32 1.0, %v9798_v19 }
0x1251   :  { %9799 = vtanh.f32 %v6467_v16  ;;  %v6464_v21 = vmul.f32 0.5, %v6463_v20 }
0x125b   :  { %v9800_v22 = vpop.eup %9799 }
0x125c   :  { %v6469_v23 = vmul.f32 %v9800_v22, %v6464_v21 }
0x125e   :  { %6470 = vst.msk [vmem:[#allocation6 + $0x18] sm:$0x3] %vm2701_vm12, %v6469_v23  ;;  %9012 = vmatmul.mubr.msk.f32.vlgmr.msra.gmra.mrb[64].mxu0 %vm2062_vm11, %v6469_v23  ;;  %9023 = vmatmul.mubr.msk.f32.vlgmr.msra.gmra.mrb[72].mxu1 %vm2062_vm11, %v6469_v23 }
0x125f   :  { %9537 = vmatpush3.bf16.msra.mxu0 %v10165_v52  ;;  %9543 = vmatpush3.bf16.msra.mxu1 %v10167_v53 }
0x1260   :  { %9538 = vmatprep.subr.bf16.mxu0 %v9867_v37  ;;  %9544 = vmatprep.subr.bf16.mxu1 %v9867_v37 }
0x1261   :  { %9033 = vmatprep.mubr.msk.f32.mxu0 %vm9868_vm10, %v9866_v17  ;;  %9044 = vmatprep.mubr.msk.f32.mxu1 %vm9868_vm10, %v9866_v17 }
0x1263   :  { %9540 = vmatpush3.bf16.msra.mxu0 %v10174_v59  ;;  %9546 = vmatpush3.bf16.msra.mxu1 %v10176_v60 }
0x1264   :  { %9547 = vmatprep.subr.bf16.mxu0 %v9867_v37  ;;  %9553 = vmatprep.subr.bf16.mxu1 %v9867_v37 }
0x1266   :  { %9034 = vmatmul.mubr.msk.f32.vlgmr.msra.gmra.mrb[66].mxu0 %vm2062_vm11, %v6469_v23  ;;  %9045 = vmatmul.mubr.msk.f32.vlgmr.msra.gmra.mrb[74].mxu1 %vm2062_vm11, %v6469_v23 }
0x1267   :  { %9549 = vmatpush3.bf16.msra.mxu0 %v10126_v39  ;;  %9555 = vmatpush3.bf16.msra.mxu1 %v10128_v44 }
0x1268   :  { %9550 = vmatprep.subr.bf16.mxu0 %v9867_v37  ;;  %9556 = vmatprep.subr.bf16.mxu1 %v9867_v37 }
0x1269   :  { %9055 = vmatprep.mubr.msk.f32.mxu0 %vm9868_vm10, %v9866_v17  ;;  %9066 = vmatprep.mubr.msk.f32.mxu1 %vm9868_vm10, %v9866_v17 }
0x126b   :  { %9552 = vmatpush3.bf16.msra.mxu0 %v10135_v49  ;;  %9558 = vmatpush3.bf16.msra.mxu1 %v10139_v50 }
0x126c   :  { %9559 = vmatprep.subr.bf16.mxu0 %v9867_v37  ;;  %9565 = vmatprep.subr.bf16.mxu1 %v9867_v37 }
0x1331   :  { %v6548_v26 = vpop.f32.mrb[64].mxu0  ;;  %v6619_v28 = vpop.f32.mrb[72].mxu1 }
0x1332   :  { %v6552_v29 = vadd.f32 %v6548_v26, %v6472_v25  ;;  %v6623_v30 = vadd.f32 %v6619_v28, %v6474_v27  ;;  %v9013_v31 = vpop.f32.mrb[65].mxu0  ;;  %v9024_v33 = vpop.f32.mrb[73].mxu1 }
0x1334   :  { %v6766_v34 = vmul.f32 0.5, %v6552_v29  ;;  %v6770_v35 = vmul.f32 0.5, %v6623_v30 }
0x1336   :  { %9801 = vtanh.f32 %v6766_v34 }
0x1337   :  { %9803 = vtanh.f32 %v6770_v35 }
0x1339   :  { %v6690_v40 = vpop.f32.mrb[66].mxu0  ;;  %v6761_v41 = vpop.f32.mrb[74].mxu1 }
0x133a   :  { %v6694_v42 = vadd.f32 %v6690_v40, %v6476_v36  ;;  %v9035_v47 = vpop.f32.mrb[67].mxu0  ;;  %v9046_v48 = vpop.f32.mrb[75].mxu1  ;;  %v6765_v46 = vadd.f32 %v6761_v41, %v6478_v45  ;;  %v7417_v36 = vld [vmem:[#allocation7 + $0x1a0] sm:$0xff]  ;;  %v7418_v40 = vld [vmem:[#allocation7 + $0x1a8] sm:$0xff]  ;;  %v7420_v45 = vld [vmem:[#allocation7 + $0x1b8] sm:$0xff] }
0x133b   :  { %v9595_v41 = vpack.c.bf16 %v7418_v40, %v7417_v36  ;;  %v7100_v48 = vld [vmem:[#allocation2 + $0xf] ss:$16 sm:$0x3] }
0x133c   :  { %9805 = vtanh.f32 %v6694_v42  ;;  %v6775_v51 = vmul.f32 0.5, %v6765_v46  ;;  %v7419_v42 = vld [vmem:[#allocation7 + $0x1b0] sm:$0xff] }
0x133e   :  { %9807 = vtanh.f32 %v6775_v51  ;;  %v7102_v51 = vld [vmem:[#allocation3 + $0xf] ss:$16 sm:$0x3] }
0x1340   :  { %v9802_v54 = vpop.eup %9801 }
0x1341   :  { %v9804_v55 = vpop.eup %9803  ;;  %v6768_v56 = vadd.f32 1.0, %v9802_v54 }
0x1342   :  { %v6772_v57 = vadd.f32 1.0, %v9804_v55 }
0x1343   :  { %v6769_v58 = vmul.f32 0.5, %v6768_v56 }
0x1344   :  { %v6773_v61 = vmul.f32 0.5, %v6772_v57 }
0x1346   :  { %v9806_v62 = vpop.eup %9805  ;;  %v6779_v63 = vmul.f32 %v6773_v61, %v6467_v16 }
0x1347   :  { %v6780_v0 = vmul.f32 %v9806_v62, %v6769_v58 }
0x1348   :  { %v9808_v18 = vpop.eup %9807 }
0x1349   :  { %v6781_v1 = vadd.f32 %v6780_v0, %v6779_v63  ;;  %v6777_v24 = vadd.f32 1.0, %v9808_v18  ;;  %v7104_v63 = vld [vmem:[#allocation4 + $0xf] ss:$16 sm:$0x3] }
0x134b   :  { %9809 = vtanh.f32 %v6781_v1  ;;  %v6778_v2 = vmul.f32 0.5, %v6777_v24  ;;  %v7106_v24 = vld [vmem:[#allocation5 + $0xf] ss:$16 sm:$0x3] }
0x1355   :  { %v9810_v3 = vpop.eup %9809 }
0x1356   :  { %v6783_v4 = vmul.f32 %v9810_v3, %v6778_v2 }
0x1358   :  { %6784 = vst.msk [vmem:[#allocation6 + $0x1a] sm:$0x3] %vm2701_vm12, %v6783_v4  ;;  %9056 = vmatmul.mubr.msk.f32.vlgmr.msra.gmra.mrb[68].mxu0 %vm2062_vm11, %v6783_v4  ;;  %9067 = vmatmul.mubr.msk.f32.vlgmr.msra.gmra.mrb[76].mxu1 %vm2062_vm11, %v6783_v4 }
0x1359   :  { %9561 = vmatpush3.bf16.msra.mxu0 %v10165_v52  ;;  %9567 = vmatpush3.bf16.msra.mxu1 %v10167_v53 }
0x135a   :  { %9562 = vmatprep.subr.bf16.mxu0 %v9867_v37  ;;  %9568 = vmatprep.subr.bf16.mxu1 %v9867_v37 }
0x135b   :  { %9077 = vmatprep.mubr.msk.f32.mxu0 %vm9868_vm10, %v9866_v17  ;;  %9088 = vmatprep.mubr.msk.f32.mxu1 %vm9868_vm10, %v9866_v17 }
0x135d   :  { %9564 = vmatpush3.bf16.msra.mxu0 %v10174_v59  ;;  %9570 = vmatpush3.bf16.msra.mxu1 %v10176_v60 }
0x135e   :  { %9571 = vmatprep.subr.bf16.mxu0 %v9867_v37  ;;  %9577 = vmatprep.subr.bf16.mxu1 %v9867_v37 }
0x1360   :  { %9078 = vmatmul.mubr.msk.f32.vlgmr.msra.gmra.mrb[70].mxu0 %vm2062_vm11, %v6783_v4  ;;  %9089 = vmatmul.mubr.msk.f32.vlgmr.msra.gmra.mrb[78].mxu1 %vm2062_vm11, %v6783_v4 }
0x1361   :  { %9573 = vmatpush3.bf16.msra.mxu0 %v10126_v39  ;;  %9579 = vmatpush3.bf16.msra.mxu1 %v10128_v44  ;;  %v6786_v39 = vld [vmem:[#allocation2 + $0xe] ss:$16 sm:$0x3] }
0x1362   :  { %9574 = vmatprep.subr.bf16.mxu0 %v9867_v37  ;;  %9580 = vmatprep.subr.bf16.mxu1 %v9867_v37 }
0x1363   :  { %9099 = vmatprep.mubr.msk.f32.mxu0 %vm9868_vm10, %v9866_v17  ;;  %9110 = vmatprep.mubr.msk.f32.mxu1 %vm9868_vm10, %v9866_v17 }
0x1365   :  { %9576 = vmatpush3.bf16.msra.mxu0 %v10135_v49  ;;  %9582 = vmatpush3.bf16.msra.mxu1 %v10139_v50 }
0x1366   :  { %9583 = vmatprep.subr.bf16.mxu0 %v9867_v37  ;;  %9589 = vmatprep.subr.bf16.mxu1 %v9867_v37 }
0x142b   :  { %v6862_v44 = vpop.f32.mrb[68].mxu0  ;;  %v6933_v32 = vpop.f32.mrb[76].mxu1 }
0x142c   :  { %v6866_v38 = vadd.f32 %v6862_v44, %v6786_v39  ;;  %v6937_v43 = vadd.f32 %v6933_v32, %v6788_v5  ;;  %v9057_v6 = vpop.f32.mrb[69].mxu0  ;;  %v9068_v7 = vpop.f32.mrb[77].mxu1  ;;  %v7819_v44 = vld [vmem:[#allocation7 + $0x1c0] ss:$0 sm:$0xff] }
0x142e   :  { %v7080_v8 = vmul.f32 0.5, %v6866_v38  ;;  %v7084_v9 = vmul.f32 0.5, %v6937_v43 }
0x1430   :  { %9811 = vtanh.f32 %v7080_v8 }
0x1431   :  { %9813 = vtanh.f32 %v7084_v9 }
0x1433   :  { %v7004_v49 = vpop.f32.mrb[70].mxu0  ;;  %v7075_v11 = vpop.f32.mrb[78].mxu1 }
0x1434   :  { %v7008_v50 = vadd.f32 %v7004_v49, %v6790_v10  ;;  %v9079_v13 = vpop.f32.mrb[71].mxu0  ;;  %v9090_v14 = vpop.f32.mrb[79].mxu1  ;;  %v7079_v15 = vadd.f32 %v7075_v11, %v6792_v12 }
0x1436   :  { %9815 = vtanh.f32 %v7008_v50  ;;  %v7089_v16 = vmul.f32 0.5, %v7079_v15 }
0x1438   :  { %9817 = vtanh.f32 %v7089_v16 }
0x143a   :  { %v9812_v19 = vpop.eup %9811 }
0x143b   :  { %v9814_v20 = vpop.eup %9813  ;;  %v7082_v21 = vadd.f32 1.0, %v9812_v19 }
0x143c   :  { %v7086_v22 = vadd.f32 1.0, %v9814_v20 }
0x143d   :  { %v7083_v23 = vmul.f32 0.5, %v7082_v21 }
0x143e   :  { %v7087_v25 = vmul.f32 0.5, %v7086_v22 }
0x1440   :  { %v9816_v26 = vpop.eup %9815  ;;  %v7093_v27 = vmul.f32 %v7087_v25, %v6781_v1  ;;  %v7824_v25 = vld [vmem:[#allocation7 + $0x1d8] ss:$0 sm:$0xff] }
0x1441   :  { %v7094_v28 = vmul.f32 %v9816_v26, %v7083_v23 }
0x1442   :  { %v9818_v30 = vpop.eup %9817 }
0x1443   :  { %v10580_v29 = vadd.f32 %v7094_v28, %v7093_v27  ;;  %v7091_v31 = vadd.f32 1.0, %v9818_v30 }
0x1445   :  { %9819 = vtanh.f32 %v10580_v29  ;;  %v7092_v33 = vmul.f32 0.5, %v7091_v31 }
0x144f   :  { %v9820_v34 = vpop.eup %9819 }
0x1450   :  { %v7097_v35 = vmul.f32 %v9820_v34, %v7092_v33 }
0x1452   :  { %7098 = vst.msk [vmem:[#allocation6 + $0x1c] sm:$0x3] %vm2701_vm12, %v7097_v35  ;;  %9100 = vmatmul.mubr.msk.f32.vlgmr.msra.gmra.mrb[72].mxu0 %vm2062_vm11, %v7097_v35  ;;  %9111 = vmatmul.mubr.msk.f32.vlgmr.msra.gmra.mrb[80].mxu1 %vm2062_vm11, %v7097_v35 }
0x1453   :  { %9585 = vmatpush3.bf16.msra.mxu0 %v10165_v52  ;;  %9591 = vmatpush3.bf16.msra.mxu1 %v10167_v53  ;;  %v9599_v52 = vpack.c.bf16 %v7420_v45, %v7419_v42  ;;  %v7414_v53 = vld [vmem:[#allocation6 + $0x8] sm:$0xff] }
0x1454   :  { %9586 = vmatprep.subr.bf16.mxu0 %v9867_v37  ;;  %9592 = vmatprep.subr.bf16.mxu1 %v9867_v37  ;;  %v7413_v37 = vld [vmem:[#allocation6] sm:$0xff] }
0x1455   :  { %9121 = vmatprep.mubr.msk.f32.mxu0 %vm9868_vm10, %v9866_v17  ;;  %9132 = vmatprep.mubr.msk.f32.mxu1 %vm9868_vm10, %v9866_v17  ;;  %v7415_v17 = vld [vmem:[#allocation6 + $0x10] sm:$0xff] }
0x1457   :  { %9588 = vmatpush3.bf16.msra.mxu0 %v10174_v59  ;;  %9594 = vmatpush3.bf16.msra.mxu1 %v10176_v60  ;;  %v7527_v59 = vld [vmem:[#allocation7 + $0x1c8] sm:$0xff]  ;;  %v7528_v60 = vld [vmem:[#allocation7 + $0x1d0] sm:$0xff] }
0x1458   :  { %9596 = vmatprep.subr.bf16.mxu0 %v9595_v41  ;;  %v9603_v47 = vpack.c.bf16 %v7528_v60, %v7527_v59 }
0x145a   :  { %9122 = vmatmul.mubr.msk.f32.vlgmr.msra.gmra.mrb[74].mxu0 %vm2062_vm11, %v7097_v35  ;;  %9133 = vmatmul.mubr.msk.f32.vlgmr.msra.gmra.mrb[82].mxu1 %vm2062_vm11, %v7097_v35 }
0x145b   :  { %9598 = vmatpush3.bf16.msra.mxu0 %v9595_v41  ;;  %9143 = vmatprep.mubr.msk.f32.mxu0 %vm2062_vm11, %v7413_v37 }
0x145c   :  { %9600 = vmatprep.subr.bf16.mxu0 %v9599_v52  ;;  %9604 = vmatprep.subr.bf16.mxu1 %v9603_v47 }
0x145d   :  { %9606 = vmatpush3.bf16.msra.mxu1 %v9603_v47 }
0x145f   :  { %9602 = vmatpush3.bf16.msra.mxu0 %v9599_v52 }
0x1462   :  { %9144 = vmatmul.mubr.msk.f32.vlgmr.msra.gmra.mrb[76].mxu0 %vm2062_vm11, %v7414_v53 }
0x1463   :  { %9146 = vmatprep.mubr.msk.f32.mxu0 %vm2062_vm11, %v7415_v17 }
0x1525   :  { %v7176_v46 = vpop.f32.mrb[72].mxu0  ;;  %v7247_v54 = vpop.f32.mrb[80].mxu1 }
0x1526   :  { %v7180_v55 = vadd.f32 %v7176_v46, %v7100_v48  ;;  %v7251_v56 = vadd.f32 %v7247_v54, %v7102_v51  ;;  %v9101_v57 = vpop.f32.mrb[73].mxu0  ;;  %v9112_v58 = vpop.f32.mrb[81].mxu1 }
0x1528   :  { %v7394_v61 = vmul.f32 0.5, %v7180_v55  ;;  %v7398_v62 = vmul.f32 0.5, %v7251_v56 }
0x152a   :  { %9821 = vtanh.f32 %v7394_v61 }
0x152b   :  { %9823 = vtanh.f32 %v7398_v62 }
0x152d   :  { %v7318_v0 = vpop.f32.mrb[74].mxu0  ;;  %v7389_v1 = vpop.f32.mrb[82].mxu1 }
0x152e   :  { %v7322_v18 = vadd.f32 %v7318_v0, %v7104_v63  ;;  %v9123_v2 = vpop.f32.mrb[75].mxu0  ;;  %v9134_v3 = vpop.f32.mrb[83].mxu1  ;;  %v7393_v4 = vadd.f32 %v7389_v1, %v7106_v24 }
0x1530   :  { %9825 = vtanh.f32 %v7322_v18  ;;  %v7403_v39 = vmul.f32 0.5, %v7393_v4 }
0x1532   :  { %9827 = vtanh.f32 %v7403_v39 }
0x1534   :  { %v9822_v5 = vpop.eup %9821 }
0x1535   :  { %v9824_v32 = vpop.eup %9823  ;;  %v7396_v38 = vadd.f32 1.0, %v9822_v5  ;;  %v9145_v43 = vpop.f32.mrb[76].mxu0 }
0x1536   :  { %v7400_v6 = vadd.f32 1.0, %v9824_v32  ;;  %v7510_v7 = vadd.f32 %v9145_v43, %v7819_v44  ;;  %v7504_v8 = vpop.f32.mrb[77].mxu0 }
0x1537   :  { %v7397_v9 = vmul.f32 0.5, %v7396_v38  ;;  %v7505_v10 = vadd.f32 %v7819_v44, %v7504_v8 }
0x1538   :  { %v7401_v49 = vmul.f32 0.5, %v7400_v6  ;;  %v7524_v13 = vmax.f32 %v7510_v7, 0.0 }
0x1539   :  { %v7523_v11 = vmax.f32 %v7505_v10, 0.0 }
0x153a   :  { %v9826_v50 = vpop.eup %9825  ;;  %v7407_v12 = vmul.f32 %v7401_v49, %v10580_v29 }
0x153b   :  { %v7408_v14 = vmul.f32 %v9826_v50, %v7397_v9  ;;  %9153 = vmatprep.mubr.msk.f32.mxu1 %vm877_vm9, %v7523_v11 }
0x153c   :  { %9154 = vmatmul.mubr.msk.f32.vlgmr.msra.gmra.mrb[84].mxu1 %vm877_vm9, %v7524_v13  ;;  %v9828_v16 = vpop.eup %9827 }
0x153d   :  { %v7409_v15 = vadd.f32 %v7408_v14, %v7407_v12  ;;  %v7405_v19 = vadd.f32 1.0, %v9828_v16 }
0x153f   :  { %9829 = vtanh.f32 %v7409_v15  ;;  %v7406_v20 = vmul.f32 0.5, %v7405_v19 }
0x1549   :  { %v9830_v21 = vpop.eup %9829 }
0x154a   :  { %v7411_v22 = vmul.f32 %v9830_v21, %v7406_v20 }
0x154c   :  { %7412 = vst.msk [vmem:[#allocation6 + $0x1e] sm:$0x3] %vm2701_vm12, %v7411_v22 }
0x1553   :  { %v7416_v23 = vld [vmem:[#allocation6 + $0x18] sm:$0xff] }
0x1554   :  { %9147 = vmatmul.mubr.msk.f32.gmra.mrb[78].mxu0 %vm2062_vm11, %v7416_v23 }
0x160f   :  { %v9155_v26 = vpop.f32.mrb[84].mxu1 }
0x1610   :  { %v7618_v27 = vadd.f32 %v9155_v26, %v7824_v25  ;;  %v7612_v28 = vpop.f32.mrb[85].mxu1 }
0x1611   :  { %v7613_v29 = vadd.f32 %v7824_v25, %v7612_v28 }
0x1612   :  { %v7632_v30 = vmax.f32 %v7618_v27, 0.0 }
0x1613   :  { %v7631_v31 = vmax.f32 %v7613_v29, 0.0 }
0x1614   :  { %v7636_v33 = vmul.f32 0.5, %v7632_v30 }
0x1615   :  { %v7635_v34 = vmul.f32 0.5, %v7631_v31 }
0x1616   :  { %9831 = vtanh.f32 %v7636_v33 }
0x1617   :  { %9833 = vtanh.f32 %v7635_v34 }
0x1620   :  { %v9832_v35 = vpop.eup %9831 }
0x1621   :  { %v9834_v36 = vpop.eup %9833  ;;  %v7644_v40 = vadd.f32 1.0, %v9832_v35 }
0x1622   :  { %v7643_v41 = vadd.f32 1.0, %v9834_v36 }
0x1623   :  { %v7648_v42 = vmul.f32 0.5, %v7644_v40 }
0x1624   :  { %v7647_v45 = vmul.f32 0.5, %v7643_v41 }
0x1625   :  { %7653 = vst.msk [vmem:[%s10626_s2 + $0x8] sm:$0xff] %vm7651_vm13, %v7648_v42 }
0x1626   :  { %7652 = vst.msk [vmem:[%s10626_s2] sm:$0xff] %vm7651_vm13, %v7647_v45 }
0x1627   :  { %v9148_v52 = vpop.f32.mrb[78].mxu0 }
0x1628   :  { %v7520_v37 = vadd.f32 %v9148_v52, %v7819_v44  ;;  %v7514_v53 = vpop.f32.mrb[79].mxu0 }
0x1629   :  { %v7515_v17 = vadd.f32 %v7819_v44, %v7514_v53 }
0x162a   :  { %v7526_v60 = vmax.f32 %v7520_v37, 0.0 }
0x162b   :  { %v7525_v59 = vmax.f32 %v7515_v17, 0.0 }
0x162d   :  { %9156 = vmatprep.mubr.msk.f32.mxu1 %vm877_vm9, %v7525_v59 }
0x162e   :  { %9157 = vmatmul.mubr.msk.f32.gmra.mrb[86].mxu1 %vm877_vm9, %v7526_v60 }
0x1701   :  { %v9158_v47 = vpop.f32.mrb[86].mxu1 }
0x1702   :  { %v7628_v48 = vadd.f32 %v9158_v47, %v7824_v25  ;;  %v7622_v46 = vpop.f32.mrb[87].mxu1 }
0x1703   :  { %v7623_v51 = vadd.f32 %v7824_v25, %v7622_v46 }
0x1704   :  { %v7634_v54 = vmax.f32 %v7628_v48, 0.0 }
0x1705   :  { %v7633_v55 = vmax.f32 %v7623_v51, 0.0 }
0x1706   :  { %v7638_v56 = vmul.f32 0.5, %v7634_v54 }
0x1707   :  { %v7637_v57 = vmul.f32 0.5, %v7633_v55 }
0x1708   :  { %9835 = vtanh.f32 %v7638_v56 }
0x1709   :  { %9837 = vtanh.f32 %v7637_v57 }
0x1712   :  { %v9836_v58 = vpop.eup %9835 }
0x1713   :  { %v9838_v61 = vpop.eup %9837  ;;  %v7646_v62 = vadd.f32 1.0, %v9836_v58 }
0x1714   :  { %v7645_v63 = vadd.f32 1.0, %v9838_v61 }
0x1715   :  { %v7650_v0 = vmul.f32 0.5, %v7646_v62 }
0x1716   :  { %v7649_v1 = vmul.f32 0.5, %v7645_v63 }
0x1717   :  { %7655 = vst.msk [vmem:[%s10626_s2 + $0x18] sm:$0xff] %vm7651_vm13, %v7650_v0 }
0x1718   :  { %7654 = vst.msk [vmem:[%s10626_s2 + $0x10] sm:$0xff] %vm7651_vm13, %v7649_v1 }
0x1719   :  { %7660 = vsyncpa [#allocation8], 1 }

</bundles_post_ra>
